<compile_context>
chip_gen: v5e
topology: v5e:2x2
jax: 0.10.0
libtpu: 0.0.40
codegen_flags: <defaults>
</compile_context>

<pallas_src>
import jax
import jax.numpy as jnp
from jax.experimental import pallas as pl
from jax.experimental.pallas import tpu as pltpu

EPS = 1e-5      # PyTorch BatchNorm2d default
PAD_L = 8       # sublane-aligned left halo offset for the W axis of scratches
PAD_R = 8       # right halo width (only 1 column is read; 8 keeps stores aligned)


def _block_kernel(x_ref, w1_ref, bn1_ref, w2_ref, bn2_ref, o_ref,
                  xp_ref, a1p_ref):
    """Fused double (3x3 conv + folded BN + ReLU) for one batch element.

    x_ref:   (1, H, W, Cin)    bf16   input tile (unpadded)
    w1_ref:  (9*Cin, Cout)     bf16   conv1 weight, rows ordered (ky, kx, cin)
    bn1_ref: (2, Cout)         f32    row 0 = scale, row 1 = shift
    w2_ref:  (9*Cout, Cout)    bf16   conv2 weight
    bn2_ref: (2, Cout)         f32
    o_ref:   (1, H, W, Cout)   f32
    xp_ref:  (H+2, W+16, Cin)  bf16   padded input scratch (halo lives in VMEM)
    a1p_ref: (H+2, W+16, Cout) bf16   padded stage-1 activation scratch
    """
    _, H, W, cin = x_ref.shape
    cout = o_ref.shape[-1]

    def zero_halo(ref):
        # Zero only the halo; interiors are fully overwritten before any read.
        h2, wp, c = ref.shape
        ref[:, :PAD_L, :] = jnp.zeros((h2, PAD_L, c), ref.dtype)
        ref[:, PAD_L + W:, :] = jnp.zeros((h2, wp - PAD_L - W, c), ref.dtype)
        ref[0:1, PAD_L:PAD_L + W, :] = jnp.zeros((1, W, c), ref.dtype)
        ref[h2 - 1:h2, PAD_L:PAD_L + W, :] = jnp.zeros((1, W, c), ref.dtype)

    zero_halo(xp_ref)
    zero_halo(a1p_ref)
    xp_ref[1:H + 1, PAD_L:PAD_L + W, :] = x_ref[0]          # already bf16

    def conv3x3(src_ref, w_ref, c):
        # Materialize the 3 dx-shifted column views once (the only
        # sublane-misaligned slices); row (dy) shifts are aligned slices.
        cols = []
        for dx in range(3):
            c0 = PAD_L - 1 + dx
            cols.append(src_ref[:, c0:c0 + W, :].reshape((H + 2) * W, c))
        # im2col: all 9 taps concatenated along K -> ONE MXU matmul, K = 9*c.
        taps = [cols[dx][dy * W:dy * W + H * W, :]
                for dy in range(3) for dx in range(3)]
        patch = jnp.concatenate(taps, axis=-1)               # (H*W, 9*c) bf16
        return jnp.dot(patch, w_ref[...],
                       preferred_element_type=jnp.float32)   # f32 accumulate

    # Stage 1: conv -> folded BN -> ReLU (f32) -> bf16 into padded scratch.
    y1 = conv3x3(xp_ref, w1_ref, cin)
    y1 = jnp.maximum(y1 * bn1_ref[0] + bn1_ref[1], 0.0)
    a1p_ref[1:H + 1, PAD_L:PAD_L + W, :] = (
        y1.reshape(H, W, cout).astype(a1p_ref.dtype))

    # Stage 2: conv -> folded BN -> ReLU -> block output (f32).
    y2 = conv3x3(a1p_ref, w2_ref, cout)
    y2 = jnp.maximum(y2 * bn2_ref[0] + bn2_ref[1], 0.0)
    o_ref[...] = y2.reshape(1, H, W, cout).astype(o_ref.dtype)


def block_forward(x_nchw, params):
    """Equivalent of Block.forward.  Input/output are NCHW like PyTorch."""
    x = jnp.transpose(x_nchw, (0, 2, 3, 1)).astype(jnp.bfloat16)  # NCHW->NHWC
    N, H, W, Cin = x.shape
    Cout = params["w1"].shape[-1]

    def fold_bn(gamma, beta, mean, var):
        scale = gamma / jnp.sqrt(var + EPS)
        return jnp.stack([scale, beta - mean * scale]).astype(jnp.float32)

    bn1 = fold_bn(params["gamma1"], params["beta1"],
                  params["mean1"], params["var1"])
    bn2 = fold_bn(params["gamma2"], params["beta2"],
                  params["mean2"], params["var2"])
    # (3,3,Ci,Co) -> (9*Ci, Co); row order (ky, kx, ci) matches the kernel's
    # tap-concatenation order.
    w1 = params["w1"].reshape(9 * Cin, Cout).astype(jnp.bfloat16)
    w2 = params["w2"].reshape(9 * Cout, Cout).astype(jnp.bfloat16)

    flops = 2 * N * H * W * 9 * (Cin * Cout + Cout * Cout)
    bytes_accessed = (x.size * 2 + N * H * W * Cout * 4
                      + w1.size * 2 + w2.size * 2 + bn1.size * 4 + bn2.size * 4)

    out = pl.pallas_call(
        _block_kernel,
        out_shape=jax.ShapeDtypeStruct((N, H, W, Cout), jnp.float32),
        grid=(N,),
        in_specs=[
            pl.BlockSpec((1, H, W, Cin), lambda n: (n, 0, 0, 0)),
            pl.BlockSpec((9 * Cin, Cout), lambda n: (0, 0)),
            pl.BlockSpec((2, Cout), lambda n: (0, 0)),
            pl.BlockSpec((9 * Cout, Cout), lambda n: (0, 0)),
            pl.BlockSpec((2, Cout), lambda n: (0, 0)),
        ],
        out_specs=pl.BlockSpec((1, H, W, Cout), lambda n: (n, 0, 0, 0)),
        scratch_shapes=[
            pltpu.VMEM((H + 2, W + PAD_L + PAD_R, Cin), jnp.bfloat16),
            pltpu.VMEM((H + 2, W + PAD_L + PAD_R, Cout), jnp.bfloat16),
        ],
        compiler_params=pltpu.CompilerParams(
            dimension_semantics=("parallel",)),
        cost_estimate=pl.CostEstimate(flops=flops, transcendentals=0,
                                      bytes_accessed=bytes_accessed),
    )(x, w1, bn1, w2, bn2)
    return jnp.transpose(out, (0, 3, 1, 2))      # NHWC -> NCHW


def init_params(key, in_channels, out_channels):
    k1, k2, k3, k4 = jax.random.split(key, 4)
    fan1 = in_channels * 9
    fan2 = out_channels * 9
    return {
        "w1": jax.random.normal(k1, (3, 3, in_channels, out_channels),
                                jnp.float32) / jnp.sqrt(fan1),
        "gamma1": 1.0 + 0.1 * jax.random.normal(k2, (out_channels,), jnp.float32),
        "beta1": 0.1 * jax.random.normal(k3, (out_channels,), jnp.float32),
        "mean1": jnp.zeros((out_channels,), jnp.float32),
        "var1": jnp.ones((out_channels,), jnp.float32),
        "w2": jax.random.normal(k4, (3, 3, out_channels, out_channels),
                                jnp.float32) / jnp.sqrt(fan2),
        "gamma2": 1.0 + 0.05 * jnp.arange(out_channels, dtype=jnp.float32),
        "beta2": 0.01 * jnp.arange(out_channels, dtype=jnp.float32),
        "mean2": jnp.zeros((out_channels,), jnp.float32),
        "var2": jnp.ones((out_channels,), jnp.float32),
    }


def block_forward_ref(x_nchw, params):
    """Pure-JAX reference (lax conv) matching the kernel's numerics: bf16
    inputs/weights/stage-1 intermediate, f32 accumulation and BN/ReLU."""
    def bf16_round(v):
        return v.astype(jnp.bfloat16).astype(jnp.float32)

    def stage(x, w, gamma, beta, mean, var):
        y = jax.lax.conv_general_dilated(
            bf16_round(x), bf16_round(w), window_strides=(1, 1), padding="SAME",
            dimension_numbers=("NHWC", "HWIO", "NHWC"),
            preferred_element_type=jnp.float32)
        scale = gamma / jnp.sqrt(var + EPS)
        y = y * scale + (beta - mean * scale)
        return jnp.maximum(y, 0.0)

    x = jnp.transpose(x_nchw, (0, 2, 3, 1))
    p = params
    x = stage(x, p["w1"], p["gamma1"], p["beta1"], p["mean1"], p["var1"])
    x = stage(x, p["w2"], p["gamma2"], p["beta2"], p["mean2"], p["var2"])
    return jnp.transpose(x, (0, 3, 1, 2))


if __name__ == "__main__":
    N, Cin, Cout, H, W = 2, 4, 8, 16, 16

    key = jax.random.PRNGKey(0)
    kx, kp = jax.random.split(key)
    x = jax.random.normal(kx, (N, Cin, H, W), jnp.float32)  # NCHW like PyTorch
    params = init_params(kp, Cin, Cout)

    out = jax.block_until_ready(block_forward(x, params))
    assert out.shape == (N, Cout, H, W), out.shape

    ref = jax.block_until_ready(block_forward_ref(x, params))
    assert jnp.allclose(out, ref, rtol=1e-2, atol=1e-2), (
        float(jnp.max(jnp.abs(out - ref))))

    print("KERNEL_OK")
</pallas_src>

<mosaic_0001>
module attributes {stable_mosaic.version = 11 : i64} {
  func.func @_block_kernel(%arg0: i32, %arg1: memref<1x16x16x4xbf16, #tpu.memory_space<vmem>>, %arg2: memref<36x8xbf16, #tpu.memory_space<vmem>>, %arg3: memref<2x8xf32, #tpu.memory_space<vmem>>, %arg4: memref<72x8xbf16, #tpu.memory_space<vmem>>, %arg5: memref<2x8xf32, #tpu.memory_space<vmem>>, %arg6: memref<1x16x16x8xf32, #tpu.memory_space<vmem>>, %arg7: memref<18x32x4xbf16, #tpu.memory_space<vmem>>, %arg8: memref<18x32x8xbf16, #tpu.memory_space<vmem>>) attributes {dimension_semantics = [#tpu.dimension_semantics<parallel>], iteration_bounds = array<i64: 2>, scalar_prefetch = 0 : i64, scratch_operands = 2 : i64, tpu.core_type = #tpu.core_type<tc>, window_params = [{transform_indices = @transform_0, window_bounds = array<i64: 1, 16, 16, 4>}, {pipeline_mode = #tpu.pipeline_mode<synchronous>, transform_indices = @transform_1, window_bounds = array<i64: 36, 8>}, {pipeline_mode = #tpu.pipeline_mode<synchronous>, transform_indices = @transform_2, window_bounds = array<i64: 2, 8>}, {pipeline_mode = #tpu.pipeline_mode<synchronous>, transform_indices = @transform_3, window_bounds = array<i64: 72, 8>}, {pipeline_mode = #tpu.pipeline_mode<synchronous>, transform_indices = @transform_4, window_bounds = array<i64: 2, 8>}, {transform_indices = @transform_5, window_bounds = array<i64: 1, 16, 16, 8>}]} {
    %cst = arith.constant 0.000000e+00 : bf16
    %0 = vector.broadcast %cst : bf16 to vector<18x8x4xbf16>
    %c0 = arith.constant 0 : index
    %c0_0 = arith.constant 0 : index
    %c0_1 = arith.constant 0 : index
    %1 = vector.load %arg7[%c0, %c0_0, %c0_1] : memref<18x32x4xbf16, #tpu.memory_space<vmem>>, vector<18x8x4xbf16>
    tpu.vector_store %arg7[%c0, %c0_0, %c0_1], %0 {strides = array<i32>} : memref<18x32x4xbf16, #tpu.memory_space<vmem>>, vector<18x8x4xbf16>,
    %cst_2 = arith.constant 0.000000e+00 : bf16
    %2 = vector.broadcast %cst_2 : bf16 to vector<18x8x4xbf16>
    %c0_3 = arith.constant 0 : index
    %c24 = arith.constant 24 : index
    %c0_4 = arith.constant 0 : index
    %3 = vector.load %arg7[%c0_3, %c24, %c0_4] : memref<18x32x4xbf16, #tpu.memory_space<vmem>>, vector<18x8x4xbf16>
    tpu.vector_store %arg7[%c0_3, %c24, %c0_4], %2 {strides = array<i32>} : memref<18x32x4xbf16, #tpu.memory_space<vmem>>, vector<18x8x4xbf16>,
    %cst_5 = arith.constant 0.000000e+00 : bf16
    %4 = vector.broadcast %cst_5 : bf16 to vector<1x16x4xbf16>
    %c0_6 = arith.constant 0 : index
    %c8 = arith.constant 8 : index
    %c0_7 = arith.constant 0 : index
    %5 = vector.load %arg7[%c0_6, %c8, %c0_7] : memref<18x32x4xbf16, #tpu.memory_space<vmem>>, vector<1x16x4xbf16>
    tpu.vector_store %arg7[%c0_6, %c8, %c0_7], %4 {strides = array<i32>} : memref<18x32x4xbf16, #tpu.memory_space<vmem>>, vector<1x16x4xbf16>,
    %cst_8 = arith.constant 0.000000e+00 : bf16
    %6 = vector.broadcast %cst_8 : bf16 to vector<1x16x4xbf16>
    %c17 = arith.constant 17 : index
    %c8_9 = arith.constant 8 : index
    %c0_10 = arith.constant 0 : index
    %7 = vector.load %arg7[%c17, %c8_9, %c0_10] : memref<18x32x4xbf16, #tpu.memory_space<vmem>>, vector<1x16x4xbf16>
    tpu.vector_store %arg7[%c17, %c8_9, %c0_10], %6 {strides = array<i32>} : memref<18x32x4xbf16, #tpu.memory_space<vmem>>, vector<1x16x4xbf16>,
    %cst_11 = arith.constant 0.000000e+00 : bf16
    %8 = vector.broadcast %cst_11 : bf16 to vector<18x8x8xbf16>
    %c0_12 = arith.constant 0 : index
    %c0_13 = arith.constant 0 : index
    %c0_14 = arith.constant 0 : index
    %9 = vector.load %arg8[%c0_12, %c0_13, %c0_14] : memref<18x32x8xbf16, #tpu.memory_space<vmem>>, vector<18x8x8xbf16>
    tpu.vector_store %arg8[%c0_12, %c0_13, %c0_14], %8 {strides = array<i32>} : memref<18x32x8xbf16, #tpu.memory_space<vmem>>, vector<18x8x8xbf16>,
    %cst_15 = arith.constant 0.000000e+00 : bf16
    %10 = vector.broadcast %cst_15 : bf16 to vector<18x8x8xbf16>
    %c0_16 = arith.constant 0 : index
    %c24_17 = arith.constant 24 : index
    %c0_18 = arith.constant 0 : index
    %11 = vector.load %arg8[%c0_16, %c24_17, %c0_18] : memref<18x32x8xbf16, #tpu.memory_space<vmem>>, vector<18x8x8xbf16>
    tpu.vector_store %arg8[%c0_16, %c24_17, %c0_18], %10 {strides = array<i32>} : memref<18x32x8xbf16, #tpu.memory_space<vmem>>, vector<18x8x8xbf16>,
    %cst_19 = arith.constant 0.000000e+00 : bf16
    %12 = vector.broadcast %cst_19 : bf16 to vector<1x16x8xbf16>
    %c0_20 = arith.constant 0 : index
    %c8_21 = arith.constant 8 : index
    %c0_22 = arith.constant 0 : index
    %13 = vector.load %arg8[%c0_20, %c8_21, %c0_22] : memref<18x32x8xbf16, #tpu.memory_space<vmem>>, vector<1x16x8xbf16>
    tpu.vector_store %arg8[%c0_20, %c8_21, %c0_22], %12 {strides = array<i32>} : memref<18x32x8xbf16, #tpu.memory_space<vmem>>, vector<1x16x8xbf16>,
    %cst_23 = arith.constant 0.000000e+00 : bf16
    %14 = vector.broadcast %cst_23 : bf16 to vector<1x16x8xbf16>
    %c17_24 = arith.constant 17 : index
    %c8_25 = arith.constant 8 : index
    %c0_26 = arith.constant 0 : index
    %15 = vector.load %arg8[%c17_24, %c8_25, %c0_26] : memref<18x32x8xbf16, #tpu.memory_space<vmem>>, vector<1x16x8xbf16>
    tpu.vector_store %arg8[%c17_24, %c8_25, %c0_26], %14 {strides = array<i32>} : memref<18x32x8xbf16, #tpu.memory_space<vmem>>, vector<1x16x8xbf16>,
    %c0_27 = arith.constant 0 : index
    %c0_28 = arith.constant 0 : index
    %c0_29 = arith.constant 0 : index
    %c0_30 = arith.constant 0 : index
    %16 = vector.load %arg1[%c0_27, %c0_28, %c0_29, %c0_30] : memref<1x16x16x4xbf16, #tpu.memory_space<vmem>>, vector<1x16x16x4xbf16>
    %17 = vector.shape_cast %16 : vector<1x16x16x4xbf16> to vector<16x16x4xbf16>
    %c1 = arith.constant 1 : index
    %c8_31 = arith.constant 8 : index
    %c0_32 = arith.constant 0 : index
    %18 = vector.load %arg7[%c1, %c8_31, %c0_32] : memref<18x32x4xbf16, #tpu.memory_space<vmem>>, vector<16x16x4xbf16>
    tpu.vector_store %arg7[%c1, %c8_31, %c0_32], %17 {strides = array<i32>} : memref<18x32x4xbf16, #tpu.memory_space<vmem>>, vector<16x16x4xbf16>,
    %c0_33 = arith.constant 0 : index
    %c7 = arith.constant 7 : index
    %c0_34 = arith.constant 0 : index
    %19 = vector.load %arg7[%c0_33, %c7, %c0_34] : memref<18x32x4xbf16, #tpu.memory_space<vmem>>, vector<18x16x4xbf16>
    %20 = vector.shape_cast %19 : vector<18x16x4xbf16> to vector<288x4xbf16>
    %c0_35 = arith.constant 0 : index
    %c8_36 = arith.constant 8 : index
    %c0_37 = arith.constant 0 : index
    %21 = vector.load %arg7[%c0_35, %c8_36, %c0_37] : memref<18x32x4xbf16, #tpu.memory_space<vmem>>, vector<18x16x4xbf16>
    %22 = vector.shape_cast %21 : vector<18x16x4xbf16> to vector<288x4xbf16>
    %c0_38 = arith.constant 0 : index
    %c9 = arith.constant 9 : index
    %c0_39 = arith.constant 0 : index
    %23 = vector.load %arg7[%c0_38, %c9, %c0_39] : memref<18x32x4xbf16, #tpu.memory_space<vmem>>, vector<18x16x4xbf16>
    %24 = vector.shape_cast %23 : vector<18x16x4xbf16> to vector<288x4xbf16>
    %25 = vector.extract_strided_slice %20 {offsets = [0, 0], sizes = [256, 4], strides = [1, 1]} : vector<288x4xbf16> to vector<256x4xbf16>
    %26 = vector.extract_strided_slice %22 {offsets = [0, 0], sizes = [256, 4], strides = [1, 1]} : vector<288x4xbf16> to vector<256x4xbf16>
    %27 = vector.extract_strided_slice %24 {offsets = [0, 0], sizes = [256, 4], strides = [1, 1]} : vector<288x4xbf16> to vector<256x4xbf16>
    %28 = vector.extract_strided_slice %20 {offsets = [16, 0], sizes = [256, 4], strides = [1, 1]} : vector<288x4xbf16> to vector<256x4xbf16>
    %29 = vector.extract_strided_slice %22 {offsets = [16, 0], sizes = [256, 4], strides = [1, 1]} : vector<288x4xbf16> to vector<256x4xbf16>
    %30 = vector.extract_strided_slice %24 {offsets = [16, 0], sizes = [256, 4], strides = [1, 1]} : vector<288x4xbf16> to vector<256x4xbf16>
    %31 = vector.extract_strided_slice %20 {offsets = [32, 0], sizes = [256, 4], strides = [1, 1]} : vector<288x4xbf16> to vector<256x4xbf16>
    %32 = vector.extract_strided_slice %22 {offsets = [32, 0], sizes = [256, 4], strides = [1, 1]} : vector<288x4xbf16> to vector<256x4xbf16>
    %33 = vector.extract_strided_slice %24 {offsets = [32, 0], sizes = [256, 4], strides = [1, 1]} : vector<288x4xbf16> to vector<256x4xbf16>
    %34 = tpu.concatenate %25, %26, %27, %28, %29, %30, %31, %32, %33 in 1 : vector<256x4xbf16>, vector<256x4xbf16>, vector<256x4xbf16>, vector<256x4xbf16>, vector<256x4xbf16>, vector<256x4xbf16>, vector<256x4xbf16>, vector<256x4xbf16>, vector<256x4xbf16> -> vector<256x36xbf16>
    %c0_40 = arith.constant 0 : index
    %c0_41 = arith.constant 0 : index
    %35 = vector.load %arg2[%c0_40, %c0_41] : memref<36x8xbf16, #tpu.memory_space<vmem>>, vector<36x8xbf16>
    %cst_42 = arith.constant dense<0.000000e+00> : vector<256x8xf32>
    %36 = tpu.matmul %34, %35, %cst_42 {dimension_numbers = #tpu.dot_dimension_numbers<[1], [0], [0], [1], [0, 0, 1, 1], [], []>} : vector<256x36xbf16>, vector<36x8xbf16>, vector<256x8xf32> -> vector<256x8xf32>
    %c0_43 = arith.constant 0 : index
    %c0_44 = arith.constant 0 : index
    %37 = vector.load %arg3[%c0_43, %c0_44] : memref<2x8xf32, #tpu.memory_space<vmem>>, vector<1x8xf32>
    %38 = vector.shape_cast %37 : vector<1x8xf32> to vector<8xf32>
    %39 = vector.shape_cast %38 : vector<8xf32> to vector<1x8xf32>
    %40 = vector.broadcast %39 : vector<1x8xf32> to vector<256x8xf32>
    %41 = arith.mulf %36, %40 : vector<256x8xf32>
    %c1_45 = arith.constant 1 : index
    %c0_46 = arith.constant 0 : index
    %42 = vector.load %arg3[%c1_45, %c0_46] : memref<2x8xf32, #tpu.memory_space<vmem>>, vector<1x8xf32>
    %43 = vector.shape_cast %42 : vector<1x8xf32> to vector<8xf32>
    %44 = vector.shape_cast %43 : vector<8xf32> to vector<1x8xf32>
    %45 = vector.broadcast %44 : vector<1x8xf32> to vector<256x8xf32>
    %46 = arith.addf %41, %45 : vector<256x8xf32>
    %cst_47 = arith.constant 0.000000e+00 : f32
    %47 = vector.broadcast %cst_47 : f32 to vector<256x8xf32>
    %48 = arith.maximumf %46, %47 : vector<256x8xf32>
    %49 = vector.shape_cast %48 : vector<256x8xf32> to vector<16x16x8xf32>
    %50 = arith.truncf %49 : vector<16x16x8xf32> to vector<16x16x8xbf16>
    %c1_48 = arith.constant 1 : index
    %c8_49 = arith.constant 8 : index
    %c0_50 = arith.constant 0 : index
    %51 = vector.load %arg8[%c1_48, %c8_49, %c0_50] : memref<18x32x8xbf16, #tpu.memory_space<vmem>>, vector<16x16x8xbf16>
    tpu.vector_store %arg8[%c1_48, %c8_49, %c0_50], %50 {strides = array<i32>} : memref<18x32x8xbf16, #tpu.memory_space<vmem>>, vector<16x16x8xbf16>,
    %c0_51 = arith.constant 0 : index
    %c7_52 = arith.constant 7 : index
    %c0_53 = arith.constant 0 : index
    %52 = vector.load %arg8[%c0_51, %c7_52, %c0_53] : memref<18x32x8xbf16, #tpu.memory_space<vmem>>, vector<18x16x8xbf16>
    %53 = vector.shape_cast %52 : vector<18x16x8xbf16> to vector<288x8xbf16>
    %c0_54 = arith.constant 0 : index
    %c8_55 = arith.constant 8 : index
    %c0_56 = arith.constant 0 : index
    %54 = vector.load %arg8[%c0_54, %c8_55, %c0_56] : memref<18x32x8xbf16, #tpu.memory_space<vmem>>, vector<18x16x8xbf16>
    %55 = vector.shape_cast %54 : vector<18x16x8xbf16> to vector<288x8xbf16>
    %c0_57 = arith.constant 0 : index
    %c9_58 = arith.constant 9 : index
    %c0_59 = arith.constant 0 : index
    %56 = vector.load %arg8[%c0_57, %c9_58, %c0_59] : memref<18x32x8xbf16, #tpu.memory_space<vmem>>, vector<18x16x8xbf16>
    %57 = vector.shape_cast %56 : vector<18x16x8xbf16> to vector<288x8xbf16>
    %58 = vector.extract_strided_slice %53 {offsets = [0, 0], sizes = [256, 8], strides = [1, 1]} : vector<288x8xbf16> to vector<256x8xbf16>
    %59 = vector.extract_strided_slice %55 {offsets = [0, 0], sizes = [256, 8], strides = [1, 1]} : vector<288x8xbf16> to vector<256x8xbf16>
    %60 = vector.extract_strided_slice %57 {offsets = [0, 0], sizes = [256, 8], strides = [1, 1]} : vector<288x8xbf16> to vector<256x8xbf16>
    %61 = vector.extract_strided_slice %53 {offsets = [16, 0], sizes = [256, 8], strides = [1, 1]} : vector<288x8xbf16> to vector<256x8xbf16>
    %62 = vector.extract_strided_slice %55 {offsets = [16, 0], sizes = [256, 8], strides = [1, 1]} : vector<288x8xbf16> to vector<256x8xbf16>
    %63 = vector.extract_strided_slice %57 {offsets = [16, 0], sizes = [256, 8], strides = [1, 1]} : vector<288x8xbf16> to vector<256x8xbf16>
    %64 = vector.extract_strided_slice %53 {offsets = [32, 0], sizes = [256, 8], strides = [1, 1]} : vector<288x8xbf16> to vector<256x8xbf16>
    %65 = vector.extract_strided_slice %55 {offsets = [32, 0], sizes = [256, 8], strides = [1, 1]} : vector<288x8xbf16> to vector<256x8xbf16>
    %66 = vector.extract_strided_slice %57 {offsets = [32, 0], sizes = [256, 8], strides = [1, 1]} : vector<288x8xbf16> to vector<256x8xbf16>
    %67 = tpu.concatenate %58, %59, %60, %61, %62, %63, %64, %65, %66 in 1 : vector<256x8xbf16>, vector<256x8xbf16>, vector<256x8xbf16>, vector<256x8xbf16>, vector<256x8xbf16>, vector<256x8xbf16>, vector<256x8xbf16>, vector<256x8xbf16>, vector<256x8xbf16> -> vector<256x72xbf16>
    %c0_60 = arith.constant 0 : index
    %c0_61 = arith.constant 0 : index
    %68 = vector.load %arg4[%c0_60, %c0_61] : memref<72x8xbf16, #tpu.memory_space<vmem>>, vector<72x8xbf16>
    %cst_62 = arith.constant dense<0.000000e+00> : vector<256x8xf32>
    %69 = tpu.matmul %67, %68, %cst_62 {dimension_numbers = #tpu.dot_dimension_numbers<[1], [0], [0], [1], [0, 0, 1, 1], [], []>} : vector<256x72xbf16>, vector<72x8xbf16>, vector<256x8xf32> -> vector<256x8xf32>
    %c0_63 = arith.constant 0 : index
    %c0_64 = arith.constant 0 : index
    %70 = vector.load %arg5[%c0_63, %c0_64] : memref<2x8xf32, #tpu.memory_space<vmem>>, vector<1x8xf32>
    %71 = vector.shape_cast %70 : vector<1x8xf32> to vector<8xf32>
    %72 = vector.shape_cast %71 : vector<8xf32> to vector<1x8xf32>
    %73 = vector.broadcast %72 : vector<1x8xf32> to vector<256x8xf32>
    %74 = arith.mulf %69, %73 : vector<256x8xf32>
    %c1_65 = arith.constant 1 : index
    %c0_66 = arith.constant 0 : index
    %75 = vector.load %arg5[%c1_65, %c0_66] : memref<2x8xf32, #tpu.memory_space<vmem>>, vector<1x8xf32>
    %76 = vector.shape_cast %75 : vector<1x8xf32> to vector<8xf32>
    %77 = vector.shape_cast %76 : vector<8xf32> to vector<1x8xf32>
    %78 = vector.broadcast %77 : vector<1x8xf32> to vector<256x8xf32>
    %79 = arith.addf %74, %78 : vector<256x8xf32>
    %cst_67 = arith.constant 0.000000e+00 : f32
    %80 = vector.broadcast %cst_67 : f32 to vector<256x8xf32>
    %81 = arith.maximumf %79, %80 : vector<256x8xf32>
    %82 = vector.shape_cast %81 : vector<256x8xf32> to vector<1x16x16x8xf32>
    %c0_68 = arith.constant 0 : index
    %c0_69 = arith.constant 0 : index
    %c0_70 = arith.constant 0 : index
    %c0_71 = arith.constant 0 : index
    %83 = vector.load %arg6[%c0_68, %c0_69, %c0_70, %c0_71] : memref<1x16x16x8xf32, #tpu.memory_space<vmem>>, vector<1x16x16x8xf32>
    tpu.vector_store %arg6[%c0_68, %c0_69, %c0_70, %c0_71], %82 {strides = array<i32>} : memref<1x16x16x8xf32, #tpu.memory_space<vmem>>, vector<1x16x16x8xf32>,
    return
  }
  func.func @transform_0(%arg0: i32) -> (i32, i32, i32, i32) {
    %c0_i32 = arith.constant 0 : i32
    %c0_i32_0 = arith.constant 0 : i32
    %c0_i32_1 = arith.constant 0 : i32
    %c0_i32_2 = arith.constant 0 : i32
    return %arg0, %c0_i32, %c0_i32_0, %c0_i32_1 : i32, i32, i32, i32
  }
  func.func @transform_1(%arg0: i32) -> (i32, i32) {
    %c0_i32 = arith.constant 0 : i32
    %c0_i32_0 = arith.constant 0 : i32
    %c0_i32_1 = arith.constant 0 : i32
    return %c0_i32, %c0_i32_0 : i32, i32
  }
  func.func @transform_2(%arg0: i32) -> (i32, i32) {
    %c0_i32 = arith.constant 0 : i32
    %c0_i32_0 = arith.constant 0 : i32
    %c0_i32_1 = arith.constant 0 : i32
    return %c0_i32, %c0_i32_0 : i32, i32
  }
  func.func @transform_3(%arg0: i32) -> (i32, i32) {
    %c0_i32 = arith.constant 0 : i32
    %c0_i32_0 = arith.constant 0 : i32
    %c0_i32_1 = arith.constant 0 : i32
    return %c0_i32, %c0_i32_0 : i32, i32
  }
  func.func @transform_4(%arg0: i32) -> (i32, i32) {
    %c0_i32 = arith.constant 0 : i32
    %c0_i32_0 = arith.constant 0 : i32
    %c0_i32_1 = arith.constant 0 : i32
    return %c0_i32, %c0_i32_0 : i32, i32
  }
  func.func @transform_5(%arg0: i32) -> (i32, i32, i32, i32) {
    %c0_i32 = arith.constant 0 : i32
    %c0_i32_0 = arith.constant 0 : i32
    %c0_i32_1 = arith.constant 0 : i32
    %c0_i32_2 = arith.constant 0 : i32
    return %arg0, %c0_i32, %c0_i32_0, %c0_i32_1 : i32, i32, i32, i32
  }
}

</mosaic_0001>

<bundles_post_ra>
// kernel: tpu_custom_call.1
= control target key start
LH: loop header
LB: loop body
LE: loop exit
PB: predicated region body
PF: predicated region fallthrough
CT: control target
= control target key end

     0   :  { %s4347_s18 = smov 0   ;;  %s6974_s0 = inlined_call_operand.vmem [shape: bf16[2,16,16,4], index: 0, kind: input, shape index: {}]   ;;  %s6975_s1 = inlined_call_operand.vmem [shape: bf16[36,8], index: 1, kind: input, shape index: {}]   ;;  %s6976_s2 = inlined_call_operand.vmem [shape: f32[2,8], index: 2, kind: input, shape index: {}]   ;;  %s6977_s3 = inlined_call_operand.vmem [shape: bf16[72,8], index: 3, kind: input, shape index: {}]   ;;  %s6978_s4 = inlined_call_operand.vmem [shape: f32[2,8], index: 4, kind: input, shape index: {}]   ;;  %s6979_s5 = inlined_call_operand.vmem [shape: f32[2,16,16,8], index: 5, kind: output, shape index: {}]  }
   0x1 LB: > { %s3945_s19 = sadd.s32 4294967295, %s4302_s18   ;;  %p3949_p0 = scmp.ge.s32.totalorder %s4302_s18, 1  ;;  %s4302_s18 = sphi %s4347_s18, %s15_s18  }
   0x2   : > { %p187_p1 = scmp.lt.s32.totalorder %s4302_s18, 3 }
   0x4   : > { %p188_p2 = pnand %p3949_p0, %p187_p1 }
   0x6   : > { %191 = sbr.rel (%p188_p2) target bundleno = 1231 (0x4cf), region = 40 }
   0xb   : > { %vm226_vm0 = vcmask 27648   ;;  %v6980_v0 = vmov 0   ;;  %s4305_s20 = smov 4   ;;  %p215_p3 = scmp.lt.s32.totalorder %s3945_s19, 1  ;;  %vm846_vm1 = vsmask.f32 3328 }
   0xc   : > { %263 = vst.msk [vmem:[#allocation2 + $0x4] sm:$0xf] %vm226_vm0, %v6980_v0  ;;  %vm847_vm2 = vsmask.f32 7440  ;;  %s4306_s25 = smov 8   ;;  %s4307_s26 = smov 12  }
   0xd   : > { %264 = vst.msk [vmem:[#allocation2 + $0x8] sm:$0xf] %vm226_vm0, %v6980_v0  ;;  %s7217_s19 = smov (!%p215_p3, %s3945_s19), 1  ;;  %vm4521_vm3 = vmor %vm846_vm1, %vm847_vm2  ;;  %vm429_vm4 = vsmask.f32 256  ;;  %vm1555_vm7 = vcmask 31744  }
   0xe   : > { %227 = vst.msk [vmem:[#allocation2] sm:$0xf] %vm226_vm0, %v6980_v0  ;;  %s4192_s21 = sshll.u32 %s7217_s19, 7  ;;  %vm430_vm5 = vsmask.f32 4368  ;;  %s4308_s27 = smov 16  }
   0xf   : > { %228 = vst.msk [vmem:[#allocation2 + $0x10] sm:$0xf] %vm226_vm0, %v6980_v0  ;;  %s4436_s24 = scalar_lea.vmem %s6974_s0, %s4192_s21  ;;  %vm4913_vm6 = vmor %vm429_vm4, %vm430_vm5  ;;  %s4309_s28 = smov 20   ;;  %vm1888_vm8 = vcmask 1041408   ;;  %vm1637_vm9 = vcmask 97280   ;;  %vm1604_vm10 = vcmask 64512  }
  0x10   : > { %229 = vst.msk [vmem:[#allocation2 + $0x20] sm:$0xf] %vm226_vm0, %v6980_v0  ;;  %v316_v2 = vld [vmem:[%s4436_s24 + $0x18] sm:$0xf]  ;;  %v317_v3 = vld [vmem:[%s4436_s24 + $0x1c] sm:$0xf] }
  0x11   : > { %230 = vst.msk [vmem:[#allocation2 + $0x30] sm:$0xf] %vm226_vm0, %v6980_v0  ;;  %v312_v4 = vld [vmem:[%s4436_s24 + $0x8] sm:$0xf]  ;;  %v313_v5 = vld [vmem:[%s4436_s24 + $0xc] sm:$0xf] }
  0x12   : > { %231 = vst.msk [vmem:[#allocation2 + $0x40] sm:$0xf] %vm226_vm0, %v6980_v0  ;;  %v310_v6 = vld [vmem:[%s4436_s24] sm:$0xf]  ;;  %v311_v7 = vld [vmem:[%s4436_s24 + $0x4] sm:$0xf] }
  0x13   : > { %232 = vst.msk [vmem:[#allocation2 + $0x50] sm:$0xf] %vm226_vm0, %v6980_v0  ;;  %v318_v8 = vld [vmem:[%s4436_s24 + $0x20] sm:$0xf]  ;;  %v319_v9 = vld [vmem:[%s4436_s24 + $0x24] sm:$0xf] }
  0x14   : > { %v4194_v1 = vld [vmem:[#allocation2 + $0x4] sm:$0xff]  ;;  %233 = vst.msk [vmem:[#allocation2 + $0x60] sm:$0xf] %vm226_vm0, %v6980_v0  ;;  %v314_v10 = vld [vmem:[%s4436_s24 + $0x10] sm:$0xf]  ;;  %s4310_s29 = smov 28  }
  0x15   : > { %234 = vst.msk [vmem:[#allocation2 + $0x70] sm:$0xf] %vm226_vm0, %v6980_v0  ;;  %1229 = vrot.lane.b32.xlu0 %v4194_v1, %s4305_s20  ;;  %v315_v11 = vld [vmem:[%s4436_s24 + $0x14] sm:$0xf]  ;;  %v320_v12 = vld [vmem:[%s4436_s24 + $0x28] sm:$0xf] }
  0x16   : > { %235 = vst.msk [vmem:[#allocation2 + $0x80] sm:$0xf] %vm226_vm0, %v6980_v0  ;;  %v321_v13 = vld [vmem:[%s4436_s24 + $0x2c] sm:$0xf]  ;;  %v4467_v14 = vld [vmem:[#allocation2 + $0x4] sm:$0xf] }
  0x17   : > { %236 = vst.msk [vmem:[#allocation2 + $0x90] sm:$0xf] %vm226_vm0, %v6980_v0  ;;  %v4469_v15 = vld [vmem:[#allocation2 + $0x8] sm:$0xf]  ;;  %v324_v16 = vld [vmem:[%s4436_s24 + $0x38] sm:$0xf] }
  0x18   : > { %237 = vst.msk [vmem:[#allocation2 + $0xa0] sm:$0xf] %vm226_vm0, %v6980_v0  ;;  %v6984_v17 = vshrl.u32 %v4467_v14, 16  ;;  %v6982_v18 = vshll.u32 %v4467_v14, 16  ;;  %v6985_v19 = vshrl.u32 %v4469_v15, 16  ;;  %v6983_v20 = vshll.u32 %v4469_v15, 16 }
  0x19   : > { %238 = vst.msk [vmem:[#allocation2 + $0xb0] sm:$0xf] %vm226_vm0, %v6980_v0  ;;  %v325_v22 = vld [vmem:[%s4436_s24 + $0x3c] sm:$0xf]  ;;  %v322_v23 = vld [vmem:[%s4436_s24 + $0x30] sm:$0xf] }
  0x1a   : > { %239 = vst.msk [vmem:[#allocation2 + $0xc0] sm:$0xf] %vm226_vm0, %v6980_v0  ;;  %v849_v24 = vrot.slane %v6984_v17, 4  ;;  %v850_v25 = vrot.slane %v6982_v18, 5  ;;  %v4487_v26 = vrot.slane %v6983_v20, 5  ;;  %v855_v27 = vrot.slane %v6985_v19, 4 }
  0x1b   : > { %240 = vst.msk [vmem:[#allocation2 + $0xd0] sm:$0xf] %vm226_vm0, %v6980_v0  ;;  %v323_v29 = vld [vmem:[%s4436_s24 + $0x34] sm:$0xf]  ;;  %v326_v31 = vld [vmem:[%s4436_s24 + $0x40] sm:$0xf] }
  0x1c   : > { %241 = vst.msk [vmem:[#allocation2 + $0xe0] sm:$0xf] %vm226_vm0, %v6980_v0  ;;  %v851_v32 = vor.u32 %v850_v25, %v849_v24  ;;  %v856_v33 = vor.u32 %v855_v27, %v4487_v26  ;;  %v327_v37 = vld [vmem:[%s4436_s24 + $0x44] sm:$0xf]  ;;  %v330_v40 = vld [vmem:[%s4436_s24 + $0x50] sm:$0xf] }
  0x1d   : > { %242 = vst.msk [vmem:[#allocation2 + $0xf0] sm:$0xf] %vm226_vm0, %v6980_v0  ;;  %v331_v42 = vld [vmem:[%s4436_s24 + $0x54] sm:$0xf]  ;;  %v328_v46 = vld [vmem:[%s4436_s24 + $0x48] sm:$0xf] }
  0x1e   : > { %243 = vst.msk [vmem:[#allocation2 + $0x100] sm:$0xf] %vm226_vm0, %v6980_v0  ;;  %v852_v43 = vrot.slane %v851_v32, 4  ;;  %v857_v44 = vrot.slane %v856_v33, 4  ;;  %v329_v52 = vld [vmem:[%s4436_s24 + $0x4c] sm:$0xf] }
  0x1f   : > { %244 = vst.msk [vmem:[#allocation2 + $0x110] sm:$0xf] %vm226_vm0, %v6980_v0  ;;  %v332_v55 = vld [vmem:[%s4436_s24 + $0x58] sm:$0xf]  ;;  %v333_v60 = vld [vmem:[%s4436_s24 + $0x5c] sm:$0xf] }
  0x20   : > { %245 = vst.msk [vmem:[#allocation2 + $0xc] sm:$0xf] %vm226_vm0, %v6980_v0  ;;  %v336_v1 = vld [vmem:[%s4436_s24 + $0x68] sm:$0xf]  ;;  %s4311_s30 = smov 24   ;;  %s4312_s6 = smov 32  }
  0x21   : > { %246 = vst.msk [vmem:[#allocation2 + $0x1c] sm:$0xf] %vm226_vm0, %v6980_v0  ;;  %vm1670_vm11 = vcmask 130048   ;;  %vm1703_vm12 = vcmask 162816   ;;  %vm1736_vm13 = vcmask 195584   ;;  %vm1769_vm14 = vcmask 228352  }
  0x22   : > { %247 = vst.msk [vmem:[#allocation2 + $0x2c] sm:$0xf] %vm226_vm0, %v6980_v0  ;;  %vm1802_vm15 = vcmask 261120   ;;  %vm1855_vm1 = vcmask 293888   ;;  %s4313_s23 = smov 48   ;;  %vm3665_vm2 = vcmask 1043456  }
  0x23   : > { %248 = vst.msk [vmem:[#allocation2 + $0x3c] sm:$0xf] %vm226_vm0, %v6980_v0  ;;  %vm3464_vm4 = vcmask 326656   ;;  %vm3497_vm5 = vcmask 392192   ;;  %s4193_s16 = sshll.u32 %s7217_s19, 8 }
  0x24   : > { %249 = vst.msk [vmem:[#allocation2 + $0x4c] sm:$0xf] %vm226_vm0, %v6980_v0  ;;  %s6785_s21 = scalar_lea.vmem %s6979_s5, %s4193_s16 }
  0x25   : > { %250 = vst.msk [vmem:[#allocation2 + $0x5c] sm:$0xf] %vm226_vm0, %v6980_v0 }
  0x26   : > { %251 = vst.msk [vmem:[#allocation2 + $0x6c] sm:$0xf] %vm226_vm0, %v6980_v0 }
  0x27   : > { %252 = vst.msk [vmem:[#allocation2 + $0x7c] sm:$0xf] %vm226_vm0, %v6980_v0  ;;  %v828_v30 = vld [vmem:[#allocation2 + $0xc] sm:$0x1] }
  0x28   : > { %253 = vst.msk [vmem:[#allocation2 + $0x8c] sm:$0xf] %vm226_vm0, %v6980_v0  ;;  %v859_v34 = vshll.u32 %v828_v30, 16  ;;  %v829_v54 = vld [vmem:[#allocation2 + $0x1c] sm:$0x1] }
  0x29   : > { %254 = vst.msk [vmem:[#allocation2 + $0x9c] sm:$0xf] %vm226_vm0, %v6980_v0  ;;  %v873_v62 = vshll.u32 %v829_v54, 16 }
  0x2a   : > { %255 = vst.msk [vmem:[#allocation2 + $0xac] sm:$0xf] %vm226_vm0, %v6980_v0  ;;  %v861_v45 = vrot.slane %v859_v34, 5 }
  0x2b   : > { %256 = vst.msk [vmem:[#allocation2 + $0xbc] sm:$0xf] %vm226_vm0, %v6980_v0 }
  0x2c   : > { %257 = vst.msk [vmem:[#allocation2 + $0xcc] sm:$0xf] %vm226_vm0, %v6980_v0 }
  0x2d   : > { %258 = vst.msk [vmem:[#allocation2 + $0xdc] sm:$0xf] %vm226_vm0, %v6980_v0 }
  0x2e   : > { %259 = vst.msk [vmem:[#allocation2 + $0xec] sm:$0xf] %vm226_vm0, %v6980_v0 }
  0x2f   : > { %260 = vst.msk [vmem:[#allocation2 + $0xfc] sm:$0xf] %vm226_vm0, %v6980_v0 }
  0x30   : > { %261 = vst.msk [vmem:[#allocation2 + $0x10c] sm:$0xf] %vm226_vm0, %v6980_v0 }
  0x31   : > { %262 = vst.msk [vmem:[#allocation2 + $0x11c] sm:$0xf] %vm226_vm0, %v6980_v0 }
  0x32   : > { %266 = vst.msk [vmem:[#allocation2 + $0x114] sm:$0xf] %vm226_vm0, %v6980_v0 }
  0x33   : > { %267 = vst.msk [vmem:[#allocation2 + $0x118] sm:$0xf] %vm226_vm0, %v6980_v0 }
  0x34   : > { %349 = vst.msk [vmem:[#allocation2 + $0x44] sm:$0xf] %vm226_vm0, %v316_v2  ;;  %v854_v2 = vsel %vm4521_vm3, %v852_v43, %v4487_v26 }
  0x35   : > { %350 = vst.msk [vmem:[#allocation2 + $0x48] sm:$0xf] %vm226_vm0, %v317_v3  ;;  %v862_v3 = vsel %vm4521_vm3, %v857_v44, %v861_v45  ;;  %v4561_v24 = vunpack.c.l.b16 %v854_v2 }
  0x36   : > { %345 = vst.msk [vmem:[#allocation2 + $0x24] sm:$0xf] %vm226_vm0, %v312_v4 }
  0x37   : > { %346 = vst.msk [vmem:[#allocation2 + $0x28] sm:$0xf] %vm226_vm0, %v313_v5 }
  0x38   : > { %343 = vst.msk [vmem:[#allocation2 + $0x14] sm:$0xf] %vm226_vm0, %v310_v6 }
  0x39   : > { %344 = vst.msk [vmem:[#allocation2 + $0x18] sm:$0xf] %vm226_vm0, %v311_v7  ;;  %v337_v7 = vld [vmem:[%s4436_s24 + $0x6c] sm:$0xf] }
  0x3a   : > { %351 = vst.msk [vmem:[#allocation2 + $0x54] sm:$0xf] %vm226_vm0, %v318_v8 }
  0x3b   : > { %7074 = vst [vmem:[#allocation4_spill] sm:$0xff] %v4467_v14  ;;  %v384_v14 = vld [vmem:[#allocation2 + $0x30] sm:$0x8] }
  0x3c   : > { %352 = vst.msk [vmem:[#allocation2 + $0x58] sm:$0xf] %vm226_vm0, %v319_v9  ;;  %v4198_v21 = vld [vmem:[#allocation2 + $0x44] sm:$0xff]  ;;  %v875_v9 = vrot.slane %v873_v62, 5 }
  0x3d   : > { %347 = vst.msk [vmem:[#allocation2 + $0x34] sm:$0xf] %vm226_vm0, %v314_v10  ;;  %1237 = vrot.lane.b32.xlu2 %v4198_v21, %s4305_s20  ;;  %v4531_v58 = vld [vmem:[#allocation2 + $0x24] sm:$0xf] }
  0x3e   : > { %348 = vst.msk [vmem:[#allocation2 + $0x38] sm:$0xf] %vm226_vm0, %v315_v11  ;;  %v4196_v28 = vld [vmem:[#allocation2 + $0x24] sm:$0xff]  ;;  %v7034_v63 = vshrl.u32 %v4531_v58, 16  ;;  %v7026_v6 = vshll.u32 %v4531_v58, 16 }
  0x3f   : > { %353 = vst.msk [vmem:[#allocation2 + $0x64] sm:$0xf] %vm226_vm0, %v320_v12  ;;  %v4497_v35 = vld [vmem:[#allocation2 + $0x14] sm:$0xf]  ;;  %1233 = vrot.lane.b32.xlu1 %v4196_v28, %s4305_s20  ;;  %v4546_v5 = vld [vmem:[#allocation2 + $0x28] sm:$0xf] }
  0x40   : > { %354 = vst.msk [vmem:[#allocation2 + $0x68] sm:$0xf] %vm226_vm0, %v321_v13  ;;  %v4195_v36 = vld [vmem:[#allocation2 + $0x14] sm:$0xff]  ;;  %v7037_v39 = vshrl.u32 %v4497_v35, 16  ;;  %v7030_v47 = vshll.u32 %v4497_v35, 16  ;;  %v7025_v10 = vshrl.u32 %v4546_v5, 16 }
  0x41   : > { %357 = vst.msk [vmem:[#allocation2 + $0x84] sm:$0xf] %vm226_vm0, %v324_v16  ;;  %v4502_v38 = vld [vmem:[#allocation2 + $0x18] sm:$0xf]  ;;  %1231 = vrot.lane.b32.xlu0 %v4195_v36, %s4305_s20  ;;  %v7022_v11 = vshll.u32 %v4546_v5, 16  ;;  %v877_v21 = vrot.slane %v7034_v63, 4 }
  0x42   : > { %358 = vst.msk [vmem:[#allocation2 + $0x88] sm:$0xf] %vm226_vm0, %v325_v22  ;;  %v7036_v48 = vshrl.u32 %v4502_v38, 16  ;;  %v7029_v49 = vshll.u32 %v4502_v38, 16  ;;  %v863_v50 = vrot.slane %v7037_v39, 4  ;;  %v864_v56 = vrot.slane %v7030_v47, 5 }
  0x43   : > { %v4199_v41 = vld [vmem:[#allocation2 + $0x54] sm:$0xff]  ;;  %355 = vst.msk [vmem:[#allocation2 + $0x74] sm:$0xf] %vm226_vm0, %v322_v23  ;;  %v334_v12 = vld [vmem:[%s4436_s24 + $0x60] sm:$0xf]  ;;  %v878_v26 = vrot.slane %v7026_v6, 5 }
  0x44   : > { %356 = vst.msk [vmem:[#allocation2 + $0x78] sm:$0xf] %vm226_vm0, %v323_v29  ;;  %v867_v57 = vrot.slane %v7029_v49, 5  ;;  %v869_v61 = vrot.slane %v7036_v48, 4  ;;  %v865_v4 = vor.u32 %v864_v56, %v863_v50  ;;  %v830_v16 = vld [vmem:[#allocation2 + $0x2c] sm:$0x1]  ;;  %v4569_v29 = vunpack.c.l.b16 %v862_v3 }
  0x45   : > { %v4197_v51 = vld [vmem:[#allocation2 + $0x34] sm:$0xff]  ;;  %359 = vst.msk [vmem:[#allocation2 + $0x94] sm:$0xf] %vm226_vm0, %v326_v31  ;;  %1239 = vrot.lane.b32.xlu2 %v4199_v41, %s4305_s20  ;;  %v335_v23 = vld [vmem:[%s4436_s24 + $0x64] sm:$0xf]  ;;  %v881_v27 = vrot.slane %v7022_v11, 5  ;;  %v879_v41 = vor.u32 %v878_v26, %v877_v21 }
  0x46   : > { %360 = vst.msk [vmem:[#allocation2 + $0x98] sm:$0xf] %vm226_vm0, %v327_v37  ;;  %v870_v8 = vor.u32 %v869_v61, %v867_v57  ;;  %v866_v13 = vrot.slane %v865_v4, 4  ;;  %v338_v28 = vld [vmem:[%s4436_s24 + $0x70] sm:$0xf]  ;;  %v883_v31 = vrot.slane %v7025_v10, 4 }
  0x47   : > { %v4200_v59 = vld [vmem:[#allocation2 + $0x64] sm:$0xff]  ;;  %363 = vst.msk [vmem:[#allocation2 + $0xb4] sm:$0xf] %vm226_vm0, %v330_v40  ;;  %1235 = vrot.lane.b32.xlu1 %v4197_v51, %s4305_s20  ;;  %v887_v32 = vshll.u32 %v830_v16, 16  ;;  %v4575_v33 = vld [vmem:[#allocation2 + $0x34] sm:$0xf] }
  0x48   : > { %364 = vst.msk [vmem:[#allocation2 + $0xb8] sm:$0xf] %vm226_vm0, %v331_v42  ;;  %v871_v25 = vrot.slane %v870_v8, 4  ;;  %v868_v30 = vsel %vm4521_vm3, %v866_v13, %v867_v57  ;;  %v339_v36 = vld [vmem:[%s4436_s24 + $0x74] sm:$0xf]  ;;  %v7021_v43 = vshrl.u32 %v4575_v33, 16  ;;  %v884_v45 = vor.u32 %v883_v31, %v881_v27 }
  0x49   : > { %361 = vst.msk [vmem:[#allocation2 + $0xa4] sm:$0xf] %vm226_vm0, %v328_v46  ;;  %1241 = vrot.lane.b32.xlu0 %v4200_v59, %s4305_s20  ;;  %v4202_v22 = vld [vmem:[#allocation2 + $0x84] sm:$0xff]  ;;  %v1263_v40 = vunpack.c.l.b16 %v868_v30  ;;  %v4581_v42 = vld [vmem:[#allocation2 + $0x38] sm:$0xf]  ;;  %v889_v46 = vrot.slane %v887_v32, 5  ;;  %v1293_v57 = vpack.c.b16 %v4569_v29, %v4561_v24 }
  0x4a   : > { %362 = vst.msk [vmem:[#allocation2 + $0xa8] sm:$0xf] %vm226_vm0, %v329_v52  ;;  %v876_v37 = vsel %vm4521_vm3, %v871_v25, %v875_v9  ;;  %v7013_v50 = vshll.u32 %v4575_v33, 16  ;;  %v831_v51 = vld [vmem:[#allocation2 + $0x3c] sm:$0x1]  ;;  %v880_v54 = vrot.slane %v879_v41, 4 }
  0x4b   : > { %365 = vst.msk [vmem:[#allocation2 + $0xc4] sm:$0xf] %vm226_vm0, %v332_v55  ;;  %v4201_v34 = vld [vmem:[#allocation2 + $0x74] sm:$0xff]  ;;  %v1264_v44 = vunpack.c.l.b16 %v876_v37  ;;  %v7016_v55 = vshrl.u32 %v4581_v42, 16  ;;  %v7012_v56 = vshll.u32 %v4581_v42, 16  ;;  %v885_v59 = vrot.slane %v884_v45, 4 }
  0x4c   : > { %366 = vst.msk [vmem:[#allocation2 + $0xc8] sm:$0xf] %vm226_vm0, %v333_v60  ;;  %v891_v60 = vrot.slane %v7021_v43, 4  ;;  %v892_v61 = vrot.slane %v7013_v50, 5  ;;  %v882_v62 = vsel %vm4521_vm3, %v880_v54, %v881_v27  ;;  %v901_v3 = vshll.u32 %v831_v51, 16 }
  0x4d   : > { %369 = vst.msk [vmem:[#allocation2 + $0xe4] sm:$0xf] %vm226_vm0, %v336_v1  ;;  %1245 = vrot.lane.b32.xlu2 %v4202_v22, %s4305_s20  ;;  %v4203_v52 = vld [vmem:[#allocation2 + $0x94] sm:$0xff]  ;;  %v895_v1 = vrot.slane %v7012_v56, 5  ;;  %v897_v2 = vrot.slane %v7016_v55, 4  ;;  %v4606_v4 = vpack.c.b16 %v1264_v44, %v1263_v40  ;;  %v1265_v8 = vunpack.c.l.b16 %v882_v62 }
  0x4e   : > { %370 = vst.msk [vmem:[#allocation2 + $0xe8] sm:$0xf] %vm226_vm0, %v337_v7  ;;  %v890_v7 = vsel %vm4521_vm3, %v885_v59, %v889_v46  ;;  %v893_v9 = vor.u32 %v892_v61, %v891_v60  ;;  %v4612_v13 = vld [vmem:[#allocation2 + $0x48] sm:$0xf]  ;;  %v832_v26 = vld [vmem:[#allocation2 + $0x4c] sm:$0x1] }
  0x4f   : > { %367 = vst.msk [vmem:[#allocation2 + $0xd4] sm:$0xf] %vm226_vm0, %v334_v12  ;;  %1243 = vrot.lane.b32.xlu1 %v4201_v34, %s4305_s20  ;;  %v4610_v12 = vld [vmem:[#allocation2 + $0x44] sm:$0xf]  ;;  %v4205_v16 = vld [vmem:[#allocation2 + $0xb4] sm:$0xff]  ;;  %v1266_v21 = vunpack.c.l.b16 %v890_v7  ;;  %v898_v22 = vor.u32 %v897_v2, %v895_v1  ;;  %v7006_v30 = vshrl.u32 %v4612_v13, 16 }
  0x50   : > { %368 = vst.msk [vmem:[#allocation2 + $0xd8] sm:$0xf] %vm226_vm0, %v335_v23  ;;  %v903_v23 = vrot.slane %v901_v3, 5  ;;  %v7014_v25 = vshrl.u32 %v4610_v12, 16  ;;  %v894_v27 = vrot.slane %v893_v9, 4  ;;  %v7001_v31 = vshll.u32 %v4612_v13, 16 }
  0x51   : > { %371 = vst.msk [vmem:[#allocation2 + $0xf4] sm:$0xf] %vm226_vm0, %v338_v28  ;;  %1247 = vrot.lane.b32.xlu0 %v4203_v52, %s4305_s20  ;;  %v7008_v28 = vshll.u32 %v4610_v12, 16  ;;  %v4619_v32 = vld [vmem:[#allocation2 + $0x54] sm:$0xf]  ;;  %v4204_v34 = vld [vmem:[#allocation2 + $0xa4] sm:$0xff] }
  0x52   : > { %372 = vst.msk [vmem:[#allocation2 + $0xf8] sm:$0xf] %vm226_vm0, %v339_v36  ;;  %v4621_v36 = vpack.c.b16 %v1266_v21, %v1265_v8  ;;  %v899_v37 = vrot.slane %v898_v22, 4  ;;  %v905_v40 = vrot.slane %v7014_v25, 4  ;;  %v915_v41 = vshll.u32 %v832_v26, 16 }
  0x53   : > { %v4625_v44 = vld [vmem:[#allocation2 + $0x58] sm:$0xf]  ;;  %v896_v45 = vsel %vm4521_vm3, %v894_v27, %v895_v1  ;;  %v906_v46 = vrot.slane %v7008_v28, 5  ;;  %v909_v51 = vrot.slane %v7001_v31, 5  ;;  %v911_v52 = vrot.slane %v7006_v30, 4  ;;  %v4206_v59 = vld [vmem:[#allocation2 + $0xc4] sm:$0xff] }
  0x54   : > { %v833_v54 = vld [vmem:[#allocation2 + $0x5c] sm:$0x1]  ;;  %v904_v60 = vsel %vm4521_vm3, %v899_v37, %v903_v23  ;;  %v1267_v61 = vunpack.c.l.b16 %v896_v45  ;;  %v917_v62 = vrot.slane %v915_v41, 5  ;;  %v6994_v1 = vshrl.u32 %v4619_v32, 16  ;;  %v4640_v9 = vld [vmem:[#allocation2 + $0x64] sm:$0xf] }
  0x55   : > { %1251 = vrot.lane.b32.xlu2 %v4205_v16, %s4305_s20  ;;  %v1268_v2 = vunpack.c.l.b16 %v904_v60  ;;  %v907_v3 = vor.u32 %v906_v46, %v905_v40  ;;  %v912_v7 = vor.u32 %v911_v52, %v909_v51  ;;  %v6987_v8 = vshll.u32 %v4619_v32, 16  ;;  %v4651_v41 = vld [vmem:[#allocation2 + $0x68] sm:$0xf]  ;;  %v4665_v19 = vld [vmem:[#allocation2 + $0x74] sm:$0xf] }
  0x56   : > { %v6991_v21 = vshrl.u32 %v4625_v44, 16  ;;  %v6986_v16 = vshll.u32 %v4625_v44, 16  ;;  %v919_v22 = vrot.slane %v6994_v1, 4  ;;  %v929_v23 = vshll.u32 %v833_v54, 16  ;;  %v836_v1 = vld [vmem:[#allocation2 + $0x8c] sm:$0x1] }
  0x57   : > { %1249 = vrot.lane.b32.xlu1 %v4204_v34, %s4305_s20  ;;  %v4647_v26 = vpack.c.b16 %v1268_v2, %v1267_v61  ;;  %v908_v27 = vrot.slane %v907_v3, 4  ;;  %v913_v37 = vrot.slane %v912_v7, 4  ;;  %v920_v40 = vrot.slane %v6987_v8, 5  ;;  %v4208_v34 = vld [vmem:[#allocation2 + $0xe4] sm:$0xff]  ;;  %v4207_v7 = vld [vmem:[#allocation2 + $0xd4] sm:$0xff] }
  0x58   : > { %v923_v45 = vrot.slane %v6986_v16, 5  ;;  %v925_v46 = vrot.slane %v6991_v21, 4  ;;  %v931_v52 = vrot.slane %v929_v23, 5  ;;  %v6990_v54 = vshrl.u32 %v4640_v9, 16  ;;  %v837_v31 = vld [vmem:[#allocation2 + $0x9c] sm:$0x1] }
  0x59   : > { %1253 = vrot.lane.b32.xlu0 %v4206_v59, %s4305_s20  ;;  %v910_v60 = vsel %vm4521_vm3, %v908_v27, %v909_v51  ;;  %v918_v61 = vsel %vm4521_vm3, %v913_v37, %v917_v62  ;;  %v921_v2 = vor.u32 %v920_v40, %v919_v22  ;;  %v6988_v3 = vshll.u32 %v4640_v9, 16  ;;  %v834_v59 = vld [vmem:[#allocation2 + $0x6c] sm:$0x1]  ;;  %v4209_v22 = vld [vmem:[#allocation2 + $0xf4] sm:$0xff]  ;;  %v4845_v47 = vld [vmem:[#allocation2 + $0xe4] sm:$0xf] }
  0x5a   : > { %v1269_v0 = vunpack.c.l.b16 %v910_v60  ;;  %v1270_v18 = vunpack.c.l.b16 %v918_v61  ;;  %v926_v20 = vor.u32 %v925_v46, %v923_v45  ;;  %v6989_v17 = vshrl.u32 %v4651_v41, 16  ;;  %v4677_v60 = vld [vmem:[#allocation2 + $0x78] sm:$0xf]  ;;  %v4870_v63 = vld [vmem:[#allocation2 + $0xf4] sm:$0xf] }
  0x5b   : > { %v922_v23 = vrot.slane %v921_v2, 4  ;;  %v6993_v16 = vshll.u32 %v4651_v41, 16  ;;  %v933_v51 = vrot.slane %v6990_v54, 4  ;;  %v934_v62 = vrot.slane %v6988_v3, 5 }
  0x5c   : > { %v4673_v27 = vpack.c.b16 %v1270_v18, %v1269_v0  ;;  %v927_v37 = vrot.slane %v926_v20, 4  ;;  %v939_v40 = vrot.slane %v6989_v17, 4  ;;  %v943_v46 = vshll.u32 %v834_v59, 16 }
  0x5d   : > { %1257 = vrot.lane.b32.xlu2 %v4208_v34, %s4305_s20  ;;  %v924_v61 = vsel %vm4521_vm3, %v922_v23, %v923_v45  ;;  %v935_v2 = vor.u32 %v934_v62, %v933_v51  ;;  %v937_v8 = vrot.slane %v6993_v16, 5  ;;  %v6992_v3 = vshrl.u32 %v4665_v19, 16  ;;  %v835_v34 = vld [vmem:[#allocation2 + $0x7c] sm:$0x1]  ;;  %v4689_v23 = vld [vmem:[#allocation2 + $0x84] sm:$0xf] }
  0x5e   : > { %v932_v0 = vsel %vm4521_vm3, %v927_v37, %v931_v52  ;;  %v1271_v18 = vunpack.c.l.b16 %v924_v61  ;;  %v945_v20 = vrot.slane %v943_v46, 5  ;;  %v6996_v59 = vshll.u32 %v4665_v19, 16  ;;  %v4697_v37 = vld [vmem:[#allocation2 + $0x88] sm:$0xf] }
  0x5f   : > { %1255 = vrot.lane.b32.xlu1 %v4207_v7, %s4305_s20  ;;  %v1272_v17 = vunpack.c.l.b16 %v932_v0  ;;  %v936_v54 = vrot.slane %v935_v2, 4  ;;  %v940_v21 = vor.u32 %v939_v40, %v937_v8  ;;  %v6999_v45 = vshrl.u32 %v4677_v60, 16 }
  0x60   : > { %v6995_v51 = vshll.u32 %v4677_v60, 16  ;;  %v947_v7 = vrot.slane %v6992_v3, 4  ;;  %v948_v52 = vrot.slane %v6996_v59, 5  ;;  %v957_v62 = vshll.u32 %v835_v34, 16  ;;  %v4723_v59 = vld [vmem:[#allocation2 + $0x98] sm:$0xf] }
  0x61   : > { %1259 = vrot.lane.b32.xlu0 %v4209_v22, %s4305_s20  ;;  %v4699_v46 = vpack.c.b16 %v1272_v17, %v1271_v18  ;;  %v938_v40 = vsel %vm4521_vm3, %v936_v54, %v937_v8  ;;  %v941_v61 = vrot.slane %v940_v21, 4  ;;  %v953_v22 = vrot.slane %v6999_v45, 4 }
  0x62   : > { %v1273_v2 = vunpack.c.l.b16 %v938_v40  ;;  %v949_v0 = vor.u32 %v948_v52, %v947_v7  ;;  %v951_v3 = vrot.slane %v6995_v51, 5  ;;  %v959_v16 = vrot.slane %v957_v62, 5  ;;  %v4715_v62 = vld [vmem:[#allocation2 + $0x94] sm:$0xf] }
  0x63   : > { %v946_v34 = vsel %vm4521_vm3, %v941_v61, %v945_v20  ;;  %v6998_v17 = vshrl.u32 %v4689_v23, 16  ;;  %v6997_v18 = vshll.u32 %v4689_v23, 16  ;;  %v7000_v8 = vshrl.u32 %v4697_v37, 16 }
  0x64   : > { %v1274_v21 = vunpack.c.l.b16 %v946_v34  ;;  %v950_v54 = vrot.slane %v949_v0, 4  ;;  %v954_v7 = vor.u32 %v953_v22, %v951_v3  ;;  %v7005_v52 = vshll.u32 %v4697_v37, 16 }
  0x65   : > { %1311 = vrot.lane.b32.xlu2 %v4606_v4, %s4306_s25  ;;  %v961_v20 = vrot.slane %v6998_v17, 4  ;;  %v962_v40 = vrot.slane %v6997_v18, 5  ;;  %v967_v61 = vrot.slane %v7000_v8, 4  ;;  %v971_v51 = vshll.u32 %v836_v1, 16 }
  0x66   : > { %v4729_v22 = vpack.c.b16 %v1274_v21, %v1273_v2  ;;  %v952_v0 = vsel %vm4521_vm3, %v950_v54, %v951_v3  ;;  %v955_v34 = vrot.slane %v954_v7, 4  ;;  %v965_v18 = vrot.slane %v7005_v52, 5  ;;  %v4742_v2 = vld [vmem:[#allocation2 + $0xa4] sm:$0xf] }
  0x67   : > { %1309 = vrot.lane.b32.xlu1 %v1293_v57, %s4306_s25  ;;  %v1275_v17 = vunpack.c.l.b16 %v952_v0  ;;  %v963_v45 = vor.u32 %v962_v40, %v961_v20  ;;  %v973_v8 = vrot.slane %v971_v51, 5  ;;  %v7002_v1 = vshrl.u32 %v4715_v62, 16  ;;  %v4751_v0 = vld [vmem:[#allocation2 + $0xa8] sm:$0xf] }
  0x68   : > { %v960_v24 = vsel %vm4521_vm3, %v955_v34, %v959_v16  ;;  %v968_v29 = vor.u32 %v967_v61, %v965_v18  ;;  %v7003_v57 = vshll.u32 %v4715_v62, 16  ;;  %v7004_v3 = vshrl.u32 %v4723_v59, 16 }
  0x69   : > { %1313 = vrot.lane.b32.xlu0 %v4621_v36, %s4306_s25  ;;  %v1276_v21 = vunpack.c.l.b16 %v960_v24  ;;  %v964_v54 = vrot.slane %v963_v45, 4  ;;  %v7007_v51 = vshll.u32 %v4723_v59, 16  ;;  %v975_v7 = vrot.slane %v7002_v1, 4 }
  0x6a   : > { %v969_v20 = vrot.slane %v968_v29, 4  ;;  %v976_v40 = vrot.slane %v7003_v57, 5  ;;  %v981_v16 = vrot.slane %v7004_v3, 4  ;;  %v985_v61 = vshll.u32 %v837_v31, 16  ;;  %v838_v29 = vld [vmem:[#allocation2 + $0xac] sm:$0x1] }
  0x6b   : > { %v4753_v34 = vpack.c.b16 %v1276_v21, %v1275_v17  ;;  %v966_v45 = vsel %vm4521_vm3, %v964_v54, %v965_v18  ;;  %v979_v24 = vrot.slane %v7007_v51, 5  ;;  %v7011_v1 = vshrl.u32 %v4742_v2, 16  ;;  %v4766_v54 = vld [vmem:[#allocation2 + $0xb4] sm:$0xf] }
  0x6c   : > { %v974_v57 = vsel %vm4521_vm3, %v969_v20, %v973_v8  ;;  %v1277_v31 = vunpack.c.l.b16 %v966_v45  ;;  %v977_v3 = vor.u32 %v976_v40, %v975_v7  ;;  %v987_v52 = vrot.slane %v985_v61, 5  ;;  %v4779_v61 = vld [vmem:[#allocation2 + $0xb8] sm:$0xf] }
  0x6d   : > { %1317 = vrot.lane.b32.xlu2 %v4673_v27, %s4306_s25  ;;  %v1278_v17 = vunpack.c.l.b16 %v974_v57  ;;  %v982_v21 = vor.u32 %v981_v16, %v979_v24  ;;  %v7009_v30 = vshll.u32 %v4742_v2, 16  ;;  %v7010_v18 = vshrl.u32 %v4751_v0, 16 }
  0x6e   : > { %v978_v51 = vrot.slane %v977_v3, 4  ;;  %v7015_v28 = vshll.u32 %v4751_v0, 16  ;;  %v989_v8 = vrot.slane %v7011_v1, 4  ;;  %v999_v20 = vshll.u32 %v838_v29, 16 }
  0x6f   : > { %1315 = vrot.lane.b32.xlu1 %v4647_v26, %s4306_s25  ;;  %v4773_v7 = vpack.c.b16 %v1278_v17, %v1277_v31  ;;  %v983_v57 = vrot.slane %v982_v21, 4  ;;  %v990_v40 = vrot.slane %v7009_v30, 5  ;;  %v995_v16 = vrot.slane %v7010_v18, 4  ;;  %v839_v17 = vld [vmem:[#allocation2 + $0xbc] sm:$0x1] }
  0x70   : > { %v980_v3 = vsel %vm4521_vm3, %v978_v51, %v979_v24  ;;  %v993_v45 = vrot.slane %v7015_v28, 5  ;;  %v1001_v29 = vrot.slane %v999_v20, 5  ;;  %v7018_v31 = vshrl.u32 %v4766_v54, 16  ;;  %v4793_v24 = vld [vmem:[#allocation2 + $0xc4] sm:$0xf] }
  0x71   : > { %1319 = vrot.lane.b32.xlu0 %v4699_v46, %s4306_s25  ;;  %v988_v21 = vsel %vm4521_vm3, %v983_v57, %v987_v52  ;;  %v1279_v30 = vunpack.c.l.b16 %v980_v3  ;;  %v991_v18 = vor.u32 %v990_v40, %v989_v8  ;;  %v7017_v1 = vshll.u32 %v4766_v54, 16 }
  0x72   : > { %v1280_v56 = vunpack.c.l.b16 %v988_v21  ;;  %v996_v50 = vor.u32 %v995_v16, %v993_v45  ;;  %v7020_v25 = vshrl.u32 %v4779_v61, 16  ;;  %v7019_v51 = vshll.u32 %v4779_v61, 16 }
  0x73   : > { %v992_v28 = vrot.slane %v991_v18, 4  ;;  %v1003_v20 = vrot.slane %v7018_v31, 4  ;;  %v1004_v55 = vrot.slane %v7017_v1, 5  ;;  %v1013_v52 = vshll.u32 %v839_v17, 16  ;;  %v4807_v18 = vld [vmem:[#allocation2 + $0xc8] sm:$0xf] }
  0x74   : > { %v4801_v8 = vpack.c.b16 %v1280_v56, %v1279_v30  ;;  %v997_v57 = vrot.slane %v996_v50, 4  ;;  %v1007_v40 = vrot.slane %v7019_v51, 5  ;;  %v1009_v16 = vrot.slane %v7020_v25, 4  ;;  %v840_v31 = vld [vmem:[#allocation2 + $0xcc] sm:$0x1] }
  0x75   : > { %1323 = vrot.lane.b32.xlu2 %v4753_v34, %s4306_s25  ;;  %v994_v3 = vsel %vm4521_vm3, %v992_v28, %v993_v45  ;;  %v1005_v21 = vor.u32 %v1004_v55, %v1003_v20  ;;  %v1015_v1 = vrot.slane %v1013_v52, 5  ;;  %v7024_v17 = vshrl.u32 %v4793_v24, 16  ;;  %v4825_v52 = vld [vmem:[#allocation2 + $0xd4] sm:$0xf] }
  0x76   : > { %7077 = vst [vmem:[#allocation5_spill] sm:$0xff] %v4801_v8  ;;  %v1002_v50 = vsel %vm4521_vm3, %v997_v57, %v1001_v29  ;;  %v1281_v56 = vunpack.c.l.b16 %v994_v3  ;;  %v1010_v30 = vor.u32 %v1009_v16, %v1007_v40  ;;  %v7023_v51 = vshll.u32 %v4793_v24, 16 }
  0x77   : > { %1321 = vrot.lane.b32.xlu1 %v4729_v22, %s4306_s25  ;;  %v1282_v25 = vunpack.c.l.b16 %v1002_v50  ;;  %v1006_v43 = vrot.slane %v1005_v21, 4  ;;  %v7028_v11 = vshrl.u32 %v4807_v18, 16  ;;  %v7027_v55 = vshll.u32 %v4807_v18, 16  ;;  %v4835_v50 = vld [vmem:[#allocation2 + $0xd8] sm:$0xf] }
  0x78   : > { %v1011_v28 = vrot.slane %v1010_v30, 4  ;;  %v1017_v45 = vrot.slane %v7024_v17, 4  ;;  %v1018_v29 = vrot.slane %v7023_v51, 5  ;;  %v1027_v20 = vshll.u32 %v840_v31, 16  ;;  %v841_v30 = vld [vmem:[#allocation2 + $0xdc] sm:$0x1] }
  0x79   : > { %1325 = vrot.lane.b32.xlu0 %v4773_v7, %s4306_s25  ;;  %v4827_v57 = vpack.c.b16 %v1282_v25, %v1281_v56  ;;  %v1008_v16 = vsel %vm4521_vm3, %v1006_v43, %v1007_v40  ;;  %v1021_v3 = vrot.slane %v7027_v55, 5  ;;  %v1023_v21 = vrot.slane %v7028_v11, 4 }
  0x7a   : > { %v1016_v51 = vsel %vm4521_vm3, %v1011_v28, %v1015_v1  ;;  %v1283_v31 = vunpack.c.l.b16 %v1008_v16  ;;  %v1019_v17 = vor.u32 %v1018_v29, %v1017_v45  ;;  %v1029_v10 = vrot.slane %v1027_v20, 5  ;;  %v4853_v29 = vld [vmem:[#allocation2 + $0xe8] sm:$0xf] }
  0x7b   : > { %7078 = vst [vmem:[#allocation6_spill] sm:$0xff] %v4827_v57  ;;  %v1284_v25 = vunpack.c.l.b16 %v1016_v51  ;;  %v1024_v56 = vor.u32 %v1023_v21, %v1021_v3  ;;  %v7032_v6 = vshrl.u32 %v4825_v52, 16  ;;  %v7031_v43 = vshll.u32 %v4825_v52, 16 }
  0x7c   : > { %v1020_v40 = vrot.slane %v1019_v17, 4  ;;  %v7035_v55 = vshrl.u32 %v4835_v50, 16  ;;  %v7033_v11 = vshll.u32 %v4835_v50, 16  ;;  %v1041_v49 = vshll.u32 %v841_v30, 16  ;;  %v842_v30 = vld [vmem:[#allocation2 + $0xec] sm:$0x1] }
  0x7d   : > { %1329 = vrot.lane.b32.xlu2 %v4827_v57, %s4306_s25  ;;  %v4847_v1 = vpack.c.b16 %v1284_v25, %v1283_v31  ;;  %v1025_v28 = vrot.slane %v1024_v56, 4  ;;  %v1031_v51 = vrot.slane %v7032_v6, 4  ;;  %v1032_v45 = vrot.slane %v7031_v43, 5 }
  0x7e   : > { %v1022_v17 = vsel %vm4521_vm3, %v1020_v40, %v1021_v3  ;;  %v1035_v20 = vrot.slane %v7033_v11, 5  ;;  %v1037_v16 = vrot.slane %v7035_v55, 4  ;;  %v1043_v21 = vrot.slane %v1041_v49, 5 }
  0x7f   : > { %7079 = vst [vmem:[#allocation7_spill] sm:$0xff] %v4847_v1  ;;  %1327 = vrot.lane.b32.xlu1 %v4801_v8, %s4306_s25  ;;  %v1030_v31 = vsel %vm4521_vm3, %v1025_v28, %v1029_v10  ;;  %v1285_v25 = vunpack.c.l.b16 %v1022_v17  ;;  %v1033_v56 = vor.u32 %v1032_v45, %v1031_v51  ;;  %v7039_v43 = vshrl.u32 %v4845_v47, 16 }
  0x80   : > { %v1286_v6 = vunpack.c.l.b16 %v1030_v31  ;;  %v1038_v3 = vor.u32 %v1037_v16, %v1035_v20  ;;  %v7038_v40 = vshll.u32 %v4845_v47, 16  ;;  %v7040_v11 = vshrl.u32 %v4853_v29, 16  ;;  %v4881_v31 = vld [vmem:[#allocation2 + $0xf8] sm:$0xf] }
  0x81   : > { %1331 = vrot.lane.b32.xlu0 %v4847_v1, %s4306_s25  ;;  %v1034_v49 = vrot.slane %v1033_v56, 4  ;;  %v7045_v55 = vshll.u32 %v4853_v29, 16  ;;  %v1045_v10 = vrot.slane %v7039_v43, 4  ;;  %v1055_v28 = vshll.u32 %v842_v30, 16 }
  0x82   : > { %v4875_v51 = vpack.c.b16 %v1286_v6, %v1285_v25  ;;  %v1039_v45 = vrot.slane %v1038_v3, 4  ;;  %v1046_v17 = vrot.slane %v7038_v40, 5  ;;  %v1051_v16 = vrot.slane %v7040_v11, 4  ;;  %v843_v6 = vld [vmem:[#allocation2 + $0xfc] sm:$0x1] }
  0x83   : > { %v1036_v56 = vsel %vm4521_vm3, %v1034_v49, %v1035_v20  ;;  %v1049_v48 = vrot.slane %v7045_v55, 5  ;;  %v1057_v39 = vrot.slane %v1055_v28, 5  ;;  %v7048_v30 = vshrl.u32 %v4870_v63, 16 }
  0x84   : > { %7080 = vst [vmem:[#allocation8_spill] sm:$0xff] %v4875_v51  ;;  %v1044_v25 = vsel %vm4521_vm3, %v1039_v45, %v1043_v21  ;;  %v1287_v3 = vunpack.c.l.b16 %v1036_v56  ;;  %v1047_v40 = vor.u32 %v1046_v17, %v1045_v10  ;;  %v7050_v43 = vshll.u32 %v4870_v63, 16 }
  0x85   : > { %v1288_v11 = vunpack.c.l.b16 %v1044_v25  ;;  %v1052_v1 = vor.u32 %v1051_v16, %v1049_v48  ;;  %v7051_v57 = vshrl.u32 %v4881_v31, 16  ;;  %v7049_v20 = vshll.u32 %v4881_v31, 16  ;;  %v378_v25 = vld [vmem:[#allocation2 + $0x10] sm:$0x8] }
  0x86   : > { %v1048_v49 = vrot.slane %v1047_v40, 4  ;;  %v1059_v28 = vrot.slane %v7048_v30, 4  ;;  %v1060_v21 = vrot.slane %v7050_v43, 5  ;;  %v1069_v45 = vshll.u32 %v843_v6, 16  ;;  %v381_v30 = vld [vmem:[#allocation2 + $0x20] sm:$0x8] }
  0x87   : > { %1333 = vrot.lane.b32.xlu1 %v4875_v51, %s4306_s25  ;;  %v4899_v10 = vpack.c.b16 %v1288_v11, %v1287_v3  ;;  %v1053_v17 = vrot.slane %v1052_v1, 4  ;;  %v1063_v16 = vrot.slane %v7049_v20, 5  ;;  %v1065_v56 = vrot.slane %v7051_v57, 4 }
  0x88   : > { %v1050_v40 = vsel %vm4521_vm3, %v1048_v49, %v1049_v48  ;;  %v1061_v55 = vor.u32 %v1060_v21, %v1059_v28  ;;  %v1071_v51 = vrot.slane %v1069_v45, 5  ;;  %v455_v43 = vshrl.u32 %v378_v25, 16 }
  0x89   : > { %7081 = vst [vmem:[#allocation9_spill] sm:$0xff] %v4899_v10  ;;  %1335 = vrot.lane.b32.xlu2 %v4899_v10, %s4306_s25  ;;  %v1058_v11 = vsel %vm4521_vm3, %v1053_v17, %v1057_v39  ;;  %v1289_v1 = vunpack.c.l.b16 %v1050_v40  ;;  %v1066_v6 = vor.u32 %v1065_v56, %v1063_v16  ;;  %v7082_v57 = vshrl.u32 %v4497_v35, 16 }
  0x8a   : > { %v1290_v3 = vunpack.c.l.b16 %v1058_v11  ;;  %v1062_v20 = vrot.slane %v1061_v55, 4  ;;  %v7085_v28 = vshrl.u32 %v4502_v38, 16  ;;  %v477_v45 = vshrl.u32 %v381_v30, 16 }
  0x8b   : > { %v462_v8 = vrot.slane %v7082_v57, 7  ;;  %v1067_v48 = vrot.slane %v1066_v6, 4  ;;  %v7086_v39 = vshrl.u32 %v4531_v58, 16  ;;  %v3955_v25 = vrot.slane %v455_v43, 11 }
  0x8c   : > { %v471_v21 = vrot.slane %v7085_v28, 7  ;;  %v4921_v56 = vpack.c.b16 %v1290_v3, %v1289_v1  ;;  %v1064_v55 = vsel %vm4521_vm3, %v1062_v20, %v1063_v16  ;;  %v7087_v57 = vshll.u32 %v4497_v35, 16 }
  0x8d   : > { %v484_v17 = vrot.slane %v7086_v39, 7  ;;  %v1072_v11 = vsel %vm4521_vm3, %v1067_v48, %v1071_v51  ;;  %v1291_v6 = vunpack.c.l.b16 %v1064_v55  ;;  %v467_v10 = vrot.slane %v462_v8, 4 }
  0x8e   : > { %v465_v40 = vor.u32 %v7087_v57, %v462_v8  ;;  %v7088_v28 = vshll.u32 %v4502_v38, 16  ;;  %1337 = vrot.lane.b32.xlu0 %v4921_v56, %s4306_s25  ;;  %v1292_v1 = vunpack.c.l.b16 %v1072_v11  ;;  %v3956_v43 = vrot.slane %v477_v45, 11 }
  0x8f   : > { %v7089_v35 = vshll.u32 %v4531_v58, 16  ;;  %v489_v8 = vrot.slane %v484_v17, 4  ;;  %v7090_v38 = vshrl.u32 %v4546_v5, 16  ;;  %v7091_v45 = vshll.u32 %v4546_v5, 16 }
  0x90   : > { %v474_v30 = vor.u32 %v7088_v28, %v471_v21  ;;  %v466_v20 = vsel %vm4913_vm6, %v3955_v25, %v465_v40  ;;  %v387_v21 = vld [vmem:[#allocation2 + $0x40] sm:$0x8]  ;;  %v4941_v39 = vpack.c.b16 %v1292_v1, %v1291_v6  ;;  %v499_v25 = vshrl.u32 %v384_v14, 16 }
  0x91   : > { %v487_v16 = vor.u32 %v7089_v35, %v484_v17  ;;  %v1103_v3 = vunpack.c.l.b16 %v466_v20  ;;  %v493_v48 = vrot.slane %v7090_v38, 7  ;;  %v7092_v11 = vshrl.u32 %v4575_v33, 16 }
  0x92   : > { %v475_v51 = vsel %vm4913_vm6, %v467_v10, %v474_v30  ;;  %v7093_v17 = vshrl.u32 %v4581_v42, 16  ;;  %1339 = vrot.lane.b32.xlu1 %v4941_v39, %s4306_s25  ;;  %v3957_v30 = vrot.slane %v499_v25, 11  ;;  %v521_v1 = vshrl.u32 %v387_v21, 16  ;;  %v390_v25 = vld [vmem:[#allocation2 + $0x50] sm:$0x8] }
  0x93   : > { %v1104_v55 = vunpack.c.l.b16 %v475_v51  ;;  %v488_v57 = vsel %vm4913_vm6, %v3956_v43, %v487_v16  ;;  %v496_v58 = vor.u32 %v7091_v45, %v493_v48  ;;  %v506_v10 = vrot.slane %v7092_v11, 7 }
  0x94   : > { %v1105_v40 = vunpack.c.l.b16 %v488_v57  ;;  %v515_v28 = vrot.slane %v7093_v17, 7  ;;  %v7094_v20 = vshrl.u32 %v4610_v12, 16  ;;  %v7095_v43 = vshll.u32 %v4575_v33, 16 }
  0x95   : > { %v4953_v6 = vpack.c.b16 %v1104_v55, %v1103_v3  ;;  %v497_v5 = vsel %vm4913_vm6, %v489_v8, %v496_v58  ;;  %v511_v16 = vrot.slane %v506_v10, 4  ;;  %v7096_v51 = vshll.u32 %v4581_v42, 16  ;;  %v393_v58 = vld [vmem:[#allocation2 + $0x60] sm:$0x8] }
  0x96   : > { %v528_v14 = vrot.slane %v7094_v20, 7  ;;  %v509_v35 = vor.u32 %v7095_v43, %v506_v10  ;;  %v1106_v3 = vunpack.c.l.b16 %v497_v5  ;;  %v3958_v48 = vrot.slane %v521_v1, 11 }
  0x97   : > { %v518_v38 = vor.u32 %v7096_v51, %v515_v28  ;;  %1344 = vrot.lane.b32.xlu2 %v4953_v6, %s4307_s26  ;;  %v7097_v21 = vshll.u32 %v4610_v12, 16  ;;  %v7098_v42 = vshrl.u32 %v4612_v13, 16  ;;  %v1238_v28 = vpop.permute.xlu2 %1237  ;;  %v7099_v1 = vshll.u32 %v4612_v13, 16 }
  0x98   : > { %v533_v57 = vrot.slane %v528_v14, 4  ;;  %v510_v8 = vsel %vm4913_vm6, %v3957_v30, %v509_v35  ;;  %v4973_v11 = vpack.c.b16 %v1106_v3, %v1105_v40  ;;  %v7100_v5 = vshrl.u32 %v4619_v32, 16 }
  0x99   : > { %v531_v55 = vor.u32 %v7097_v21, %v528_v14  ;;  %v519_v33 = vsel %vm4913_vm6, %v511_v16, %v518_v38  ;;  %v537_v45 = vrot.slane %v7098_v42, 7  ;;  %v1107_v10 = vunpack.c.l.b16 %v510_v8 }
  0x9a   : > { %v1108_v17 = vunpack.c.l.b16 %v519_v33  ;;  %v543_v14 = vshrl.u32 %v390_v25, 16  ;;  %v550_v43 = vrot.slane %v7100_v5, 7  ;;  %1346 = vrot.lane.b32.xlu0 %v4973_v11, %s4307_s26  ;;  %v7101_v40 = vshrl.u32 %v4625_v44, 16 }
  0x9b   : > { %v532_v12 = vsel %vm4913_vm6, %v3958_v48, %v531_v55  ;;  %v540_v20 = vor.u32 %v7099_v1, %v537_v45  ;;  %v565_v51 = vshrl.u32 %v393_v58, 16  ;;  %v7102_v38 = vshrl.u32 %v4640_v9, 16  ;;  %v396_v48 = vld [vmem:[#allocation2 + $0x70] sm:$0x8] }
  0x9c   : > { %v1109_v30 = vunpack.c.l.b16 %v532_v12  ;;  %v4983_v35 = vpack.c.b16 %v1108_v17, %v1107_v10  ;;  %v559_v16 = vrot.slane %v7101_v40, 7  ;;  %v3959_v21 = vrot.slane %v543_v14, 11  ;;  %v399_v14 = vld [vmem:[#allocation2 + $0x80] sm:$0x8] }
  0x9d   : > { %v572_v3 = vrot.slane %v7102_v38, 7  ;;  %v541_v13 = vsel %vm4913_vm6, %v533_v57, %v540_v20  ;;  %v7103_v55 = vshll.u32 %v4619_v32, 16  ;;  %v555_v8 = vrot.slane %v550_v43, 4 }
  0x9e   : > { %1348 = vrot.lane.b32.xlu1 %v4983_v35, %s4307_s26  ;;  %v1110_v33 = vunpack.c.l.b16 %v541_v13  ;;  %v7104_v42 = vshll.u32 %v4625_v44, 16  ;;  %v3960_v58 = vrot.slane %v565_v51, 11  ;;  %v7105_v10 = vshll.u32 %v4640_v9, 16 }
  0x9f   : > { %v553_v25 = vor.u32 %v7103_v55, %v550_v43  ;;  %v577_v57 = vrot.slane %v572_v3, 4  ;;  %v7106_v1 = vshrl.u32 %v4651_v41, 16  ;;  %v587_v20 = vshrl.u32 %v396_v48, 16 }
  0xa0   : > { %v562_v45 = vor.u32 %v7104_v42, %v559_v16  ;;  %v575_v17 = vor.u32 %v7105_v10, %v572_v3  ;;  %v5003_v5 = vpack.c.b16 %v1110_v33, %v1109_v30  ;;  %v7107_v16 = vshll.u32 %v4651_v41, 16 }
  0xa1   : > { %v554_v12 = vsel %vm4913_vm6, %v3959_v21, %v553_v25  ;;  %v581_v32 = vrot.slane %v7106_v1, 7  ;;  %v3961_v3 = vrot.slane %v587_v20, 11  ;;  %v7108_v48 = vshrl.u32 %v4665_v19, 16  ;;  %v5021_v25 = vpop.permute.xlu2 %1239 }
  0xa2   : > { %v563_v43 = vsel %vm4913_vm6, %v555_v8, %v562_v45  ;;  %v1111_v44 = vunpack.c.l.b16 %v554_v12  ;;  %v576_v40 = vsel %vm4913_vm6, %v3960_v58, %v575_v17  ;;  %1350 = vrot.lane.b32.xlu2 %v5003_v5, %s4307_s26  ;;  %v5015_v30 = vsel %vm1555_vm7, %v5003_v5, %v1238_v28 }
  0xa3   : > { %v1112_v9 = vunpack.c.l.b16 %v563_v43  ;;  %v584_v51 = vor.u32 %v7107_v16, %v581_v32  ;;  %v1113_v38 = vunpack.c.l.b16 %v576_v40  ;;  %v594_v13 = vrot.slane %v7108_v48, 7  ;;  %v405_v48 = vld [vmem:[#allocation2 + $0xa0] sm:$0x8] }
  0xa4   : > { %v7109_v21 = vshrl.u32 %v4677_v60, 16  ;;  %v609_v8 = vshrl.u32 %v399_v14, 16  ;;  %v7110_v42 = vshrl.u32 %v4689_v23, 16  ;;  %v7111_v28 = vshrl.u32 %v4697_v37, 16  ;;  %v402_v14 = vld [vmem:[#allocation2 + $0x90] sm:$0x8] }
  0xa5   : > { %v5023_v41 = vpack.c.b16 %v1112_v9, %v1111_v44  ;;  %v585_v33 = vsel %vm4913_vm6, %v577_v57, %v584_v51  ;;  %v7112_v17 = vshll.u32 %v4665_v19, 16  ;;  %v599_v1 = vrot.slane %v594_v13, 4 }
  0xa6   : > { %v603_v55 = vrot.slane %v7109_v21, 7  ;;  %v616_v45 = vrot.slane %v7110_v42, 7  ;;  %v625_v58 = vrot.slane %v7111_v28, 7  ;;  %v1114_v10 = vunpack.c.l.b16 %v585_v33 }
  0xa7   : > { %v597_v12 = vor.u32 %v7112_v17, %v594_v13  ;;  %v7113_v32 = vshll.u32 %v4677_v60, 16  ;;  %1352 = vrot.lane.b32.xlu0 %v5023_v41, %s4307_s26  ;;  %v3962_v43 = vrot.slane %v609_v8, 11  ;;  %v7114_v57 = vshll.u32 %v4689_v23, 16 }
  0xa8   : > { %v621_v40 = vrot.slane %v616_v45, 4  ;;  %v5039_v9 = vpack.c.b16 %v1114_v10, %v1113_v38  ;;  %v7115_v60 = vshll.u32 %v4697_v37, 16  ;;  %v631_v23 = vshrl.u32 %v402_v14, 16 }
  0xa9   : > { %v606_v20 = vor.u32 %v7113_v32, %v603_v55  ;;  %v619_v44 = vor.u32 %v7114_v57, %v616_v45  ;;  %v598_v16 = vsel %vm4913_vm6, %v3961_v3, %v597_v12  ;;  %v7116_v8 = vshrl.u32 %v4715_v62, 16  ;;  %v408_v45 = vld [vmem:[#allocation2 + $0xb0] sm:$0x8] }
  0xaa   : > { %v628_v51 = vor.u32 %v7115_v60, %v625_v58  ;;  %v1115_v13 = vunpack.c.l.b16 %v598_v16  ;;  %1354 = vrot.lane.b32.xlu1 %v5039_v9, %s4307_s26  ;;  %v7117_v37 = vshrl.u32 %v4723_v59, 16  ;;  %v3963_v10 = vrot.slane %v631_v23, 11 }
  0xab   : > { %v607_v19 = vsel %vm4913_vm6, %v599_v1, %v606_v20  ;;  %v620_v55 = vsel %vm4913_vm6, %v3962_v43, %v619_v44  ;;  %v638_v33 = vrot.slane %v7116_v8, 7  ;;  %v653_v17 = vshrl.u32 %v405_v48, 16  ;;  %v5065_v44 = vpop.permute.xlu2 %1245 }
  0xac   : > { %v1116_v21 = vunpack.c.l.b16 %v607_v19  ;;  %v629_v38 = vsel %vm4913_vm6, %v621_v40, %v628_v51  ;;  %v1117_v3 = vunpack.c.l.b16 %v620_v55  ;;  %v647_v42 = vrot.slane %v7117_v37, 7  ;;  %v5079_v55 = vpop.permute.xlu0 %1229 }
  0xad   : > { %v1118_v58 = vunpack.c.l.b16 %v629_v38  ;;  %v7118_v12 = vshll.u32 %v4715_v62, 16  ;;  %v643_v32 = vrot.slane %v638_v33, 4  ;;  %v7119_v20 = vshll.u32 %v4723_v59, 16 }
  0xae   : > { %v5057_v28 = vpack.c.b16 %v1116_v21, %v1115_v13  ;;  %v7120_v43 = vshrl.u32 %v4742_v2, 16  ;;  %v3964_v16 = vrot.slane %v653_v17, 11  ;;  %v7122_v19 = vshrl.u32 %v4751_v0, 16 }
  0xaf   : > { %v641_v1 = vor.u32 %v7118_v12, %v638_v33  ;;  %v650_v14 = vor.u32 %v7119_v20, %v647_v42  ;;  %v5069_v40 = vpack.c.b16 %v1118_v58, %v1117_v3  ;;  %v675_v62 = vshrl.u32 %v408_v45, 16 }
  0xb0   : > { %v660_v57 = vrot.slane %v7120_v43, 7  ;;  %1356 = vrot.lane.b32.xlu2 %v5057_v28, %s4307_s26  ;;  %v669_v60 = vrot.slane %v7122_v19, 7  ;;  %v7123_v48 = vshll.u32 %v4742_v2, 16  ;;  %v7124_v3 = vshll.u32 %v4751_v0, 16 }
  0xb1   : > { %7121 = vst [vmem:[#allocation10_spill] sm:$0xff] %v5069_v40  ;;  %v642_v51 = vsel %vm4913_vm6, %v3963_v10, %v641_v1  ;;  %v651_v59 = vsel %vm4913_vm6, %v643_v32, %v650_v14  ;;  %1358 = vrot.lane.b32.xlu0 %v5069_v40, %s4307_s26  ;;  %v3965_v37 = vrot.slane %v675_v62, 11  ;;  %v7125_v42 = vshrl.u32 %v4766_v54, 16  ;;  %v411_v10 = vld [vmem:[#allocation2 + $0xc0] sm:$0x8] }
  0xb2   : > { %v663_v13 = vor.u32 %v7123_v48, %v660_v57  ;;  %v665_v21 = vrot.slane %v660_v57, 4  ;;  %v1119_v23 = vunpack.c.l.b16 %v642_v51  ;;  %v1120_v38 = vunpack.c.l.b16 %v651_v59 }
  0xb3   : > { %v672_v8 = vor.u32 %v7124_v3, %v669_v60  ;;  %v682_v45 = vrot.slane %v7125_v42, 7  ;;  %v7126_v2 = vshrl.u32 %v4779_v61, 16  ;;  %v7127_v0 = vshll.u32 %v4766_v54, 16  ;;  %v5109_v59 = vpop.permute.xlu2 %1251  ;;  %v5115_v3 = vpop.permute.xlu1 %1233 }
  0xb4   : > { %v664_v33 = vsel %vm4913_vm6, %v3964_v16, %v663_v13  ;;  %v5091_v17 = vpack.c.b16 %v1120_v38, %v1119_v23  ;;  %v7128_v43 = vshll.u32 %v4779_v61, 16  ;;  %v697_v16 = vshrl.u32 %v411_v10, 16  ;;  %7130 = vst [vmem:[#allocation11_spill] sm:$0xff] %v5109_v59  ;;  %v417_v13 = vld [vmem:[#allocation2 + $0xe0] sm:$0x8] }
  0xb5   : > { %v691_v58 = vrot.slane %v7126_v2, 7  ;;  %v673_v12 = vsel %vm4913_vm6, %v665_v21, %v672_v8  ;;  %v1121_v1 = vunpack.c.l.b16 %v664_v33  ;;  %v685_v20 = vor.u32 %v7127_v0, %v682_v45  ;;  %v5123_v2 = vpop.permute.xlu0 %1231  ;;  %v414_v10 = vld [vmem:[#allocation2 + $0xd0] sm:$0x8] }
  0xb6   : > { %v1122_v32 = vunpack.c.l.b16 %v673_v12  ;;  %v687_v14 = vrot.slane %v682_v45, 4  ;;  %1360 = vrot.lane.b32.xlu1 %v5091_v17, %s4307_s26  ;;  %v7129_v51 = vshrl.u32 %v4793_v24, 16  ;;  %v3966_v21 = vrot.slane %v697_v16, 11 }
  0xb7   : > { %v694_v57 = vor.u32 %v7128_v43, %v691_v58  ;;  %v686_v60 = vsel %vm4913_vm6, %v3965_v37, %v685_v20  ;;  %v7131_v23 = vshll.u32 %v4793_v24, 16  ;;  %v7132_v37 = vshrl.u32 %v4807_v18, 16 }
  0xb8   : > { %v5101_v19 = vpack.c.b16 %v1122_v32, %v1121_v1  ;;  %v704_v54 = vrot.slane %v7129_v51, 7  ;;  %v1123_v48 = vunpack.c.l.b16 %v686_v60  ;;  %v741_v58 = vshrl.u32 %v417_v13, 16 }
  0xb9   : > { %v695_v62 = vsel %vm4913_vm6, %v687_v14, %v694_v57  ;;  %v713_v42 = vrot.slane %v7132_v37, 7  ;;  %v7133_v24 = vshll.u32 %v4807_v18, 16  ;;  %v7134_v0 = vshrl.u32 %v4845_v47, 16 }
  0xba   : > { %v1124_v61 = vunpack.c.l.b16 %v695_v62  ;;  %1362 = vrot.lane.b32.xlu2 %v5101_v19, %s4307_s26  ;;  %v707_v38 = vor.u32 %v7131_v23, %v704_v54  ;;  %v709_v33 = vrot.slane %v704_v54, 4  ;;  %v3968_v32 = vrot.slane %v741_v58, 11 }
  0xbb   : > { %v716_v12 = vor.u32 %v7133_v24, %v713_v42  ;;  %v748_v20 = vrot.slane %v7134_v0, 7  ;;  %v7135_v14 = vshrl.u32 %v4853_v29, 16  ;;  %v719_v16 = vshrl.u32 %v414_v10, 16  ;;  %v5152_v58 = vpop.permute.xlu1 %1235 }
  0xbc   : > { %v5117_v8 = vpack.c.b16 %v1124_v61, %v1123_v48  ;;  %v708_v45 = vsel %vm4913_vm6, %v3966_v21, %v707_v38  ;;  %v7136_v60 = vshrl.u32 %v4825_v52, 16  ;;  %v7137_v54 = vshll.u32 %v4845_v47, 16  ;;  %v5141_v21 = vpop.permute.xlu2 %1257 }
  0xbd   : > { %v1125_v1 = vunpack.c.l.b16 %v708_v45  ;;  %v757_v43 = vrot.slane %v7135_v14, 7  ;;  %v717_v57 = vsel %vm4913_vm6, %v709_v33, %v716_v12  ;;  %v753_v48 = vrot.slane %v748_v20, 4  ;;  %7139 = vst [vmem:[#allocation12_spill] sm:$0xff] %v5141_v21  ;;  %v4269_v45 = vld [vmem:[#allocation2 + $0x14] sm:$0xff]  ;;  %v5160_v0 = vpop.permute.xlu0 %1241  ;;  %v420_v14 = vld [vmem:[#allocation2 + $0xf0] sm:$0x8] }
  0xbe   : > { %1364 = vrot.lane.b32.xlu0 %v5117_v8, %s4307_s26  ;;  %v726_v62 = vrot.slane %v7136_v60, 7  ;;  %v1126_v51 = vunpack.c.l.b16 %v717_v57  ;;  %v751_v18 = vor.u32 %v7137_v54, %v748_v20  ;;  %v7138_v61 = vshll.u32 %v4853_v29, 16 }
  0xbf   : > { %v3967_v23 = vrot.slane %v719_v16, 11  ;;  %v7140_v38 = vshll.u32 %v4825_v52, 16  ;;  %v7141_v10 = vshrl.u32 %v4835_v50, 16  ;;  %v763_v16 = vshrl.u32 %v420_v14, 16 }
  0xc0   : > { %v760_v13 = vor.u32 %v7138_v61, %v757_v43  ;;  %v731_v42 = vrot.slane %v726_v62, 4  ;;  %v5145_v33 = vpack.c.b16 %v1126_v51, %v1125_v1  ;;  %v752_v47 = vsel %vm4913_vm6, %v3968_v32, %v751_v18 }
  0xc1   : > { %v729_v37 = vor.u32 %v7140_v38, %v726_v62  ;;  %v735_v24 = vrot.slane %v7141_v10, 7  ;;  %v1129_v52 = vunpack.c.l.b16 %v752_v47  ;;  %v7142_v32 = vshll.u32 %v4835_v50, 16 }
  0xc2   : > { %1381 = vrot.lane.b32.xlu2 %v4269_v45, %s4308_s27  ;;  %v761_v29 = vsel %vm4913_vm6, %v753_v48, %v760_v13  ;;  %1366 = vrot.lane.b32.xlu1 %v5145_v33, %s4307_s26  ;;  %v7143_v60 = vshrl.u32 %v4870_v63, 16  ;;  %v7144_v54 = vshrl.u32 %v4881_v31, 16  ;;  %v3969_v48 = vrot.slane %v763_v16, 11 }
  0xc3   : > { %v1130_v12 = vunpack.c.l.b16 %v761_v29  ;;  %v730_v1 = vsel %vm4913_vm6, %v3967_v23, %v729_v37  ;;  %v738_v20 = vor.u32 %v7142_v32, %v735_v24  ;;  %v7145_v61 = vshll.u32 %v4870_v63, 16  ;;  %v5185_v29 = vpop.permute.xlu1 %1243 }
  0xc4   : > { %v1127_v57 = vunpack.c.l.b16 %v730_v1  ;;  %v770_v62 = vrot.slane %v7143_v60, 7  ;;  %v779_v18 = vrot.slane %v7144_v54, 7  ;;  %v5176_v23 = vpop.permute.xlu2 %1311  ;;  %v7146_v38 = vshll.u32 %v4881_v31, 16  ;;  %v4272_v54 = vld [vmem:[#allocation2 + $0x44] sm:$0xff] }
  0xc5   : > { %v5166_v43 = vpack.c.b16 %v1130_v12, %v1129_v52  ;;  %v739_v51 = vsel %vm4913_vm6, %v731_v42, %v738_v20  ;;  %v4270_v42 = vld [vmem:[#allocation2 + $0x24] sm:$0xff]  ;;  %v5191_v31 = vpop.permute.xlu0 %1247  ;;  %v4271_v20 = vld [vmem:[#allocation2 + $0x34] sm:$0xff] }
  0xc6   : > { %1416 = vrot.lane.b32.xlu0 %v4606_v4, %s4309_s28  ;;  %v1128_v50 = vunpack.c.l.b16 %v739_v51  ;;  %v773_v13 = vor.u32 %v7145_v61, %v770_v62  ;;  %v775_v4 = vrot.slane %v770_v62, 4  ;;  %v782_v37 = vor.u32 %v7146_v38, %v779_v18 }
  0xc8   : > { %v5180_v45 = vpack.c.b16 %v1128_v50, %v1127_v57  ;;  %v774_v47 = vsel %vm4913_vm6, %v3969_v48, %v773_v13  ;;  %v783_v63 = vsel %vm4913_vm6, %v775_v4, %v782_v37  ;;  %v4274_v37 = vld [vmem:[#allocation2 + $0x64] sm:$0xff] }
  0xc9   : > { %v1131_v10 = vunpack.c.l.b16 %v774_v47  ;;  %v1132_v24 = vunpack.c.l.b16 %v783_v63 }
  0xca   : > { %1488 = vrot.lane.b32.xlu2 %v4270_v42, %s4310_s29  ;;  %1451 = vrot.lane.b32.xlu1 %v4973_v11, %s4311_s30 }
  0xcb   : > { %v5195_v52 = vpack.c.b16 %v1132_v24, %v1131_v10  ;;  %v5200_v1 = vpop.permute.xlu1 %1249  ;;  %v4275_v10 = vld [vmem:[#allocation2 + $0x74] sm:$0xff] }
  0xcc   : > { %v5197_v12 = vpop.permute.xlu2 %1317  ;;  %7147 = vst [vmem:[#allocation13_spill] sm:$0xff] %v5200_v1 }
  0xcd   : > { %v5204_v32 = vpop.permute.xlu0 %1253 }
  0xce   : > { %1523 = vrot.lane.b32.xlu0 %v4621_v36, %s4312_s6  ;;  %7148 = vst [vmem:[#allocation14_spill] sm:$0xff] %v5204_v32  ;;  %v7161_v32 = vshll.u32 %v4469_v15, 16 }
  0xd2   : > { %1383 = vrot.lane.b32.xlu2 %v4270_v42, %s4308_s27  ;;  %1368 = vrot.lane.b32.xlu1 %v5180_v45, %s4307_s26 }
  0xd3   : > { %v5209_v14 = vpop.permute.xlu1 %1255 }
  0xd4   : > { %7149 = vst [vmem:[#allocation15_spill] sm:$0xff] %v5209_v14  ;;  %v5211_v57 = vpop.permute.xlu2 %1323 }
  0xd5   : > { %v5215_v16 = vpop.permute.xlu0 %1259 }
  0xd6   : > { %1418 = vrot.lane.b32.xlu0 %v4621_v36, %s4309_s28  ;;  %7150 = vst [vmem:[#allocation16_spill] sm:$0xff] %v5215_v16 }
  0xda   : > { %1490 = vrot.lane.b32.xlu2 %v4271_v20, %s4310_s29  ;;  %1453 = vrot.lane.b32.xlu1 %v4983_v35, %s4311_s30 }
  0xdb   : > { %v5221_v60 = vpop.permute.xlu1 %1309 }
  0xdc   : > { %v5224_v36 = vpop.permute.xlu2 %1329 }
  0xdd   : > { %7151 = vst [vmem:[#allocation17_spill] sm:$0xff] %v5224_v36  ;;  %v5226_v62 = vpop.permute.xlu0 %1313 }
  0xde   : > { %1525 = vrot.lane.b32.xlu0 %v4647_v26, %s4312_s6 }
  0xe2   : > { %1420 = vrot.lane.b32.xlu2 %v4647_v26, %s4309_s28  ;;  %1385 = vrot.lane.b32.xlu1 %v4271_v20, %s4308_s27 }
  0xe3   : > { %v5232_v51 = vpop.permute.xlu1 %1315 }
  0xe4   : > { %v5238_v18 = vpop.permute.xlu2 %1335 }
  0xe5   : > { %v5235_v26 = vpop.permute.xlu0 %1319  ;;  %7152 = vst [vmem:[#allocation18_spill] sm:$0xff] %v5238_v18 }
  0xe6   : > { %1455 = vrot.lane.b32.xlu0 %v5003_v5, %s4311_s30  ;;  %v4273_v5 = vld [vmem:[#allocation2 + $0x54] sm:$0xff] }
  0xea   : > { %1527 = vrot.lane.b32.xlu2 %v4673_v27, %s4312_s6  ;;  %1492 = vrot.lane.b32.xlu1 %v4272_v54, %s4310_s29 }
  0xeb   : > { %v5242_v50 = vpop.permute.xlu1 %1321 }
  0xed   : > { %v5247_v48 = vpop.permute.xlu0 %1325 }
  0xee   : > { %1387 = vrot.lane.b32.xlu0 %v4272_v54, %s4308_s27  ;;  %7153 = vst [vmem:[#allocation19_spill] sm:$0xff] %v5247_v48 }
  0xf1   : > { %v5249_v61 = vpop.permute.xlu2 %1344 }
  0xf2   : > { %1457 = vrot.lane.b32.xlu2 %v5023_v41, %s4311_s30  ;;  %1422 = vrot.lane.b32.xlu1 %v4673_v27, %s4309_s28 }
  0xf3   : > { %v5253_v13 = vpop.permute.xlu1 %1327 }
  0xf5   : > { %v5258_v4 = vpop.permute.xlu0 %1331 }
  0xf6   : > { %1494 = vrot.lane.b32.xlu0 %v4273_v5, %s4310_s29  ;;  %7154 = vst [vmem:[#allocation20_spill] sm:$0xff] %v5258_v4 }
  0xfa   : > { %1370 = vrot.lane.b32.xlu2 %v5166_v43, %s4307_s26  ;;  %1529 = vrot.lane.b32.xlu1 %v4699_v46, %s4312_s6 }
  0xfb   : > { %v5266_v38 = vpop.permute.xlu1 %1333 }
  0xfc   : > { %v5262_v27 = vpop.permute.xlu2 %1350  ;;  %7155 = vst [vmem:[#allocation21_spill] sm:$0xff] %v5266_v38 }
  0xfe   : > { %1389 = vrot.lane.b32.xlu0 %v4273_v5, %s4308_s27 }
 0x100   : > { %v5270_v47 = vpop.permute.xlu0 %1337 }
 0x101   : > { %7156 = vst [vmem:[#allocation22_spill] sm:$0xff] %v5270_v47  ;;  %v7158_v47 = vshrl.u32 %v4469_v15, 16 }
 0x102   : > { %1459 = vrot.lane.b32.xlu2 %v5039_v9, %s4311_s30  ;;  %1424 = vrot.lane.b32.xlu1 %v4699_v46, %s4309_s28  ;;  %v1839_v46 = vld [vmem:[%s6975_s1 + $0x10] sm:$0x3] }
 0x103   : > { %v1849_v24 = vunpack.c.l.b16 %v1839_v46  ;;  %v4213_v46 = vld [vmem:[%s6975_s1 + $0x8] sm:$0xff]  ;;  %v449_v21 = vrot.slane %v7158_v47, 7 }
 0x104   : > { %v5278_v63 = vpop.permute.xlu1 %1339 }
 0x105   : > { %7157 = vst [vmem:[#allocation23_spill] sm:$0xff] %v5278_v63  ;;  %v1852_v5 = vpack.c.b16 %v1849_v24, %v1849_v24  ;;  %v4276_v63 = vld [vmem:[#allocation2 + $0x84] sm:$0xff]  ;;  %v452_v4 = vor.u32 %v7161_v32, %v449_v21 }
 0x106   : > { %1496 = vrot.lane.b32.xlu0 %v4274_v37, %s4310_s29 }
 0x10a   : > { %1391 = vrot.lane.b32.xlu2 %v4274_v37, %s4308_s27  ;;  %v5272_v42 = vpop.permute.xlu2 %1356  ;;  %1531 = vrot.lane.b32.xlu1 %v4729_v22, %s4312_s6 }
 0x10c   : > { %v5288_v54 = vpop.permute.xlu0 %1346 }
 0x10e   : > { %1426 = vrot.lane.b32.xlu0 %v4729_v22, %s4309_s28  ;;  %v1890_v22 = vsel %vm1888_vm8, %v1852_v5, 0  ;;  %vm3530_vm8 = vcmask 457728  }
 0x10f   : > { %1897 = vmatpush.bf16.msra.mxu0 %v1890_v22  ;;  %4236 = vmatpush.bf16.msra.mxu3 %v1890_v22  ;;  %v4212_v22 = vld [vmem:[%s6975_s1] sm:$0xff] }
 0x110   : > { %v5292_v37 = vpop.permute.xlu1 %1348 }
 0x112   : > { %1498 = vrot.lane.b32.xlu2 %v4275_v10, %s4310_s29  ;;  %1461 = vrot.lane.b32.xlu1 %v5057_v28, %s4311_s30 }
 0x113   : > { %1898 = vmatpush.bf16.msra.mxu0 %v4213_v46  ;;  %4237 = vmatpush.bf16.msra.mxu3 %v4213_v46  ;;  %v375_v46 = vld [vmem:[#allocation2] sm:$0x8] }
 0x114   : > { %v5286_v20 = vpop.permute.xlu2 %1362  ;;  %v433_v18 = vshrl.u32 %v375_v46, 16 }
 0x116   : > { %1533 = vrot.lane.b32.xlu0 %v4753_v34, %s4312_s6  ;;  %v3954_v59 = vrot.slane %v433_v18, 11  ;;  %v4277_v18 = vld [vmem:[#allocation2 + $0x94] sm:$0xff] }
 0x117   : > { %1899 = vmatpush.bf16.msra.mxu0 %v4212_v22  ;;  %4238 = vmatpush.bf16.msra.mxu3 %v4212_v22  ;;  %v7159_v22 = vld [vmem:[#allocation4_spill] sm:$0xff] }
 0x118   : > { %v7160_v14 = vshrl.u32 %v7159_v22, 16  ;;  %v7162_v36 = vshll.u32 %v7159_v22, 16 }
 0x119   : > { %v5302_v5 = vpop.permute.xlu0 %1352 }
 0x11a   : > { %1428 = vrot.lane.b32.xlu2 %v4753_v34, %s4309_s28  ;;  %1393 = vrot.lane.b32.xlu1 %v4275_v10, %s4308_s27  ;;  %v440_v38 = vrot.slane %v7160_v14, 7 }
 0x11c   : > { %v1382_v24 = vpop.permute.xlu2 %1381  ;;  %v5309_v34 = vpop.permute.xlu1 %1354  ;;  %v443_v1 = vor.u32 %v7162_v36, %v440_v38  ;;  %v445_v48 = vrot.slane %v440_v38, 4  ;;  %v7163_v36 = vld [vmem:[#allocation5_spill] sm:$0xff] }
 0x11e   : > { %1463 = vrot.lane.b32.xlu0 %v5069_v40, %s4311_s30  ;;  %v444_v14 = vsel %vm4913_vm6, %v3954_v59, %v443_v1  ;;  %v453_v15 = vsel %vm4913_vm6, %v445_v48, %v452_v4 }
 0x11f   : > { %v1101_v21 = vunpack.c.l.b16 %v444_v14  ;;  %v1102_v32 = vunpack.c.l.b16 %v453_v15  ;;  %v7164_v14 = vld [vmem:[#allocation6_spill] sm:$0xff] }
 0x121   : > { %v1133_v46 = vpack.c.b16 %v1102_v32, %v1101_v21 }
 0x122   : > { %1535 = vrot.lane.b32.xlu2 %v4773_v7, %s4312_s6  ;;  %1500 = vrot.lane.b32.xlu1 %v4276_v63, %s4310_s29 }
 0x123   : > { %v5314_v16 = vpop.permute.xlu0 %1358  ;;  %v1558_v1 = vsel %vm1555_vm7, %v1133_v46, %v5079_v55 }
 0x124   : > { %v1489_v10 = vpop.permute.xlu2 %1488  ;;  %v1606_v48 = vsel %vm1604_vm10, %v1558_v1, %v5221_v60 }
 0x125   : > { %v1639_v4 = vsel %vm1637_vm9, %v1606_v48, %v5249_v61 }
 0x126   : > { %1372 = vrot.lane.b32.xlu0 %v5195_v52, %s4307_s26  ;;  %v1672_v21 = vsel %vm1670_vm11, %v1639_v4, %v1382_v24  ;;  %v4279_v24 = vld [vmem:[#allocation2 + $0xb4] sm:$0xff] }
 0x128   : > { %v5327_v40 = vpop.permute.xlu1 %1360 }
 0x12a   : > { %1430 = vrot.lane.b32.xlu2 %v4773_v7, %s4309_s28  ;;  %1395 = vrot.lane.b32.xlu1 %v4276_v63, %s4308_s27  ;;  %v4278_v63 = vld [vmem:[#allocation2 + $0xa4] sm:$0xff] }
 0x12c   : > { %v1384_v47 = vpop.permute.xlu2 %1383 }
 0x12e   : > { %1465 = vrot.lane.b32.xlu0 %v5091_v17, %s4311_s30 }
 0x130   : > { %v5335_v7 = vpop.permute.xlu0 %1364 }
 0x132   : > { %1537 = vrot.lane.b32.xlu2 %v7163_v36, %s4312_s6  ;;  %1502 = vrot.lane.b32.xlu1 %v4277_v18, %s4310_s29 }
 0x134   : > { %v1491_v38 = vpop.permute.xlu2 %1490  ;;  %v5341_v22 = vpop.permute.xlu1 %1366 }
 0x136   : > { %1399 = vrot.lane.b32.xlu0 %v4278_v63, %s4308_s27 }
 0x138   : > { %v1417_v59 = vpop.permute.xlu0 %1416 }
 0x139   : > { %v1705_v55 = vsel %vm1703_vm12, %v1672_v21, %v1417_v59  ;;  %v7165_v59 = vld [vmem:[#allocation7_spill] sm:$0xff] }
 0x13a   : > { %1469 = vrot.lane.b32.xlu2 %v5117_v8, %s4311_s30  ;;  %1434 = vrot.lane.b32.xlu1 %v7164_v14, %s4309_s28 }
 0x13c   : > { %v1421_v15 = vpop.permute.xlu2 %1420  ;;  %v1452_v32 = vpop.permute.xlu1 %1451 }
 0x13d   : > { %v1738_v60 = vsel %vm1736_vm13, %v1705_v55, %v1452_v32 }
 0x13e   : > { %1397 = vrot.lane.b32.xlu0 %v4277_v18, %s4308_s27  ;;  %v1771_v61 = vsel %vm1769_vm14, %v1738_v60, %v1489_v10  ;;  %v1561_v10 = vsel %vm1555_vm7, %v4953_v6, %v5123_v2 }
 0x13f   : > { %v1608_v21 = vsel %vm1604_vm10, %v1561_v10, %v5176_v23  ;;  %v7166_v10 = vld [vmem:[#allocation8_spill] sm:$0xff] }
 0x140   : > { %v1524_v46 = vpop.permute.xlu0 %1523 }
 0x141   : > { %v1804_v1 = vsel %vm1802_vm15, %v1771_v61, %v1524_v46 }
 0x142   : > { %4052 = vmatmul.msk.bf16.vlgmr.msra.gmra.mxu0 %vm1855_vm1, %v1804_v1  ;;  %1432 = vrot.lane.b32.xlu2 %v7163_v36, %s4309_s28  ;;  %v1641_v36 = vsel %vm1637_vm9, %v1608_v21, %v5288_v54 }
 0x143   : > { %1506 = vrot.lane.b32.xlu1 %v4279_v24, %s4310_s29  ;;  %v1674_v32 = vsel %vm1670_vm11, %v1641_v36, %v1384_v47 }
 0x144   : > { %v1528_v18 = vpop.permute.xlu2 %1527  ;;  %v5365_v48 = vpop.permute.xlu1 %1368 }
 0x146   : > { %1541 = vrot.lane.b32.xlu0 %v7165_v59, %s4312_s6 }
 0x148   : > { %v1419_v4 = vpop.permute.xlu0 %1418 }
 0x149   : > { %v1707_v60 = vsel %vm1703_vm12, %v1674_v32, %v1419_v4  ;;  %v341_v4 = vld [vmem:[%s4436_s24 + $0x7c] sm:$0xf] }
 0x14a   : > { %1504 = vrot.lane.b32.xlu2 %v4278_v63, %s4310_s29  ;;  %374 = vst.msk [vmem:[#allocation2 + $0x108] sm:$0xf] %vm226_vm0, %v341_v4  ;;  %v4282_v4 = vld [vmem:[#allocation2 + $0xe4] sm:$0xff] }
 0x14b   : > { %1467 = vrot.lane.b32.xlu1 %v5101_v19, %s4311_s30 }
 0x14c   : > { %v1458_v55 = vpop.permute.xlu2 %1457  ;;  %v1454_v6 = vpop.permute.xlu1 %1453 }
 0x14d   : > { %v1740_v2 = vsel %vm1736_vm13, %v1707_v60, %v1454_v6  ;;  %v1567_v6 = vsel %vm1555_vm7, %v4983_v35, %v5152_v58 }
 0x14e   : > { %1539 = vrot.lane.b32.xlu0 %v7164_v14, %s4312_s6  ;;  %v1773_v63 = vsel %vm1769_vm14, %v1740_v2, %v1491_v38  ;;  %v1564_v14 = vsel %vm1555_vm7, %v4973_v11, %v5115_v3  ;;  %v4280_v3 = vld [vmem:[#allocation2 + $0xc4] sm:$0xff] }
 0x14f   : > { %v1610_v38 = vsel %vm1604_vm10, %v1564_v14, %v5226_v62 }
 0x150   : > { %v1526_v23 = vpop.permute.xlu0 %1525  ;;  %v1643_v61 = vsel %vm1637_vm9, %v1610_v38, %v5292_v37 }
 0x151   : > { %v1806_v54 = vsel %vm1802_vm15, %v1773_v63, %v1526_v23 }
 0x152   : > { %4053 = vmatmul.msk.bf16.gmra.mxu0 %vm1855_vm1, %v1806_v54  ;;  %1436 = vrot.lane.b32.xlu2 %v7165_v59, %s4309_s28 }
 0x153   : > { %1401 = vrot.lane.b32.xlu1 %v4279_v24, %s4308_s27  ;;  %v340_v24 = vld [vmem:[%s4436_s24 + $0x78] sm:$0xf]  ;;  %s4314_s24 = smov 56  }
 0x154   : > { %v5388_v47 = vpop.permute.xlu2 %1370  ;;  %v1386_v46 = vpop.permute.xlu1 %1385  ;;  %373 = vst.msk [vmem:[#allocation2 + $0x104] sm:$0xf] %vm226_vm0, %v340_v24  ;;  %vm268_vm0 = vcmask 60416  }
 0x155   : > { %v1676_v59 = vsel %vm1670_vm11, %v1643_v61, %v1386_v46  ;;  %v7167_v46 = vld [vmem:[#allocation9_spill] sm:$0xff] }
 0x156   : > { %1471 = vrot.lane.b32.xlu0 %v5145_v33, %s4311_s30  ;;  %v1709_v11 = vsel %vm1703_vm12, %v1676_v59, %v1421_v15  ;;  %v4281_v15 = vld [vmem:[#allocation2 + $0xd4] sm:$0xff]  ;;  %v425_v59 = vld [vmem:[#allocation2 + $0x108] sm:$0xf] }
 0x158   : > { %v1456_v1 = vpop.permute.xlu0 %1455 }
 0x159   : > { %v1742_v37 = vsel %vm1736_vm13, %v1709_v11, %v1456_v1  ;;  %v799_v11 = vshrl.u32 %v425_v59, 16 }
 0x15a   : > { %1543 = vrot.lane.b32.xlu2 %v7166_v10, %s4312_s6 }
 0x15b   : > { %1508 = vrot.lane.b32.xlu1 %v4280_v3, %s4310_s29 }
 0x15c   : > { %v1460_v62 = vpop.permute.xlu2 %1459  ;;  %v1493_v21 = vpop.permute.xlu1 %1492 }
 0x15d   : > { %v1775_v36 = vsel %vm1769_vm14, %v1742_v37, %v1493_v21 }
 0x15e   : > { %1403 = vrot.lane.b32.xlu0 %v4280_v3, %s4308_s27  ;;  %v1808_v60 = vsel %vm1802_vm15, %v1775_v36, %v1528_v18  ;;  %v1612_v18 = vsel %vm1604_vm10, %v1567_v6, %v5232_v51  ;;  %v1614_v3 = vsel %vm1604_vm10, %v5015_v30, %v5197_v12  ;;  %v802_v6 = vshll.u32 %v425_v59, 16 }
 0x15f   : > { %v1645_v54 = vsel %vm1637_vm9, %v1612_v18, %v5262_v27  ;;  %v424_v27 = vld [vmem:[#allocation2 + $0x104] sm:$0xf] }
 0x160   : > { %v1388_v32 = vpop.permute.xlu0 %1387 }
 0x161   : > { %v1678_v14 = vsel %vm1670_vm11, %v1645_v54, %v1388_v32 }
 0x162   : > { %4054 = vmatmul.msk.bf16.gmra.mxu0 %vm1855_vm1, %v1808_v60  ;;  %1473 = vrot.lane.b32.xlu2 %v5180_v45, %s4311_s30  ;;  %v793_v60 = vshll.u32 %v424_v27, 16 }
 0x163   : > { %1438 = vrot.lane.b32.xlu1 %v7166_v10, %s4309_s28  ;;  %v423_v10 = vld [vmem:[#allocation2 + $0x100] sm:$0x8] }
 0x164   : > { %v1423_v2 = vpop.permute.xlu1 %1422  ;;  %v5421_v23 = vpop.permute.xlu2 %1391  ;;  %v785_v21 = vshrl.u32 %v423_v10, 16 }
 0x165   : > { %v1711_v38 = vsel %vm1703_vm12, %v1678_v14, %v1423_v2  ;;  %v1647_v2 = vsel %vm1637_vm9, %v1614_v3, %v5302_v5 }
 0x166   : > { %1510 = vrot.lane.b32.xlu0 %v4281_v15, %s4310_s29  ;;  %v1744_v35 = vsel %vm1736_vm13, %v1711_v38, %v1458_v55  ;;  %v790_v55 = vshrl.u32 %v424_v27, 16  ;;  %v3970_v30 = vrot.slane %v785_v21, 11 }
 0x168   : > { %v1495_v63 = vpop.permute.xlu0 %1494  ;;  %v792_v32 = vrot.slane %v790_v55, 7 }
 0x169   : > { %v1777_v61 = vsel %vm1769_vm14, %v1744_v35, %v1495_v63  ;;  %v1074_v35 = vrot.slane %v793_v60, 5 }
 0x16a   : > { %1405 = vrot.lane.b32.xlu2 %v4281_v15, %s4308_s27  ;;  %v801_v15 = vrot.slane %v799_v11, 7  ;;  %v795_v12 = vor.u32 %v793_v60, %v792_v32  ;;  %v797_v14 = vrot.slane %v792_v32, 4  ;;  %v4283_v32 = vld [vmem:[#allocation2 + $0xf4] sm:$0xff] }
 0x16b   : > { %1545 = vrot.lane.b32.xlu1 %v7167_v46, %s4312_s6 }
 0x16c   : > { %v1530_v58 = vpop.permute.xlu1 %1529  ;;  %v5436_v1 = vpop.permute.xlu2 %1498  ;;  %v804_v38 = vor.u32 %v802_v6, %v801_v15 }
 0x16d   : > { %v1810_v24 = vsel %vm1802_vm15, %v1777_v61, %v1530_v58  ;;  %v1077_v58 = vrot.slane %v802_v6, 5  ;;  %v1079_v61 = vrot.slane %v799_v11, 4  ;;  %v1573_v6 = vsel %vm1555_vm7, %v5023_v41, %v5021_v25 }
 0x16e   : > { %1440 = vrot.lane.b32.xlu0 %v7167_v46, %s4309_s28  ;;  %v1073_v46 = vrot.slane %v790_v55, 4 }
 0x16f   : > { %v1080_v55 = vor.u32 %v1079_v61, %v1077_v58 }
 0x170   : > { %v1390_v51 = vpop.permute.xlu0 %1389  ;;  %v1075_v10 = vor.u32 %v1074_v35, %v1073_v46 }
 0x171   : > { %v1680_v18 = vsel %vm1670_vm11, %v1647_v2, %v1390_v51  ;;  %v844_v51 = vld [vmem:[#allocation2 + $0x10c] sm:$0x1]  ;;  %v1081_v15 = vrot.slane %v1080_v55, 4  ;;  %v427_v2 = vld [vmem:[#allocation2 + $0x114] sm:$0xf] }
 0x172   : > { %4055 = vmatmul.msk.bf16.gmra.mxu0 %vm1855_vm1, %v1810_v24  ;;  %1512 = vrot.lane.b32.xlu2 %v4282_v4, %s4310_s29  ;;  %v805_v24 = vsel %vm4913_vm6, %v797_v14, %v804_v38  ;;  %v1083_v3 = vshll.u32 %v844_v51, 16  ;;  %v1076_v60 = vrot.slane %v1075_v10, 4  ;;  %v812_v41 = vshrl.u32 %v427_v2, 16 }
 0x173   : > { %1475 = vrot.lane.b32.xlu1 %v5166_v43, %s4311_s30 }
 0x174   : > { %v1425_v37 = vpop.permute.xlu1 %1424  ;;  %v5452_v54 = vpop.permute.xlu2 %1428  ;;  %v1078_v35 = vsel %vm4521_vm3, %v1076_v60, %v1077_v58  ;;  %v1087_v58 = vrot.slane %v812_v41, 4  ;;  %v814_v10 = vrot.slane %v812_v41, 7  ;;  %v845_v60 = vld [vmem:[#allocation2 + $0x11c] sm:$0x1] }
 0x175   : > { %v1713_v63 = vsel %vm1703_vm12, %v1680_v18, %v1425_v37  ;;  %v1342_v37 = vunpack.c.l.b16 %v805_v24  ;;  %v1616_v18 = vsel %vm1604_vm10, %v1573_v6, %v5235_v26  ;;  %v4210_v26 = vld [vmem:[#allocation2 + $0x104] sm:$0xff] }
 0x176   : > { %1547 = vrot.lane.b32.xlu0 %v4921_v56, %s4312_s6  ;;  %v1746_v5 = vsel %vm1736_vm13, %v1713_v63, %v1460_v62  ;;  %v1649_v14 = vsel %vm1637_vm9, %v1616_v18, %v5309_v34  ;;  %v1413_v34 = vunpack.c.l.b16 %v1078_v35  ;;  %v819_v6 = vrot.slane %v814_v10, 4 }
 0x177   : > { %v1682_v46 = vsel %vm1670_vm11, %v1649_v14, %v5421_v23  ;;  %v426_v23 = vld [vmem:[#allocation2 + $0x110] sm:$0x8]  ;;  %v1097_v35 = vshll.u32 %v845_v60, 16  ;;  %v1579_v60 = vsel %vm1555_vm7, %v5057_v28, %v5185_v29 }
 0x178   : > { %v1497_v36 = vpop.permute.xlu0 %1496 }
 0x17a   : > { %1442 = vrot.lane.b32.xlu2 %v4921_v56, %s4309_s28  ;;  %v796_v56 = vsel %vm4913_vm6, %v3970_v30, %v795_v12  ;;  %v428_v12 = vld [vmem:[#allocation2 + $0x118] sm:$0xf] }
 0x17b   : > { %1407 = vrot.lane.b32.xlu1 %v4282_v4, %s4308_s27  ;;  %v1779_v4 = vsel %vm1769_vm14, %v1746_v5, %v1497_v36  ;;  %v1341_v62 = vunpack.c.l.b16 %v796_v56  ;;  %v1085_v36 = vrot.slane %v1083_v3, 5  ;;  %v815_v5 = vshll.u32 %v427_v2, 16 }
 0x17c   : > { %v1532_v27 = vpop.permute.xlu1 %1531  ;;  %v5469_v21 = vpop.permute.xlu2 %1535  ;;  %v821_v51 = vshrl.u32 %v428_v12, 16 }
 0x17d   : > { %v1812_v11 = vsel %vm1802_vm15, %v1779_v4, %v1532_v27  ;;  %v1343_v30 = vpack.c.b16 %v1342_v37, %v1341_v62  ;;  %v1086_v25 = vsel %vm4521_vm3, %v1081_v15, %v1085_v36  ;;  %v824_v27 = vshll.u32 %v428_v12, 16 }
 0x17e   : > { %1477 = vrot.lane.b32.xlu0 %v5195_v52, %s4311_s30  ;;  %v1414_v24 = vunpack.c.l.b16 %v1086_v25  ;;  %v807_v4 = vshrl.u32 %v426_v23, 16  ;;  %v823_v55 = vrot.slane %v821_v51, 7  ;;  %v1088_v3 = vrot.slane %v815_v5, 5 }
 0x17f   : > { %v1093_v62 = vrot.slane %v821_v51, 4  ;;  %v817_v36 = vor.u32 %v815_v5, %v814_v10 }
 0x180   : > { %v1427_v59 = vpop.permute.xlu0 %1426  ;;  %v3971_v15 = vrot.slane %v807_v4, 11  ;;  %v1415_v18 = vpack.c.b16 %v1414_v24, %v1413_v34  ;;  %v1089_v14 = vor.u32 %v1088_v3, %v1087_v58 }
 0x181   : > { %v1715_v61 = vsel %vm1703_vm12, %v1682_v46, %v1427_v59 }
 0x182   : > { %4056 = vmatmul.msk.bf16.gmra.mxu0 %vm1855_vm1, %v1812_v11  ;;  %1549 = vrot.lane.b32.xlu2 %v4941_v39, %s4312_s6  ;;  %v1091_v11 = vrot.slane %v824_v27, 5 }
 0x183   : > { %1514 = vrot.lane.b32.xlu1 %v4283_v32, %s4310_s29 }
 0x184   : > { %v1462_v63 = vpop.permute.xlu1 %1461  ;;  %v5494_v37 = vpop.permute.xlu2 %1430  ;;  %v1094_v46 = vor.u32 %v1093_v62, %v1091_v11  ;;  %v7168_v62 = vmov 0  }
 0x185   : > { %v1748_v56 = vsel %vm1736_vm13, %v1715_v61, %v1462_v63  ;;  %v818_v63 = vsel %vm4913_vm6, %v3971_v15, %v817_v36  ;;  %v1576_v61 = vsel %vm1555_vm7, %v5039_v9, %v5160_v0  ;;  %v4211_v0 = vld [vmem:[#allocation2 + $0x114] sm:$0xff]  ;;  %269 = vst.msk [vmem:[#allocation3] sm:$0xf] %vm268_vm0, %v7168_v62 }
 0x186   : > { %1409 = vrot.lane.b32.xlu0 %v4283_v32, %s4308_s27  ;;  %v1781_v59 = vsel %vm1769_vm14, %v1748_v56, %v5436_v1  ;;  %v1448_v25 = vunpack.c.l.b16 %v818_v63  ;;  %v1618_v5 = vsel %vm1604_vm10, %v1576_v61, %v5242_v50  ;;  %v1095_v51 = vrot.slane %v1094_v46, 4  ;;  %270 = vst.msk [vmem:[#allocation3 + $0x10] sm:$0xf] %vm268_vm0, %v7168_v62 }
 0x187   : > { %v1651_v56 = vsel %vm1637_vm9, %v1618_v5, %v5272_v42  ;;  %271 = vst.msk [vmem:[#allocation3 + $0x20] sm:$0xf] %vm268_vm0, %v7168_v62  ;;  %v7170_v5 = vld [vmem:[#allocation19_spill] sm:$0xff] }
 0x188   : > { %v1534_v38 = vpop.permute.xlu0 %1533  ;;  %272 = vst.msk [vmem:[#allocation3 + $0x30] sm:$0xf] %vm268_vm0, %v7168_v62 }
 0x189   : > { %v1814_v1 = vsel %vm1802_vm15, %v1781_v59, %v1534_v38  ;;  %v1090_v38 = vrot.slane %v1089_v14, 4  ;;  %273 = vst.msk [vmem:[#allocation3 + $0x40] sm:$0xf] %vm268_vm0, %v7168_v62 }
 0x18a   : > { %1479 = vrot.lane.b32.xlu2 %v1343_v30, %s4311_s30  ;;  %274 = vst.msk [vmem:[#allocation3 + $0x50] sm:$0xf] %vm268_vm0, %v7168_v62 }
 0x18b   : > { %1444 = vrot.lane.b32.xlu1 %v4941_v39, %s4309_s28  ;;  %v826_v39 = vor.u32 %v824_v27, %v823_v55  ;;  %v1099_v27 = vrot.slane %v1097_v35, 5  ;;  %v1092_v58 = vsel %vm4521_vm3, %v1090_v38, %v1091_v11  ;;  %275 = vst.msk [vmem:[#allocation3 + $0x60] sm:$0xf] %vm268_vm0, %v7168_v62 }
 0x18c   : > { %v1394_v32 = vpop.permute.xlu1 %1393  ;;  %v1538_v9 = vpop.permute.xlu2 %1537  ;;  %v1520_v42 = vunpack.c.l.b16 %v1092_v58  ;;  %276 = vst.msk [vmem:[#allocation3 + $0x70] sm:$0xf] %vm268_vm0, %v7168_v62 }
 0x18d   : > { %v827_v12 = vsel %vm4913_vm6, %v819_v6, %v826_v39  ;;  %v1684_v24 = vsel %vm1670_vm11, %v1651_v56, %v1394_v32  ;;  %v1100_v50 = vsel %vm4521_vm3, %v1095_v51, %v1099_v27  ;;  %277 = vst.msk [vmem:[#allocation3 + $0x80] sm:$0xf] %vm268_vm0, %v7168_v62  ;;  %v5624_v27 = vld [vmem:[%s6976_s2] ss:$0 sm:$0xff] }
 0x18e   : > { %1516 = vrot.lane.b32.xlu0 %v4210_v26, %s4310_s29  ;;  %v1449_v41 = vunpack.c.l.b16 %v827_v12  ;;  %v1521_v4 = vunpack.c.l.b16 %v1100_v50  ;;  %278 = vst.msk [vmem:[#allocation3 + $0x90] sm:$0xf] %vm268_vm0, %v7168_v62 }
 0x18f   : > { %279 = vst.msk [vmem:[#allocation3 + $0xa0] sm:$0xf] %vm268_vm0, %v7168_v62 }
 0x190   : > { %v1464_v2 = vpop.permute.xlu0 %1463  ;;  %v1450_v34 = vpack.c.b16 %v1449_v41, %v1448_v25  ;;  %v1522_v11 = vpack.c.b16 %v1521_v4, %v1520_v42  ;;  %280 = vst.msk [vmem:[#allocation3 + $0xb0] sm:$0xf] %vm268_vm0, %v7168_v62  ;;  %v7169_v25 = vld [vmem:[#allocation10_spill] sm:$0xff] }
 0x191   : > { %281 = vst.msk [vmem:[#allocation3 + $0xc0] sm:$0xf] %vm268_vm0, %v7168_v62  ;;  %v1582_v41 = vsel %vm1555_vm7, %v7169_v25, %v5065_v44 }
 0x192   : > { %4057 = vmatmul.msk.bf16.gmra.mxu0 %vm1855_vm1, %v1814_v1  ;;  %1374 = vrot.lane.b32.xlu2 %v1343_v30, %s4307_s26  ;;  %282 = vst.msk [vmem:[#allocation3 + $0xd0] sm:$0xf] %vm268_vm0, %v7168_v62  ;;  %v1622_v38 = vsel %vm1604_vm10, %v1582_v41, %v7170_v5  ;;  %s4315_s26 = smov 64  }
 0x193   : > { %1551 = vrot.lane.b32.xlu1 %v1415_v18, %s4312_s6  ;;  %283 = vst.msk [vmem:[#allocation3 + $0xe0] sm:$0xf] %vm268_vm0, %v7168_v62  ;;  %v1655_v51 = vsel %vm1637_vm9, %v1622_v38, %v5327_v40 }
 0x194   : > { %v1501_v30 = vpop.permute.xlu1 %1500  ;;  %v1470_v32 = vpop.permute.xlu2 %1469  ;;  %284 = vst.msk [vmem:[#allocation3 + $0xf0] sm:$0xf] %vm268_vm0, %v7168_v62 }
 0x195   : > { %285 = vst.msk [vmem:[#allocation3 + $0x100] sm:$0xf] %vm268_vm0, %v7168_v62 }
 0x196   : > { %1411 = vrot.lane.b32.xlu0 %v4210_v26, %s4308_s27  ;;  %v1717_v26 = vsel %vm1703_vm12, %v1684_v24, %v5452_v54  ;;  %286 = vst.msk [vmem:[#allocation3 + $0x110] sm:$0xf] %vm268_vm0, %v7168_v62 }
 0x197   : > { %v1750_v10 = vsel %vm1736_vm13, %v1717_v26, %v1464_v2  ;;  %287 = vst.msk [vmem:[#allocation3 + $0xc] sm:$0xf] %vm268_vm0, %v7168_v62 }
 0x198   : > { %v5513_v23 = vpop.permute.xlu0 %1372  ;;  %v1783_v55 = vsel %vm1769_vm14, %v1750_v10, %v1501_v30  ;;  %288 = vst.msk [vmem:[#allocation3 + $0x1c] sm:$0xf] %vm268_vm0, %v7168_v62  ;;  %v5634_v30 = vld [vmem:[%s6976_s2 + $0x1] ss:$0 sm:$0xff]  ;;  %v7171_v10 = vld [vmem:[#allocation13_spill] sm:$0xff] }
 0x199   : > { %v1816_v54 = vsel %vm1802_vm15, %v1783_v55, %v5469_v21  ;;  %v1620_v21 = vsel %vm1604_vm10, %v1579_v60, %v5211_v57  ;;  %289 = vst.msk [vmem:[#allocation3 + $0x2c] sm:$0xf] %vm268_vm0, %v7168_v62  ;;  %v1588_v55 = vsel %vm1555_vm7, %v5101_v19, %v7171_v10  ;;  %v2152_v10 = vld [vmem:[#allocation3 + $0x20] sm:$0x8] }
 0x19a   : > { %1481 = vrot.lane.b32.xlu2 %v1450_v34, %s4311_s30  ;;  %v1653_v15 = vsel %vm1637_vm9, %v1620_v21, %v5314_v16  ;;  %290 = vst.msk [vmem:[#allocation3 + $0x3c] sm:$0xf] %vm268_vm0, %v7168_v62 }
 0x19b   : > { %1446 = vrot.lane.b32.xlu1 %v1415_v18, %s4309_s28  ;;  %291 = vst.msk [vmem:[#allocation3 + $0x4c] sm:$0xf] %vm268_vm0, %v7168_v62  ;;  %s4316_s28 = smov 40  }
 0x19c   : > { %v1396_v59 = vpop.permute.xlu1 %1395  ;;  %v1433_v16 = vpop.permute.xlu2 %1432  ;;  %292 = vst.msk [vmem:[#allocation3 + $0x5c] sm:$0xf] %vm268_vm0, %v7168_v62 }
 0x19d   : > { %v1686_v28 = vsel %vm1670_vm11, %v1653_v15, %v1396_v59  ;;  %293 = vst.msk [vmem:[#allocation3 + $0x6c] sm:$0xf] %vm268_vm0, %v7168_v62  ;;  %v7172_v59 = vld [vmem:[#allocation17_spill] sm:$0xff] }
 0x19e   : > { %1518 = vrot.lane.b32.xlu0 %v4211_v0, %s4310_s29  ;;  %v1719_v57 = vsel %vm1703_vm12, %v1686_v28, %v5494_v37  ;;  %v1585_v37 = vsel %vm1555_vm7, %v5091_v17, %v5191_v31  ;;  %294 = vst.msk [vmem:[#allocation3 + $0x7c] sm:$0xf] %vm268_vm0, %v7168_v62 }
 0x19f   : > { %v1624_v63 = vsel %vm1604_vm10, %v1585_v37, %v5253_v13  ;;  %295 = vst.msk [vmem:[#allocation3 + $0x8c] sm:$0xf] %vm268_vm0, %v7168_v62 }
 0x1a0   : > { %v1466_v3 = vpop.permute.xlu0 %1465  ;;  %v1657_v12 = vsel %vm1637_vm9, %v1624_v63, %v5286_v20  ;;  %296 = vst.msk [vmem:[#allocation3 + $0x9c] sm:$0xf] %vm268_vm0, %v7168_v62 }
 0x1a1   : > { %v1752_v6 = vsel %vm1736_vm13, %v1719_v57, %v1466_v3  ;;  %297 = vst.msk [vmem:[#allocation3 + $0xac] sm:$0xf] %vm268_vm0, %v7168_v62  ;;  %v1626_v3 = vsel %vm1604_vm10, %v1588_v55, %v7172_v59 }
 0x1a2   : > { %4058 = vmatmul.msk.bf16.gmra.mxu0 %vm1855_vm1, %v1816_v54  ;;  %298 = vst.msk [vmem:[#allocation3 + $0xbc] sm:$0xf] %vm268_vm0, %v7168_v62 }
 0x1a3   : > { %1553 = vrot.lane.b32.xlu1 %v1522_v11, %s4312_s6  ;;  %299 = vst.msk [vmem:[#allocation3 + $0xcc] sm:$0xf] %vm268_vm0, %v7168_v62 }
 0x1a4   : > { %v1503_v36 = vpop.permute.xlu1 %1502  ;;  %v1505_v13 = vpop.permute.xlu2 %1504  ;;  %300 = vst.msk [vmem:[#allocation3 + $0xdc] sm:$0xf] %vm268_vm0, %v7168_v62 }
 0x1a5   : > { %v1785_v39 = vsel %vm1769_vm14, %v1752_v6, %v1503_v36  ;;  %301 = vst.msk [vmem:[#allocation3 + $0xec] sm:$0xf] %vm268_vm0, %v7168_v62 }
 0x1a6   : > { %v1818_v1 = vsel %vm1802_vm15, %v1785_v39, %v1538_v9  ;;  %302 = vst.msk [vmem:[#allocation3 + $0xfc] sm:$0xf] %vm268_vm0, %v7168_v62 }
 0x1a7   : > { %303 = vst.msk [vmem:[#allocation3 + $0x10c] sm:$0xf] %vm268_vm0, %v7168_v62 }
 0x1a8   : > { %v1400_v29 = vpop.permute.xlu0 %1399  ;;  %304 = vst.msk [vmem:[#allocation3 + $0x11c] sm:$0xf] %vm268_vm0, %v7168_v62 }
 0x1a9   : > { %v1690_v17 = vsel %vm1670_vm11, %v1657_v12, %v1400_v29  ;;  %305 = vst.msk [vmem:[#allocation3 + $0x4] sm:$0xf] %vm268_vm0, %v7168_v62 }
 0x1aa   : > { %306 = vst.msk [vmem:[#allocation3 + $0x8] sm:$0xf] %vm268_vm0, %v7168_v62 }
 0x1ab   : > { %308 = vst.msk [vmem:[#allocation3 + $0x114] sm:$0xf] %vm268_vm0, %v7168_v62 }
 0x1ac   : > { %v1435_v2 = vpop.permute.xlu1 %1434  ;;  %v1437_v0 = vpop.permute.xlu2 %1436  ;;  %309 = vst.msk [vmem:[#allocation3 + $0x118] sm:$0xf] %vm268_vm0, %v7168_v62 }
 0x1ad   : > { %v1723_v31 = vsel %vm1703_vm12, %v1690_v17, %v1435_v2 }
 0x1ae   : > { %v1756_v14 = vsel %vm1736_vm13, %v1723_v31, %v1470_v32  ;;  %v1659_v32 = vsel %vm1637_vm9, %v1626_v3, %v5335_v7 }
 0x1b0   : > { %v1398_v18 = vpop.permute.xlu0 %1397 }
 0x1b1   : > { %v1688_v44 = vsel %vm1670_vm11, %v1655_v51, %v1398_v18  ;;  %v4214_v37 = vld [vmem:[#allocation3 + $0x4] sm:$0xff] }
 0x1b2   : > { %4059 = vmatmul.msk.bf16.gmra.mxu0 %vm1855_vm1, %v1818_v1  ;;  %v1721_v56 = vsel %vm1703_vm12, %v1688_v44, %v1433_v16  ;;  %2994 = vrot.lane.b32.xlu2 %v4214_v37, %s4306_s25  ;;  %v7173_v1 = vld [vmem:[#allocation11_spill] sm:$0xff] }
 0x1b3   : > { %v1591_v17 = vsel %vm1555_vm7, %v5117_v8, %v7173_v1 }
 0x1b4   : > { %v1544_v36 = vpop.permute.xlu2 %1543 }
 0x1b5   : > { %v1507_v20 = vpop.permute.xlu1 %1506 }
 0x1b6   : > { %v1789_v46 = vsel %vm1769_vm14, %v1756_v14, %v1507_v20  ;;  %v7174_v20 = vld [vmem:[#allocation20_spill] sm:$0xff] }
 0x1b7   : > { %v1628_v14 = vsel %vm1604_vm10, %v1591_v17, %v7174_v20 }
 0x1b8   : > { %v1542_v35 = vpop.permute.xlu0 %1541 }
 0x1b9   : > { %v1822_v61 = vsel %vm1802_vm15, %v1789_v46, %v1542_v35  ;;  %v1661_v46 = vsel %vm1637_vm9, %v1628_v14, %v5341_v22 }
 0x1ba   : > { %4061 = vmatmul.msk.bf16.vlgmr.msra.gmra.mxu3 %vm1855_vm1, %v1822_v61 }
 0x1bc   : > { %v1474_v31 = vpop.permute.xlu2 %1473 }
 0x1bd   : > { %v1468_v40 = vpop.permute.xlu1 %1467 }
 0x1be   : > { %v1754_v34 = vsel %vm1736_vm13, %v1721_v56, %v1468_v40 }
 0x1bf   : > { %v1901_v24 = vpop.f32.mrf.mxu0  ;;  %v1787_v50 = vsel %vm1769_vm14, %v1754_v34, %v1505_v13 }
 0x1c0   : > { %v1540_v9 = vpop.permute.xlu0 %1539  ;;  %v1983_v58 = vmul.f32 %v5624_v27, %v1901_v24 }
 0x1c1   : > { %v1820_v26 = vsel %vm1802_vm15, %v1787_v50, %v1540_v9 }
 0x1c2   : > { %v2017_v42 = vadd.f32 %v5634_v30, %v1983_v58  ;;  %4060 = vmatmul.msk.bf16.gmra.mxu0 %vm1855_vm1, %v1820_v26 }
 0x1c4   : > { %v2049_v4 = vmax.f32 %v2017_v42, 0.0  ;;  %v1406_v56 = vpop.permute.xlu2 %1405 }
 0x1c5   : > { %v1402_v54 = vpop.permute.xlu1 %1401 }
 0x1c6   : > { %v2081_v11 = vpack.c.bf16 %v2049_v4, %v2049_v4  ;;  %v1692_v19 = vsel %vm1670_vm11, %v1659_v32, %v1402_v54  ;;  %v2245_v54 = vshrl.u32 %v2152_v10, 16 }
 0x1c7   : > { %v1903_v60 = vpop.f32.mrf.mxu0  ;;  %v1725_v29 = vsel %vm1703_vm12, %v1692_v19, %v1437_v0  ;;  %v7176_v19 = vld [vmem:[#allocation21_spill] sm:$0xff] }
 0x1c8   : > { %v1472_v21 = vpop.permute.xlu0 %1471  ;;  %2114 = vst.msk [vmem:[#allocation3 + $0x14] sm:$0xf] %vm268_vm0, %v2081_v11  ;;  %v1984_v15 = vmul.f32 %v5624_v27, %v1903_v60  ;;  %v7175_v60 = vld [vmem:[#allocation14_spill] sm:$0xff] }
 0x1c9   : > { %v1758_v7 = vsel %vm1736_vm13, %v1725_v29, %v1472_v21  ;;  %v1594_v21 = vsel %vm1555_vm7, %v5145_v33, %v7175_v60  ;;  %v4070_v33 = vrot.slane %v2245_v54, 11 }
 0x1ca   : > { %v2018_v28 = vadd.f32 %v5634_v30, %v1984_v15  ;;  %v1630_v15 = vsel %vm1604_vm10, %v1594_v21, %v7176_v19 }
 0x1cb   : > { %v1663_v29 = vsel %vm1637_vm9, %v1630_v15, %v5365_v48 }
 0x1cc   : > { %v2050_v57 = vmax.f32 %v2018_v28, 0.0 }
 0x1cd   : > { %v1509_v6 = vpop.permute.xlu1 %1508 }
 0x1ce   : > { %v2082_v16 = vpack.c.bf16 %v2050_v57, %v2050_v57  ;;  %v1791_v62 = vsel %vm1769_vm14, %v1758_v7, %v1509_v6  ;;  %v1696_v6 = vsel %vm1670_vm11, %v1663_v29, %v1406_v56  ;;  %v7177_v56 = vld [vmem:[#allocation15_spill] sm:$0xff] }
 0x1cf   : > { %v1906_v39 = vpop.f32.mrf.mxu0  ;;  %v1824_v63 = vsel %vm1802_vm15, %v1791_v62, %v1544_v36  ;;  %v1513_v62 = vpop.permute.xlu2 %1512 }
 0x1d0   : > { %v1404_v2 = vpop.permute.xlu0 %1403  ;;  %2115 = vst.msk [vmem:[#allocation3 + $0x18] sm:$0xf] %vm268_vm0, %v2082_v16  ;;  %v1985_v18 = vmul.f32 %v5624_v27, %v1906_v39  ;;  %4062 = vmatmul.msk.bf16.gmra.mxu3 %vm1855_vm1, %v1824_v63 }
 0x1d1   : > { %v1694_v41 = vsel %vm1670_vm11, %v1661_v46, %v1404_v2 }
 0x1d2   : > { %v2019_v12 = vadd.f32 %v5634_v30, %v1985_v18 }
 0x1d4   : > { %v2051_v13 = vmax.f32 %v2019_v12, 0.0 }
 0x1d5   : > { %v1439_v25 = vpop.permute.xlu1 %1438 }
 0x1d6   : > { %v2083_v35 = vpack.c.bf16 %v2051_v13, %v2051_v13  ;;  %v1727_v51 = vsel %vm1703_vm12, %v1694_v41, %v1439_v25 }
 0x1d7   : > { %v1908_v61 = vpop.f32.mrf.mxu0  ;;  %v4215_v38 = vld [vmem:[#allocation3 + $0x14] sm:$0xff]  ;;  %v1760_v40 = vsel %vm1736_vm13, %v1727_v51, %v1474_v31 }
 0x1d8   : > { %v1511_v5 = vpop.permute.xlu0 %1510  ;;  %2116 = vst.msk [vmem:[#allocation3 + $0x24] sm:$0xf] %vm268_vm0, %v2083_v35  ;;  %v1986_v8 = vmul.f32 %v5624_v27, %v1908_v61  ;;  %2996 = vrot.lane.b32.xlu0 %v4215_v38, %s4306_s25 }
 0x1d9   : > { %v1793_v24 = vsel %vm1769_vm14, %v1760_v40, %v1511_v5  ;;  %v2155_v40 = vld [vmem:[#allocation3 + $0x30] sm:$0x8] }
 0x1da   : > { %v2020_v44 = vadd.f32 %v5634_v30, %v1986_v8 }
 0x1dc   : > { %v2052_v22 = vmax.f32 %v2020_v44, 0.0 }
 0x1dd   : > { %v1546_v9 = vpop.permute.xlu1 %1545 }
 0x1de   : > { %v2084_v34 = vpack.c.bf16 %v2052_v22, %v2052_v22  ;;  %v1826_v58 = vsel %vm1802_vm15, %v1793_v24, %v1546_v9  ;;  %v1443_v24 = vpop.permute.xlu2 %1442 }
 0x1df   : > { %v1911_v0 = vpop.f32.mrf.mxu0  ;;  %v5698_v50 = vld [vmem:[#allocation3 + $0x24] sm:$0xf] }
 0x1e0   : > { %2117 = vst.msk [vmem:[#allocation3 + $0x28] sm:$0xf] %vm268_vm0, %v2084_v34  ;;  %v1987_v26 = vmul.f32 %v5624_v27, %v1911_v0  ;;  %v1441_v42 = vpop.permute.xlu0 %1440  ;;  %v2250_v4 = vshrl.u32 %v5698_v50, 16  ;;  %4063 = vmatmul.msk.bf16.gmra.mxu3 %vm1855_vm1, %v1826_v58  ;;  %v2253_v3 = vshll.u32 %v5698_v50, 16  ;;  %v1597_v34 = vsel %vm1555_vm7, %v5180_v45, %v7177_v56 }
 0x1e1   : > { %v1729_v37 = vsel %vm1703_vm12, %v1696_v6, %v1441_v42 }
 0x1e2   : > { %v2021_v55 = vadd.f32 %v5634_v30, %v1987_v26  ;;  %v2252_v59 = vrot.slane %v2250_v4, 7  ;;  %v7178_v26 = vld [vmem:[#allocation18_spill] sm:$0xff] }
 0x1e3   : > { %v1632_v42 = vsel %vm1604_vm10, %v1597_v34, %v7178_v26  ;;  %v7179_v34 = vld [vmem:[#allocation12_spill] sm:$0xff] }
 0x1e4   : > { %v2053_v11 = vmax.f32 %v2021_v55, 0.0  ;;  %v2255_v32 = vor.u32 %v2253_v3, %v2252_v59  ;;  %v2257_v13 = vrot.slane %v2252_v59, 4  ;;  %v1665_v10 = vsel %vm1637_vm9, %v1632_v42, %v5388_v47  ;;  %v7180_v42 = vld [vmem:[#allocation22_spill] sm:$0xff] }
 0x1e5   : > { %v1476_v28 = vpop.permute.xlu1 %1475 }
 0x1e6   : > { %v2085_v36 = vpack.c.bf16 %v2053_v11, %v2053_v11  ;;  %v1762_v48 = vsel %vm1736_vm13, %v1729_v37, %v1476_v28  ;;  %v2256_v31 = vsel %vm4913_vm6, %v4070_v33, %v2255_v32  ;;  %v2267_v11 = vshrl.u32 %v2155_v40, 16 }
 0x1e7   : > { %v1913_v57 = vpop.f32.mrf.mxu0  ;;  %v4216_v16 = vld [vmem:[#allocation3 + $0x24] sm:$0xff]  ;;  %v1795_v14 = vsel %vm1769_vm14, %v1762_v48, %v1513_v62  ;;  %v2870_v5 = vunpack.c.l.b16 %v2256_v31 }
 0x1e8   : > { %v5717_v7 = vld [vmem:[#allocation3 + $0x28] sm:$0xf]  ;;  %2118 = vst.msk [vmem:[#allocation3 + $0x34] sm:$0xf] %vm268_vm0, %v2085_v36  ;;  %v1988_v39 = vmul.f32 %v5624_v27, %v1913_v57  ;;  %2998 = vrot.lane.b32.xlu1 %v4216_v16, %s4306_s25  ;;  %v1548_v63 = vpop.permute.xlu0 %1547  ;;  %v4071_v28 = vrot.slane %v2267_v11, 11 }
 0x1e9   : > { %v2259_v2 = vshrl.u32 %v5717_v7, 16  ;;  %v2262_v1 = vshll.u32 %v5717_v7, 16  ;;  %v1828_v8 = vsel %vm1802_vm15, %v1795_v14, %v1548_v63 }
 0x1ea   : > { %v2022_v18 = vadd.f32 %v5634_v30, %v1988_v39  ;;  %v1550_v39 = vpop.permute.xlu2 %1549 }
 0x1eb   : > { %v2261_v12 = vrot.slane %v2259_v2, 7 }
 0x1ec   : > { %v2054_v17 = vmax.f32 %v2022_v18, 0.0 }
 0x1ed   : > { %v2264_v20 = vor.u32 %v2262_v1, %v2261_v12  ;;  %v1408_v35 = vpop.permute.xlu1 %1407 }
 0x1ee   : > { %v2086_v46 = vpack.c.bf16 %v2054_v17, %v2054_v17  ;;  %v1698_v54 = vsel %vm1670_vm11, %v1665_v10, %v1408_v35 }
 0x1ef   : > { %v2265_v25 = vsel %vm4913_vm6, %v2257_v13, %v2264_v20  ;;  %v1916_v41 = vpop.f32.mrf.mxu0  ;;  %v5737_v61 = vld [vmem:[#allocation3 + $0x34] sm:$0xf]  ;;  %v1731_v36 = vsel %vm1703_vm12, %v1698_v54, %v1443_v24  ;;  %v1600_v24 = vsel %vm1555_vm7, %v5166_v43, %v7179_v34 }
 0x1f0   : > { %v2871_v38 = vunpack.c.l.b16 %v2265_v25  ;;  %2119 = vst.msk [vmem:[#allocation3 + $0x38] sm:$0xf] %vm268_vm0, %v2086_v46  ;;  %v1989_v51 = vmul.f32 %v5624_v27, %v1916_v41  ;;  %v2272_v44 = vshrl.u32 %v5737_v61, 16  ;;  %4064 = vmatmul.msk.bf16.gmra.mxu3 %vm1855_vm1, %v1828_v8  ;;  %v2275_v58 = vshll.u32 %v5737_v61, 16  ;;  %v1478_v59 = vpop.permute.xlu0 %1477 }
 0x1f1   : > { %v1764_v62 = vsel %vm1736_vm13, %v1731_v36, %v1478_v59  ;;  %v1634_v10 = vsel %vm1604_vm10, %v1600_v24, %v7180_v42 }
 0x1f2   : > { %v5744_v22 = vpack.c.b16 %v2871_v38, %v2870_v5  ;;  %v2023_v9 = vadd.f32 %v5634_v30, %v1989_v51  ;;  %v2274_v0 = vrot.slane %v2272_v44, 7  ;;  %v2158_v51 = vld [vmem:[#allocation3 + $0x40] sm:$0x8]  ;;  %v1480_v59 = vpop.permute.xlu2 %1479 }
 0x1f4   : > { %v2055_v55 = vmax.f32 %v2023_v9, 0.0  ;;  %v2277_v45 = vor.u32 %v2275_v58, %v2274_v0  ;;  %v2279_v48 = vrot.slane %v2274_v0, 4  ;;  %v2289_v0 = vshrl.u32 %v2158_v51, 16 }
 0x1f5   : > { %v1515_v60 = vpop.permute.xlu1 %1514 }
 0x1f6   : > { %v2087_v32 = vpack.c.bf16 %v2055_v55, %v2055_v55  ;;  %v2278_v37 = vsel %vm4913_vm6, %v4071_v28, %v2277_v45  ;;  %v1797_v63 = vsel %vm1769_vm14, %v1764_v62, %v1515_v60  ;;  %v1667_v55 = vsel %vm1637_vm9, %v1634_v10, %v5513_v23 }
 0x1f7   : > { %v1918_v21 = vpop.f32.mrf.mxu0  ;;  %v4217_v19 = vld [vmem:[#allocation3 + $0x34] sm:$0xff]  ;;  %v2872_v14 = vunpack.c.l.b16 %v2278_v37  ;;  %v1830_v41 = vsel %vm1802_vm15, %v1797_v63, %v1550_v39  ;;  %v4072_v36 = vrot.slane %v2289_v0, 11 }
 0x1f8   : > { %v5760_v15 = vld [vmem:[#allocation3 + $0x38] sm:$0xf]  ;;  %2120 = vst.msk [vmem:[#allocation3 + $0x44] sm:$0xf] %vm268_vm0, %v2087_v32  ;;  %v1990_v47 = vmul.f32 %v5624_v27, %v1918_v21  ;;  %3000 = vrot.lane.b32.xlu2 %v4217_v19, %s4306_s25  ;;  %v1410_v17 = vpop.permute.xlu0 %1409 }
 0x1f9   : > { %v2281_v29 = vshrl.u32 %v5760_v15, 16  ;;  %v2284_v6 = vshll.u32 %v5760_v15, 16  ;;  %v1700_v45 = vsel %vm1670_vm11, %v1667_v55, %v1410_v17 }
 0x1fa   : > { %v2024_v57 = vadd.f32 %v5634_v30, %v1990_v47 }
 0x1fb   : > { %v2283_v16 = vrot.slane %v2281_v29, 7 }
 0x1fc   : > { %v2056_v33 = vmax.f32 %v2024_v57, 0.0 }
 0x1fd   : > { %v2286_v18 = vor.u32 %v2284_v6, %v2283_v16  ;;  %v1445_v13 = vpop.permute.xlu1 %1444 }
 0x1fe   : > { %v2088_v12 = vpack.c.bf16 %v2056_v33, %v2056_v33  ;;  %v1733_v43 = vsel %vm1703_vm12, %v1700_v45, %v1445_v13 }
 0x1ff   : > { %v2287_v31 = vsel %vm4913_vm6, %v2279_v48, %v2286_v18  ;;  %v1921_v20 = vpop.f32.mrf.mxu0  ;;  %v5779_v35 = vld [vmem:[#allocation3 + $0x44] sm:$0xf]  ;;  %v1766_v62 = vsel %vm1736_vm13, %v1733_v43, %v1480_v59  ;;  %v7183_v59 = vld [vmem:[#allocation23_spill] sm:$0xff] }
 0x200   : > { %v2873_v46 = vunpack.c.l.b16 %v2287_v31  ;;  %2121 = vst.msk [vmem:[#allocation3 + $0x48] sm:$0xf] %vm268_vm0, %v2088_v12  ;;  %v1991_v25 = vmul.f32 %v5624_v27, %v1921_v20  ;;  %v2294_v5 = vshrl.u32 %v5779_v35, 16  ;;  %4065 = vmatmul.msk.bf16.gmra.mxu3 %vm1855_vm1, %v1830_v41  ;;  %v2297_v56 = vshll.u32 %v5779_v35, 16  ;;  %v1517_v21 = vpop.permute.xlu0 %1516 }
 0x201   : > { %v1799_v12 = vsel %vm1769_vm14, %v1766_v62, %v1517_v21 }
 0x202   : > { %v5786_v38 = vpack.c.b16 %v2873_v46, %v2872_v14  ;;  %v2025_v8 = vadd.f32 %v5634_v30, %v1991_v25  ;;  %v2296_v40 = vrot.slane %v2294_v5, 7  ;;  %v1375_v14 = vpop.permute.xlu2 %1374 }
 0x204   : > { %v2057_v9 = vmax.f32 %v2025_v8, 0.0  ;;  %v2299_v26 = vor.u32 %v2297_v56, %v2296_v40  ;;  %v2301_v37 = vrot.slane %v2296_v40, 4  ;;  %v2161_v8 = vld [vmem:[#allocation3 + $0x50] sm:$0x8] }
 0x205   : > { %v1552_v28 = vpop.permute.xlu1 %1551  ;;  %v2311_v55 = vshrl.u32 %v2161_v8, 16 }
 0x206   : > { %v2089_v11 = vpack.c.bf16 %v2057_v9, %v2057_v9  ;;  %v2300_v33 = vsel %vm4913_vm6, %v4072_v36, %v2299_v26  ;;  %v1832_v25 = vsel %vm1802_vm15, %v1799_v12, %v1552_v28  ;;  %v7182_v26 = vld [vmem:[#allocation16_spill] sm:$0xff] }
 0x207   : > { %v1923_v54 = vpop.f32.mrf.mxu0  ;;  %v4218_v32 = vld [vmem:[#allocation3 + $0x44] sm:$0xff]  ;;  %v2874_v31 = vunpack.c.l.b16 %v2300_v33  ;;  %v1603_v42 = vsel %vm1555_vm7, %v5195_v52, %v7182_v26  ;;  %vm3563_vm7 = vcmask 523264  }
 0x208   : > { %v5802_v60 = vld [vmem:[#allocation3 + $0x48] sm:$0xf]  ;;  %2122 = vst.msk [vmem:[#allocation3 + $0x54] sm:$0xf] %vm268_vm0, %v2089_v11  ;;  %v1992_v19 = vmul.f32 %v5624_v27, %v1923_v54  ;;  %3002 = vrot.lane.b32.xlu0 %v4218_v32, %s4306_s25  ;;  %v1412_v40 = vpop.permute.xlu0 %1411  ;;  %v1636_v11 = vsel %vm1604_vm10, %v1603_v42, %v7183_v59 }
 0x209   : > { %v2303_v47 = vshrl.u32 %v5802_v60, 16  ;;  %v2306_v16 = vshll.u32 %v5802_v60, 16  ;;  %v1669_v54 = vsel %vm1637_vm9, %v1636_v11, %v1375_v14  ;;  %vm3632_vm9 = vcmask 588800  }
 0x20a   : > { %v2026_v23 = vadd.f32 %v5634_v30, %v1992_v19  ;;  %v1702_v43 = vsel %vm1670_vm11, %v1669_v54, %v1412_v40  ;;  %v1482_v28 = vpop.permute.xlu2 %1481 }
 0x20b   : > { %v2305_v57 = vrot.slane %v2303_v47, 7 }
 0x20c   : > { %v2058_v39 = vmax.f32 %v2026_v23, 0.0 }
 0x20d   : > { %v2308_v48 = vor.u32 %v2306_v16, %v2305_v57  ;;  %v1447_v24 = vpop.permute.xlu1 %1446  ;;  %v4073_v57 = vrot.slane %v2311_v55, 11 }
 0x20e   : > { %v2090_v18 = vpack.c.bf16 %v2058_v39, %v2058_v39  ;;  %v1735_v36 = vsel %vm1703_vm12, %v1702_v43, %v1447_v24 }
 0x20f   : > { %v2309_v63 = vsel %vm4913_vm6, %v2301_v37, %v2308_v48  ;;  %v1926_v17 = vpop.f32.mrf.mxu0  ;;  %v5821_v20 = vld [vmem:[#allocation3 + $0x54] sm:$0xf]  ;;  %v1768_v37 = vsel %vm1736_vm13, %v1735_v36, %v1482_v28 }
 0x210   : > { %v2875_v13 = vunpack.c.l.b16 %v2309_v63  ;;  %2123 = vst.msk [vmem:[#allocation3 + $0x58] sm:$0xf] %vm268_vm0, %v2090_v18  ;;  %v1993_v46 = vmul.f32 %v5624_v27, %v1926_v17  ;;  %v2316_v41 = vshrl.u32 %v5821_v20, 16  ;;  %4066 = vmatmul.msk.bf16.gmra.mxu3 %vm1855_vm1, %v1832_v25  ;;  %v2319_v9 = vshll.u32 %v5821_v20, 16  ;;  %v1519_v48 = vpop.permute.xlu0 %1518 }
 0x212   : > { %v5828_v51 = vpack.c.b16 %v2875_v13, %v2874_v31  ;;  %v2027_v34 = vadd.f32 %v5634_v30, %v1993_v46  ;;  %v2318_v0 = vrot.slane %v2316_v41, 7  ;;  %v1801_v46 = vsel %vm1769_vm14, %v1768_v37, %v1519_v48 }
 0x214   : > { %7181 = vst [vmem:[#allocation4_spill] sm:$0xff] %v5828_v51  ;;  %v2059_v10 = vmax.f32 %v2027_v34, 0.0  ;;  %v2321_v45 = vor.u32 %v2319_v9, %v2318_v0  ;;  %v2323_v12 = vrot.slane %v2318_v0, 4 }
 0x215   : > { %v1554_v31 = vpop.permute.xlu1 %1553 }
 0x216   : > { %v2091_v32 = vpack.c.bf16 %v2059_v10, %v2059_v10  ;;  %v2322_v63 = vsel %vm4913_vm6, %v4073_v57, %v2321_v45  ;;  %v1834_v0 = vsel %vm1802_vm15, %v1801_v46, %v1554_v31  ;;  %v2146_v46 = vld [vmem:[#allocation3] sm:$0x8] }
 0x217   : > { %v1928_v21 = vpop.f32.mrf.mxu0  ;;  %v5843_v19 = vld [vmem:[#allocation3 + $0x58] sm:$0xf]  ;;  %v2876_v40 = vunpack.c.l.b16 %v2322_v63 }
 0x218   : > { %2124 = vst.msk [vmem:[#allocation3 + $0x64] sm:$0xf] %vm268_vm0, %v2091_v32  ;;  %v1994_v52 = vmul.f32 %v5624_v27, %v1928_v21  ;;  %v2325_v23 = vshrl.u32 %v5843_v19, 16  ;;  %v2328_v39 = vshll.u32 %v5843_v19, 16  ;;  %v2164_v32 = vld [vmem:[#allocation3 + $0x60] sm:$0x8] }
 0x21a   : > { %v2028_v62 = vadd.f32 %v5634_v30, %v1994_v52  ;;  %v2327_v33 = vrot.slane %v2325_v23, 7  ;;  %v2333_v52 = vshrl.u32 %v2164_v32, 16  ;;  %v2690_v50 = vrot.slane %v2325_v23, 4 }
 0x21c   : > { %v2060_v18 = vmax.f32 %v2028_v62, 0.0  ;;  %v2330_v17 = vor.u32 %v2328_v39, %v2327_v33  ;;  %v4074_v63 = vrot.slane %v2333_v52, 11 }
 0x21e   : > { %v2092_v13 = vpack.c.bf16 %v2060_v18, %v2060_v18  ;;  %v2331_v14 = vsel %vm4913_vm6, %v2323_v12, %v2330_v17 }
 0x21f   : > { %v1931_v25 = vpop.f32.mrf.mxu0  ;;  %v5861_v8 = vld [vmem:[#allocation3 + $0x64] sm:$0xf]  ;;  %v2877_v34 = vunpack.c.l.b16 %v2331_v14 }
 0x220   : > { %2125 = vst.msk [vmem:[#allocation3 + $0x68] sm:$0xf] %vm268_vm0, %v2092_v13  ;;  %v1995_v24 = vmul.f32 %v5624_v27, %v1931_v25  ;;  %v7061_v26 = vshrl.u32 %v5861_v8, 16  ;;  %4067 = vmatmul.msk.bf16.gmra.mxu3 %vm1855_vm1, %v1834_v0  ;;  %v7059_v55 = vshll.u32 %v5861_v8, 16  ;;  %v5893_v25 = vld [vmem:[#allocation3 + $0x4] sm:$0xf] }
 0x221   : > { %v5868_v42 = vpack.c.b16 %v2877_v34, %v2876_v40  ;;  %v5895_v40 = vld [vmem:[#allocation3 + $0x8] sm:$0xf]  ;;  %v2201_v34 = vshrl.u32 %v2146_v46, 16 }
 0x222   : > { %v2029_v10 = vadd.f32 %v5634_v30, %v1995_v24  ;;  %v2340_v59 = vrot.slane %v7061_v26, 7  ;;  %v2206_v24 = vshrl.u32 %v5893_v25, 16 }
 0x224   : > { %v2061_v11 = vmax.f32 %v2029_v10, 0.0  ;;  %v2343_v45 = vor.u32 %v7059_v55, %v2340_v59  ;;  %v2345_v48 = vrot.slane %v2340_v59, 4  ;;  %v2215_v59 = vshrl.u32 %v5895_v40, 16 }
 0x225   : > { %v2208_v32 = vrot.slane %v2206_v24, 7 }
 0x226   : > { %v2093_v54 = vpack.c.bf16 %v2061_v11, %v2061_v11  ;;  %v2344_v0 = vsel %vm4913_vm6, %v4074_v63, %v2343_v45 }
 0x227   : > { %v1933_v43 = vpop.f32.mrf.mxu0  ;;  %v5876_v21 = vld [vmem:[#allocation3 + $0x68] sm:$0xf]  ;;  %v2878_v45 = vunpack.c.l.b16 %v2344_v0 }
 0x228   : > { %2126 = vst.msk [vmem:[#allocation3 + $0x74] sm:$0xf] %vm268_vm0, %v2093_v54  ;;  %v1996_v36 = vmul.f32 %v5624_v27, %v1933_v43  ;;  %v7062_v28 = vshrl.u32 %v5876_v21, 16  ;;  %v7068_v62 = vshll.u32 %v5876_v21, 16  ;;  %v4068_v54 = vrot.slane %v2201_v34, 11 }
 0x229   : > { %v2209_v43 = vshll.u32 %v5893_v25, 16 }
 0x22a   : > { %v2030_v57 = vadd.f32 %v5634_v30, %v1996_v36  ;;  %v2349_v33 = vrot.slane %v7062_v28, 7 }
 0x22c   : > { %v2062_v37 = vmax.f32 %v2030_v57, 0.0  ;;  %v2352_v18 = vor.u32 %v7068_v62, %v2349_v33  ;;  %v2217_v57 = vrot.slane %v2215_v59, 7  ;;  %v2218_v33 = vshll.u32 %v5895_v40, 16 }
 0x22e   : > { %v2094_v12 = vpack.c.bf16 %v2062_v37, %v2062_v37  ;;  %v2353_v17 = vsel %vm4913_vm6, %v2345_v48, %v2352_v18  ;;  %v2167_v37 = vld [vmem:[#allocation3 + $0x70] sm:$0x8]  ;;  %v2211_v48 = vor.u32 %v2209_v43, %v2208_v32  ;;  %v2213_v18 = vrot.slane %v2208_v32, 4 }
 0x22f   : > { %v1936_v31 = vpop.f32.mrf.mxu0  ;;  %v5889_v13 = vld [vmem:[#allocation3 + $0x74] sm:$0xf]  ;;  %v2879_v11 = vunpack.c.l.b16 %v2353_v17  ;;  %v2355_v0 = vshrl.u32 %v2167_v37, 16 }
 0x230   : > { %2127 = vst.msk [vmem:[#allocation3 + $0x78] sm:$0xf] %vm268_vm0, %v2094_v12  ;;  %v1997_v14 = vmul.f32 %v5624_v27, %v1936_v31  ;;  %v7060_v36 = vshrl.u32 %v5889_v13, 16  ;;  %v2220_v12 = vor.u32 %v2218_v33, %v2217_v57  ;;  %v7063_v34 = vshll.u32 %v5889_v13, 16 }
 0x231   : > { %v5913_v17 = vpack.c.b16 %v2879_v11, %v2878_v45  ;;  %v4075_v55 = vrot.slane %v2355_v0, 11 }
 0x232   : > { %v2031_v10 = vadd.f32 %v5634_v30, %v1997_v14  ;;  %v2212_v14 = vsel %vm4913_vm6, %v4068_v54, %v2211_v48  ;;  %v2221_v11 = vsel %vm4913_vm6, %v2213_v18, %v2220_v12 }
 0x233   : > { %v2867_v45 = vunpack.c.l.b16 %v2221_v11 }
 0x234   : > { %v2063_v52 = vmax.f32 %v2031_v10, 0.0  ;;  %v2362_v10 = vrot.slane %v7060_v36, 7 }
 0x236   : > { %v2095_v63 = vpack.c.bf16 %v2063_v52, %v2063_v52  ;;  %v2866_v52 = vunpack.c.l.b16 %v2212_v14  ;;  %v2365_v48 = vor.u32 %v7063_v34, %v2362_v10 }
 0x237   : > { %v1938_v31 = vpop.f32.mrf.mxu0  ;;  %v5917_v46 = vld [vmem:[#allocation3 + $0x78] sm:$0xf] }
 0x238   : > { %2128 = vst.msk [vmem:[#allocation3 + $0x84] sm:$0xf] %vm268_vm0, %v2095_v63  ;;  %v1998_v32 = vmul.f32 %v5624_v27, %v1938_v31  ;;  %v7064_v57 = vshrl.u32 %v5917_v46, 16  ;;  %v2898_v37 = vpack.c.b16 %v2867_v45, %v2866_v52  ;;  %v2995_v31 = vpop.permute.xlu2 %2994  ;;  %v7067_v12 = vshll.u32 %v5917_v46, 16 }
 0x239   : > { %v2366_v0 = vsel %vm4913_vm6, %v4075_v55, %v2365_v48  ;;  %v2367_v52 = vrot.slane %v2362_v10, 4 }
 0x23a   : > { %v2032_v54 = vadd.f32 %v5634_v30, %v1998_v32  ;;  %v2371_v36 = vrot.slane %v7064_v57, 7  ;;  %v5934_v18 = vsel %vm1604_vm10, %v2898_v37, %v2995_v31  ;;  %v2880_v31 = vunpack.c.l.b16 %v2366_v0  ;;  %v2170_v0 = vld [vmem:[#allocation3 + $0x80] sm:$0x8] }
 0x23c   : > { %v2064_v63 = vmax.f32 %v2032_v54, 0.0  ;;  %v2374_v45 = vor.u32 %v7067_v12, %v2371_v36 }
 0x23d   : > { %v1946_v26 = vpop.f32.mrf.mxu3 }
 0x23e   : > { %v2001_v28 = vmul.f32 %v5624_v27, %v1946_v26  ;;  %v2096_v14 = vpack.c.bf16 %v2064_v63, %v2064_v63 }
 0x23f   : > { %v1941_v11 = vpop.f32.mrf.mxu0  ;;  %v5938_v34 = vld [vmem:[#allocation3 + $0x84] sm:$0xf] }
 0x240   : > { %v2035_v32 = vadd.f32 %v5634_v30, %v2001_v28  ;;  %2129 = vst.msk [vmem:[#allocation3 + $0x88] sm:$0xf] %vm268_vm0, %v2096_v14  ;;  %v1999_v26 = vmul.f32 %v5624_v27, %v1941_v11  ;;  %v7065_v54 = vshrl.u32 %v5938_v34, 16  ;;  %v2375_v28 = vsel %vm4913_vm6, %v2367_v52, %v2374_v45 }
 0x241   : > { %v7066_v55 = vshll.u32 %v5938_v34, 16  ;;  %v2881_v10 = vunpack.c.l.b16 %v2375_v28 }
 0x242   : > { %v2067_v37 = vmax.f32 %v2035_v32, 0.0  ;;  %v2033_v63 = vadd.f32 %v5634_v30, %v1999_v26  ;;  %v2384_v36 = vrot.slane %v7065_v54, 7 }
 0x243   : > { %v5955_v32 = vpack.c.b16 %v2881_v10, %v2880_v31 }
 0x244   : > { %v2099_v57 = vpack.c.bf16 %v2067_v37, %v2067_v37  ;;  %v2065_v48 = vmax.f32 %v2033_v63, 0.0  ;;  %v2387_v52 = vor.u32 %v7066_v55, %v2384_v36 }
 0x245   : > { %v1948_v14 = vpop.f32.mrf.mxu3 }
 0x246   : > { %2132 = vst.msk [vmem:[#allocation3 + $0xa4] sm:$0xf] %vm268_vm0, %v2099_v57  ;;  %v2002_v11 = vmul.f32 %v5624_v27, %v1948_v14  ;;  %v2097_v45 = vpack.c.bf16 %v2065_v48, %v2065_v48  ;;  %v2377_v14 = vshrl.u32 %v2170_v0, 16 }
 0x247   : > { %v1943_v37 = vpop.f32.mrf.mxu0  ;;  %v5960_v28 = vld [vmem:[#allocation3 + $0x88] sm:$0xf] }
 0x248   : > { %v2036_v26 = vadd.f32 %v5634_v30, %v2002_v11  ;;  %2130 = vst.msk [vmem:[#allocation3 + $0x94] sm:$0xf] %vm268_vm0, %v2097_v45  ;;  %v2000_v63 = vmul.f32 %v5624_v27, %v1943_v37  ;;  %v7069_v57 = vshrl.u32 %v5960_v28, 16  ;;  %v7070_v11 = vshll.u32 %v5960_v28, 16 }
 0x249   : > { %v4076_v12 = vrot.slane %v2377_v14, 11 }
 0x24a   : > { %v2068_v54 = vmax.f32 %v2036_v26, 0.0  ;;  %v2034_v31 = vadd.f32 %v5634_v30, %v2000_v63  ;;  %v2393_v10 = vrot.slane %v7069_v57, 7  ;;  %v2389_v26 = vrot.slane %v2384_v36, 4 }
 0x24b   : > { %v2388_v0 = vsel %vm4913_vm6, %v4076_v12, %v2387_v52 }
 0x24c   : > { %v2100_v48 = vpack.c.bf16 %v2068_v54, %v2068_v54  ;;  %v2066_v55 = vmax.f32 %v2034_v31, 0.0  ;;  %v2396_v45 = vor.u32 %v7070_v11, %v2393_v10  ;;  %v2882_v57 = vunpack.c.l.b16 %v2388_v0 }
 0x24e   : > { %2133 = vst.msk [vmem:[#allocation3 + $0xa8] sm:$0xf] %vm268_vm0, %v2100_v48  ;;  %v2098_v62 = vpack.c.bf16 %v2066_v55, %v2066_v55  ;;  %v2397_v37 = vsel %vm4913_vm6, %v2389_v26, %v2396_v45 }
 0x24f   : > { %v2883_v54 = vunpack.c.l.b16 %v2397_v37 }
 0x250   : > { %2131 = vst.msk [vmem:[#allocation3 + $0x98] sm:$0xf] %vm268_vm0, %v2098_v62 }
 0x251   : > { %v5982_v55 = vpack.c.b16 %v2883_v54, %v2882_v57 }
 0x253   : > { %v1951_v63 = vpop.f32.mrf.mxu3 }
 0x254   : > { %v2003_v14 = vmul.f32 %v5624_v27, %v1951_v63 }
 0x255   : > { %v5977_v31 = vld [vmem:[#allocation3 + $0xa4] sm:$0xff] }
 0x256   : > { %3014 = vrot.lane.b32.xlu0 %v5977_v31, %s4306_s25  ;;  %v2037_v62 = vadd.f32 %v5634_v30, %v2003_v14  ;;  %v6128_v60 = vld [vmem:[#allocation3 + $0xa8] sm:$0xf] }
 0x258   : > { %v2069_v36 = vmax.f32 %v2037_v62, 0.0 }
 0x25a   : > { %v2101_v10 = vpack.c.bf16 %v2069_v36, %v2069_v36 }
 0x25b   : > { %v1953_v12 = vpop.f32.mrf.mxu3 }
 0x25c   : > { %2134 = vst.msk [vmem:[#allocation3 + $0xb4] sm:$0xf] %vm268_vm0, %v2101_v10  ;;  %v2004_v52 = vmul.f32 %v5624_v27, %v1953_v12 }
 0x25e   : > { %v2038_v48 = vadd.f32 %v5634_v30, %v2004_v52  ;;  %v2598_v52 = vld [vmem:[#allocation3 + $0x2c] sm:$0x1] }
 0x260   : > { %v2070_v45 = vmax.f32 %v2038_v48, 0.0  ;;  %v2646_v48 = vrot.slane %v2262_v1, 5 }
 0x262   : > { %v2102_v26 = vpack.c.bf16 %v2070_v45, %v2070_v45  ;;  %v2648_v45 = vrot.slane %v2259_v2, 4 }
 0x263   : > { %v1956_v0 = vpop.f32.mrf.mxu3 }
 0x264   : > { %2135 = vst.msk [vmem:[#allocation3 + $0xb8] sm:$0xf] %vm268_vm0, %v2102_v26  ;;  %v2005_v37 = vmul.f32 %v5624_v27, %v1956_v0 }
 0x266   : > { %v2039_v57 = vadd.f32 %v5634_v30, %v2005_v37  ;;  %v4219_v37 = vld [vmem:[#allocation3 + $0x54] sm:$0xff] }
 0x268   : > { %v2071_v54 = vmax.f32 %v2039_v57, 0.0  ;;  %v2642_v57 = vrot.slane %v2250_v4, 4  ;;  %v2688_v4 = vrot.slane %v2328_v39, 5 }
 0x26a   : > { %v2103_v63 = vpack.c.bf16 %v2071_v54, %v2071_v54  ;;  %v2643_v54 = vrot.slane %v2253_v3, 5  ;;  %v2601_v3 = vld [vmem:[#allocation3 + $0x5c] sm:$0x1]  ;;  %v2691_v23 = vor.u32 %v2690_v50, %v2688_v4 }
 0x26b   : > { %v1958_v14 = vpop.f32.mrf.mxu3  ;;  %v5991_v62 = vld [vmem:[#allocation3 + $0xb4] sm:$0xff]  ;;  %v2694_v39 = vshll.u32 %v2601_v3, 16 }
 0x26c   : > { %2136 = vst.msk [vmem:[#allocation3 + $0xc4] sm:$0xf] %vm268_vm0, %v2103_v63  ;;  %v2006_v36 = vmul.f32 %v5624_v27, %v1958_v14  ;;  %3016 = vrot.lane.b32.xlu1 %v5991_v62, %s4306_s25  ;;  %v2652_v63 = vshll.u32 %v2598_v52, 16  ;;  %v2644_v2 = vor.u32 %v2643_v54, %v2642_v57 }
 0x26e   : > { %v2040_v10 = vadd.f32 %v5634_v30, %v2006_v36  ;;  %v2649_v36 = vor.u32 %v2648_v45, %v2646_v48  ;;  %v2654_v1 = vrot.slane %v2652_v63, 5  ;;  %v2645_v45 = vrot.slane %v2644_v2, 4  ;;  %v2596_v2 = vld [vmem:[#allocation3 + $0xc] sm:$0x1] }
 0x26f   : > { %v2618_v63 = vrot.slane %v2218_v33, 5  ;;  %v6043_v33 = vld [vmem:[#allocation3 + $0x14] sm:$0xf] }
 0x270   : > { %v2072_v12 = vmax.f32 %v2040_v10, 0.0  ;;  %v2647_v54 = vsel %vm4521_vm3, %v2645_v45, %v2646_v48  ;;  %v2696_v48 = vrot.slane %v2694_v39, 5  ;;  %v6045_v45 = vld [vmem:[#allocation3 + $0x18] sm:$0xf] }
 0x272   : > { %v2104_v26 = vpack.c.bf16 %v2072_v12, %v2072_v12  ;;  %v2650_v12 = vrot.slane %v2649_v36, 4 }
 0x273   : > { %v1961_v0 = vpop.f32.mrf.mxu3 }
 0x274   : > { %2137 = vst.msk [vmem:[#allocation3 + $0xc8] sm:$0xf] %vm268_vm0, %v2104_v26  ;;  %v2007_v14 = vmul.f32 %v5624_v27, %v1961_v0  ;;  %3004 = vrot.lane.b32.xlu1 %v4219_v37, %s4306_s25  ;;  %v2684_v0 = vrot.slane %v2316_v41, 4  ;;  %v2685_v37 = vrot.slane %v2319_v9, 5  ;;  %v2655_v19 = vsel %vm4521_vm3, %v2650_v12, %v2654_v1 }
 0x275   : > { %v2614_v41 = vrot.slane %v2206_v24, 4  ;;  %v2615_v9 = vrot.slane %v2209_v43, 5  ;;  %v3031_v36 = vunpack.c.l.b16 %v2655_v19  ;;  %v3030_v12 = vunpack.c.l.b16 %v2647_v54 }
 0x276   : > { %v2041_v7 = vadd.f32 %v5634_v30, %v2007_v14  ;;  %v2620_v14 = vrot.slane %v2215_v59, 4 }
 0x277   : > { %v2616_v24 = vor.u32 %v2615_v9, %v2614_v41  ;;  %v6037_v25 = vpack.c.b16 %v3031_v36, %v3030_v12  ;;  %v2599_v41 = vld [vmem:[#allocation3 + $0x3c] sm:$0x1]  ;;  %v2228_v9 = vshrl.u32 %v6043_v33, 16  ;;  %v2237_v36 = vshrl.u32 %v6045_v45, 16 }
 0x278   : > { %v2073_v10 = vmax.f32 %v2041_v7, 0.0  ;;  %v2686_v7 = vor.u32 %v2685_v37, %v2684_v0  ;;  %v2621_v3 = vor.u32 %v2620_v14, %v2618_v63  ;;  %v6053_v37 = vrot.slane %v2284_v6, 5 }
 0x279   : > { %v2666_v6 = vshll.u32 %v2599_v41, 16  ;;  %v2634_v61 = vrot.slane %v2237_v36, 4 }
 0x27a   : > { %v2105_v52 = vpack.c.bf16 %v2073_v10, %v2073_v10  ;;  %v2692_v10 = vrot.slane %v2691_v23, 4  ;;  %v2687_v43 = vrot.slane %v2686_v7, 4  ;;  %v2617_v23 = vrot.slane %v2616_v24, 4 }
 0x27b   : > { %v1963_v26 = vpop.f32.mrf.mxu3  ;;  %v6014_v11 = vld [vmem:[#allocation3 + $0xc4] sm:$0xff]  ;;  %v2622_v39 = vrot.slane %v2621_v3, 4  ;;  %v2656_v24 = vrot.slane %v2272_v44, 4  ;;  %v2657_v3 = vrot.slane %v2275_v58, 5 }
 0x27c   : > { %2138 = vst.msk [vmem:[#allocation3 + $0xd4] sm:$0xf] %vm268_vm0, %v2105_v52  ;;  %v2008_v57 = vmul.f32 %v5624_v27, %v1963_v26  ;;  %3018 = vrot.lane.b32.xlu2 %v6014_v11, %s4306_s25  ;;  %v2624_v52 = vshll.u32 %v2596_v2, 16  ;;  %v2697_v59 = vsel %vm4521_vm3, %v2692_v10, %v2696_v48  ;;  %v2689_v0 = vsel %vm4521_vm3, %v2687_v43, %v2688_v4  ;;  %v2597_v43 = vld [vmem:[#allocation3 + $0x1c] sm:$0x1] }
 0x27d   : > { %v2240_v4 = vshll.u32 %v6045_v45, 16  ;;  %v3036_v7 = vunpack.c.l.b16 %v2689_v0  ;;  %v2619_v15 = vsel %vm4521_vm3, %v2617_v23, %v2618_v63  ;;  %v7071_v10 = vshll.u32 %v6043_v33, 16 }
 0x27e   : > { %v2042_v20 = vadd.f32 %v5634_v30, %v2008_v57  ;;  %v2662_v57 = vrot.slane %v2281_v29, 4  ;;  %v2626_v54 = vrot.slane %v2624_v52, 5  ;;  %v3026_v52 = vunpack.c.l.b16 %v2619_v15 }
 0x27f   : > { %v2628_v0 = vrot.slane %v2228_v9, 4  ;;  %v2638_v23 = vshll.u32 %v2597_v43, 16  ;;  %v2671_v43 = vrot.slane %v2297_v56, 5 }
 0x280   : > { %v2074_v1 = vmax.f32 %v2042_v20, 0.0  ;;  %v3037_v20 = vunpack.c.l.b16 %v2697_v59  ;;  %v2627_v29 = vsel %vm4521_vm3, %v2622_v39, %v2626_v54  ;;  %v2668_v59 = vrot.slane %v2666_v6, 5  ;;  %v6096_v6 = vld [vmem:[%s6976_s2] ss:$0 sm:$0xff] }
 0x282   : > { %v2106_v50 = vpack.c.bf16 %v2074_v1, %v2074_v1  ;;  %v2663_v1 = vor.u32 %v2662_v57, %v6053_v37  ;;  %v2629_v57 = vrot.slane %v7071_v10, 5 }
 0x283   : > { %v1966_v26 = vpop.f32.mrf.mxu3 }
 0x284   : > { %2139 = vst.msk [vmem:[#allocation3 + $0xd8] sm:$0xf] %vm268_vm0, %v2106_v50  ;;  %v2009_v40 = vmul.f32 %v5624_v27, %v1966_v26  ;;  %3078 = vrot.lane.b32.xlu2 %v6037_v25, %s4308_s27  ;;  %v6069_v50 = vpack.c.b16 %v3037_v20, %v3036_v7  ;;  %v3027_v26 = vunpack.c.l.b16 %v2627_v29  ;;  %v2664_v58 = vrot.slane %v2663_v1, 4  ;;  %v4220_v7 = vld [vmem:[#allocation3 + $0x64] sm:$0xff] }
 0x285   : > { %v2640_v29 = vrot.slane %v2638_v23, 5 }
 0x286   : > { %v2043_v19 = vadd.f32 %v5634_v30, %v2009_v40  ;;  %v2632_v40 = vrot.slane %v2240_v4, 5  ;;  %v3058_v39 = vpack.c.b16 %v3027_v26, %v3026_v52  ;;  %v2669_v20 = vsel %vm4521_vm3, %v2664_v58, %v2668_v59  ;;  %v2600_v26 = vld [vmem:[#allocation3 + $0x4c] sm:$0x1] }
 0x287   : > { %v7185_v59 = vshrl.u32 %v5876_v21, 16 }
 0x288   : > { %v2075_v14 = vmax.f32 %v2043_v19, 0.0  ;;  %v2635_v54 = vor.u32 %v2634_v61, %v2632_v40  ;;  %v2674_v61 = vrot.slane %v2306_v16, 5  ;;  %v2680_v16 = vshll.u32 %v2600_v26, 16 }
 0x28a   : > { %v2107_v2 = vpack.c.bf16 %v2075_v14, %v2075_v14 }
 0x28b   : > { %v1968_v48 = vpop.f32.mrf.mxu3  ;;  %v6067_v12 = vld [vmem:[#allocation3 + $0xd4] sm:$0xff] }
 0x28c   : > { %2140 = vst.msk [vmem:[#allocation3 + $0xe4] sm:$0xf] %vm268_vm0, %v2107_v2  ;;  %v2010_v63 = vmul.f32 %v5624_v27, %v1968_v48  ;;  %3020 = vrot.lane.b32.xlu0 %v6067_v12, %s4306_s25  ;;  %3084 = vrot.lane.b32.xlu2 %v6069_v50, %s4308_s27  ;;  %v2658_v27 = vor.u32 %v2657_v3, %v2656_v24  ;;  %v3033_v48 = vunpack.c.l.b16 %v2669_v20  ;;  %v2636_v24 = vrot.slane %v2635_v54, 4 }
 0x28d   : > { %v2630_v2 = vor.u32 %v2629_v57, %v2628_v0  ;;  %v2670_v3 = vrot.slane %v2294_v5, 4  ;;  %v7184_v5 = vshll.u32 %v5876_v21, 16  ;;  %v7186_v20 = vshrl.u32 %v5861_v8, 16 }
 0x28e   : > { %v2044_v44 = vadd.f32 %v5634_v30, %v2010_v63  ;;  %v2659_v30 = vrot.slane %v2658_v27, 4  ;;  %v6109_v63 = vld [vmem:[%s6976_s2 + $0x1] ss:$0 sm:$0xff]  ;;  %v2704_v27 = vrot.slane %v7185_v59, 4  ;;  %v2641_v56 = vsel %vm4521_vm3, %v2636_v24, %v2640_v29  ;;  %v2177_v29 = vld [vmem:[#allocation3 + $0xa4] sm:$0xf] }
 0x28f   : > { %v6120_v58 = vrot.slane %v7184_v5, 5  ;;  %v3029_v24 = vunpack.c.l.b16 %v2641_v56  ;;  %v2426_v59 = vshrl.u32 %v2177_v29, 16 }
 0x290   : > { %v2076_v19 = vmax.f32 %v2044_v44, 0.0  ;;  %v2661_v1 = vsel %vm4521_vm3, %v2659_v30, %v6053_v37  ;;  %v2676_v37 = vrot.slane %v2303_v47, 4  ;;  %v2631_v44 = vrot.slane %v2630_v2, 4 }
 0x291   : > { %v3032_v57 = vunpack.c.l.b16 %v2661_v1  ;;  %v2705_v30 = vor.u32 %v2704_v27, %v6120_v58  ;;  %v2435_v1 = vshrl.u32 %v6128_v60, 16 }
 0x292   : > { %v2108_v41 = vpack.c.bf16 %v2076_v19, %v2076_v19  ;;  %v2602_v19 = vld [vmem:[#allocation3 + $0x6c] sm:$0x1]  ;;  %v2633_v35 = vsel %vm4521_vm3, %v2631_v44, %v2632_v40  ;;  %v2677_v54 = vor.u32 %v2676_v37, %v2674_v61 }
 0x293   : > { %v1971_v14 = vpop.f32.mrf.mxu3  ;;  %v6130_v23 = vpack.c.b16 %v3033_v48, %v3032_v57  ;;  %v2708_v2 = vshll.u32 %v2602_v19, 16  ;;  %v2438_v48 = vshll.u32 %v6128_v60, 16  ;;  %v2706_v44 = vrot.slane %v2705_v30, 4  ;;  %v2606_v57 = vld [vmem:[#allocation3 + $0xac] sm:$0x1] }
 0x294   : > { %2141 = vst.msk [vmem:[#allocation3 + $0xe8] sm:$0xf] %vm268_vm0, %v2108_v41  ;;  %v2011_v15 = vmul.f32 %v6096_v6, %v1971_v14  ;;  %3074 = vrot.lane.b32.xlu0 %v3058_v39, %s4308_s27  ;;  %3006 = vrot.lane.b32.xlu2 %v4220_v7, %s4306_s25  ;;  %v2672_v39 = vor.u32 %v2671_v43, %v2670_v3  ;;  %v2698_v14 = vrot.slane %v7186_v20, 4  ;;  %v7187_v7 = vshll.u32 %v5861_v8, 16 }
 0x295   : > { %v3028_v8 = vunpack.c.l.b16 %v2633_v35  ;;  %v2678_v26 = vrot.slane %v2677_v54, 4  ;;  %v2682_v43 = vrot.slane %v2680_v16, 5  ;;  %v2710_v5 = vrot.slane %v2708_v2, 5 }
 0x296   : > { %v2045_v52 = vadd.f32 %v6109_v63, %v2011_v15  ;;  %v2699_v40 = vrot.slane %v7187_v7, 5  ;;  %v6148_v19 = vrot.slane %v2438_v48, 5  ;;  %v2760_v60 = vrot.slane %v2435_v1, 4 }
 0x297   : > { %v2683_v56 = vsel %vm4521_vm3, %v2678_v26, %v2682_v43  ;;  %v2711_v20 = vsel %vm4521_vm3, %v2706_v44, %v2710_v5  ;;  %v2764_v7 = vshll.u32 %v2606_v57, 16  ;;  %v2428_v26 = vrot.slane %v2426_v59, 7  ;;  %v2603_v43 = vld [vmem:[#allocation3 + $0x7c] sm:$0x1] }
 0x298   : > { %v2077_v0 = vmax.f32 %v2045_v52, 0.0  ;;  %v2673_v52 = vrot.slane %v2672_v39, 4  ;;  %v2700_v37 = vor.u32 %v2699_v40, %v2698_v14  ;;  %v4221_v39 = vld [vmem:[#allocation3 + $0x74] sm:$0xff]  ;;  %v2754_v14 = vrot.slane %v2426_v59, 4  ;;  %v2176_v40 = vld [vmem:[#allocation3 + $0xa0] sm:$0x8] }
 0x299   : > { %v2766_v44 = vrot.slane %v2764_v7, 5 }
 0x29a   : > { %v2109_v47 = vpack.c.bf16 %v2077_v0, %v2077_v0  ;;  %v2429_v0 = vshll.u32 %v2177_v29, 16  ;;  %v2675_v35 = vsel %vm4521_vm3, %v2673_v52, %v2674_v61  ;;  %v2701_v54 = vrot.slane %v2700_v37, 4 }
 0x29b   : > { %v1973_v41 = vpop.f32.mrf.mxu3  ;;  %v6132_v21 = vld [vmem:[#allocation3 + $0xe4] sm:$0xff]  ;;  %v2437_v61 = vrot.slane %v2435_v1, 7  ;;  %v3034_v29 = vunpack.c.l.b16 %v2675_v35  ;;  %v2421_v52 = vshrl.u32 %v2176_v40, 16  ;;  %v3039_v37 = vunpack.c.l.b16 %v2711_v20 }
 0x29c   : > { %2142 = vst.msk [vmem:[#allocation3 + $0xf4] sm:$0xf] %vm268_vm0, %v2109_v47  ;;  %v2012_v15 = vmul.f32 %v6096_v6, %v1973_v41  ;;  %3080 = vrot.lane.b32.xlu0 %v6130_v23, %s4308_s27  ;;  %3022 = vrot.lane.b32.xlu1 %v6132_v21, %s4306_s25  ;;  %v6150_v41 = vpack.c.b16 %v3029_v24, %v3028_v8  ;;  %v2755_v2 = vrot.slane %v2429_v0, 5  ;;  %v3035_v8 = vunpack.c.l.b16 %v2683_v56 }
 0x29d   : > { %v7188_v1 = vshll.u32 %v5917_v46, 16  ;;  %v2440_v56 = vor.u32 %v2438_v48, %v2437_v61  ;;  %v4078_v7 = vrot.slane %v2421_v52, 11  ;;  %v2431_v40 = vor.u32 %v2429_v0, %v2428_v26 }
 0x29e   : > { %v2046_v3 = vadd.f32 %v6109_v63, %v2012_v15  ;;  %v2761_v15 = vor.u32 %v2760_v60, %v6148_v19 }
 0x29f   : > { %v6170_v5 = vrot.slane %v7188_v1, 5  ;;  %v2432_v52 = vsel %vm4913_vm6, %v4078_v7, %v2431_v40 }
 0x2a0   : > { %v2078_v27 = vmax.f32 %v2046_v3, 0.0  ;;  %v2703_v3 = vsel %vm4521_vm3, %v2701_v54, %v6120_v58  ;;  %v2762_v35 = vrot.slane %v2761_v15, 4  ;;  %v6176_v58 = vpack.c.b16 %v3035_v8, %v3034_v29  ;;  %v2149_v54 = vld [vmem:[#allocation3 + $0x10] sm:$0x8] }
 0x2a1   : > { %v3038_v59 = vunpack.c.l.b16 %v2703_v3  ;;  %v2230_v3 = vrot.slane %v2228_v9, 7 }
 0x2a2   : > { %v2110_v47 = vpack.c.bf16 %v2078_v27, %v2078_v27  ;;  %v7189_v27 = vshrl.u32 %v5917_v46, 16  ;;  %v2767_v0 = vsel %vm4521_vm3, %v2762_v35, %v2766_v44 }
 0x2a3   : > { %v1976_v16 = vpop.f32.mrf.mxu3  ;;  %v6180_v46 = vpack.c.b16 %v3039_v37, %v3038_v59  ;;  %v2235_v59 = vrot.slane %v2230_v3, 4 }
 0x2a4   : > { %2143 = vst.msk [vmem:[#allocation3 + $0xf8] sm:$0xf] %vm268_vm0, %v2110_v47  ;;  %v2013_v30 = vmul.f32 %v6096_v6, %v1976_v16  ;;  %3076 = vrot.lane.b32.xlu1 %v6150_v41, %s4308_s27  ;;  %3008 = vrot.lane.b32.xlu0 %v4221_v39, %s4306_s25  ;;  %v2718_v57 = vrot.slane %v7189_v27, 4  ;;  %v2756_v47 = vor.u32 %v2755_v2, %v2754_v14  ;;  %v2239_v16 = vrot.slane %v2237_v36, 7 }
 0x2a5   : > { %v2722_v39 = vshll.u32 %v2603_v43, 16  ;;  %v7190_v14 = vshrl.u32 %v5889_v13, 16  ;;  %v7191_v2 = vshll.u32 %v5889_v13, 16 }
 0x2a6   : > { %v2047_v24 = vadd.f32 %v6109_v63, %v2013_v30  ;;  %v2433_v30 = vrot.slane %v2428_v26, 4  ;;  %v2719_v15 = vor.u32 %v2718_v57, %v6170_v5  ;;  %v2757_v29 = vrot.slane %v2756_v47, 4 }
 0x2a7   : > { %v2712_v48 = vrot.slane %v7190_v14, 4  ;;  %v2713_v36 = vrot.slane %v7191_v2, 5  ;;  %v3047_v26 = vunpack.c.l.b16 %v2767_v0  ;;  %v2242_v37 = vor.u32 %v2240_v4, %v2239_v16  ;;  %v6237_v14 = vpop.permute.xlu0 %2996 }
 0x2a8   : > { %v2079_v60 = vmax.f32 %v2047_v24, 0.0  ;;  %v2441_v8 = vsel %vm4913_vm6, %v2433_v30, %v2440_v56  ;;  %v2223_v24 = vshrl.u32 %v2149_v54, 16  ;;  %v2720_v27 = vrot.slane %v2719_v15, 4  ;;  %v6211_v54 = vld [vmem:[#allocation3 + $0x98] sm:$0xf] }
 0x2a9   : > { %v2887_v9 = vunpack.c.l.b16 %v2441_v8  ;;  %v2714_v43 = vor.u32 %v2713_v36, %v2712_v48  ;;  %v2724_v57 = vrot.slane %v2722_v39, 5  ;;  %v2886_v56 = vunpack.c.l.b16 %v2432_v52  ;;  %v2604_v8 = vld [vmem:[#allocation3 + $0x8c] sm:$0x1]  ;;  %v2605_v52 = vld [vmem:[#allocation3 + $0x9c] sm:$0x1] }
 0x2aa   : > { %v2111_v20 = vpack.c.bf16 %v2079_v60, %v2079_v60  ;;  %v7192_v60 = vshll.u32 %v6043_v33, 16  ;;  %v2243_v45 = vsel %vm4913_vm6, %v2235_v59, %v2242_v37  ;;  %v2413_v39 = vshrl.u32 %v6211_v54, 16 }
 0x2ab   : > { %v1978_v1 = vpop.f32.mrf.mxu3  ;;  %v6178_v10 = vld [vmem:[#allocation3 + $0xf4] sm:$0xff]  ;;  %v6215_v7 = vpack.c.b16 %v2887_v9, %v2886_v56  ;;  %v2715_v40 = vrot.slane %v2714_v43, 4  ;;  %v2725_v33 = vsel %vm4521_vm3, %v2720_v27, %v2724_v57  ;;  %v2416_v30 = vshll.u32 %v6211_v54, 16 }
 0x2ac   : > { %2144 = vst.msk [vmem:[#allocation3 + $0x104] sm:$0xf] %vm268_vm0, %v2111_v20  ;;  %v2014_v61 = vmul.f32 %v6096_v6, %v1978_v1  ;;  %3082 = vrot.lane.b32.xlu1 %v6176_v58, %s4308_s27  ;;  %3024 = vrot.lane.b32.xlu2 %v6178_v10, %s4306_s25  ;;  %v2759_v6 = vsel %vm4521_vm3, %v2757_v29, %v6148_v19  ;;  %v6235_v1 = vld [vmem:[#allocation3 + $0x94] sm:$0xf]  ;;  %v2869_v48 = vunpack.c.l.b16 %v2243_v45  ;;  %v3041_v2 = vunpack.c.l.b16 %v2725_v33 }
 0x2ad   : > { %3086 = vrot.lane.b32.xlu0 %v6180_v46, %s4308_s27  ;;  %v2233_v47 = vor.u32 %v7192_v60, %v2230_v3  ;;  %v3046_v35 = vunpack.c.l.b16 %v2759_v6  ;;  %v2717_v16 = vsel %vm4521_vm3, %v2715_v40, %v6170_v5  ;;  %v7194_v5 = vshrl.u32 %v5960_v28, 16  ;;  %v4286_v56 = vld [vmem:[#allocation3 + $0x14] sm:$0xff] }
 0x2ae   : > { %v2048_v13 = vadd.f32 %v6109_v63, %v2014_v61  ;;  %v4069_v63 = vrot.slane %v2223_v24, 11  ;;  %v3040_v15 = vunpack.c.l.b16 %v2717_v16  ;;  %v7193_v61 = vshll.u32 %v5960_v28, 16  ;;  %v4222_v16 = vld [vmem:[#allocation3 + $0x84] sm:$0xff] }
 0x2af   : > { %v6213_v20 = vpack.c.b16 %v3047_v26, %v3046_v35  ;;  %v2732_v0 = vrot.slane %v7194_v5, 4  ;;  %v2404_v24 = vshrl.u32 %v6235_v1, 16  ;;  %v2407_v3 = vshll.u32 %v6235_v1, 16  ;;  %v6262_v59 = vpop.permute.xlu0 %3002 }
 0x2b0   : > { %v2080_v44 = vmax.f32 %v2048_v13, 0.0  ;;  %v2234_v4 = vsel %vm4913_vm6, %v4069_v63, %v2233_v47  ;;  %v2730_v29 = vrot.slane %v7193_v61, 5  ;;  %v2744_v13 = vrot.slane %v2416_v30, 5  ;;  %7197 = vst [vmem:[#allocation5_spill] sm:$0xff] %v6262_v59 }
 0x2b1   : > { %v2868_v36 = vunpack.c.l.b16 %v2234_v4  ;;  %v2746_v6 = vrot.slane %v2413_v39, 4  ;;  %v6249_v9 = vpack.c.b16 %v3041_v2, %v3040_v15  ;;  %v7195_v43 = vshrl.u32 %v5938_v34, 16 }
 0x2b2   : > { %v2112_v19 = vpack.c.bf16 %v2080_v44, %v2080_v44  ;;  %v7196_v28 = vshll.u32 %v5938_v34, 16  ;;  %v2733_v27 = vor.u32 %v2732_v0, %v2730_v29  ;;  %v2736_v57 = vshll.u32 %v2604_v8, 16 }
 0x2b3   : > { %v6247_v26 = vpack.c.b16 %v2869_v48, %v2868_v36  ;;  %v2726_v37 = vrot.slane %v7195_v43, 4  ;;  %v2740_v63 = vrot.slane %v2404_v24, 4  ;;  %v2741_v60 = vrot.slane %v2407_v3, 5  ;;  %v4223_v48 = vld [vmem:[#allocation3 + $0x94] sm:$0xff] }
 0x2b4   : > { %2145 = vst.msk [vmem:[#allocation3 + $0x108] sm:$0xf] %vm268_vm0, %v2112_v19  ;;  %3094 = vrot.lane.b32.xlu1 %v6213_v20, %s4308_s27  ;;  %3232 = vrot.lane.b32.xlu2 %v6215_v7, %s4313_s23  ;;  %v2727_v44 = vrot.slane %v7196_v28, 5  ;;  %v2747_v47 = vor.u32 %v2746_v6, %v2744_v13  ;;  %v2750_v35 = vshll.u32 %v2605_v52, 16  ;;  %v2734_v19 = vrot.slane %v2733_v27, 4 }
 0x2b5   : > { %3269 = vrot.lane.b32.xlu0 %v5977_v31, %s4314_s24  ;;  %v2738_v40 = vrot.slane %v2736_v57, 5  ;;  %v2742_v45 = vor.u32 %v2741_v60, %v2740_v63  ;;  %v2180_v27 = vld [vmem:[#allocation3 + $0xb4] sm:$0xf]  ;;  %v2173_v63 = vld [vmem:[#allocation3 + $0x90] sm:$0x8] }
 0x2b6   : > { %v2728_v34 = vor.u32 %v2727_v44, %v2726_v37  ;;  %v2748_v33 = vrot.slane %v2747_v47, 4  ;;  %v2752_v4 = vrot.slane %v2750_v35, 5  ;;  %v2181_v37 = vld [vmem:[#allocation3 + $0xb8] sm:$0xf]  ;;  %v2399_v35 = vshrl.u32 %v2173_v63, 16 }
 0x2b7   : > { %v2739_v36 = vsel %vm4521_vm3, %v2734_v19, %v2738_v40  ;;  %v2743_v15 = vrot.slane %v2742_v45, 4  ;;  %v2457_v60 = vshrl.u32 %v2181_v37, 16  ;;  %v6290_v19 = vpop.permute.xlu2 %3000 }
 0x2b8   : > { %v2729_v2 = vrot.slane %v2728_v34, 4  ;;  %v2753_v61 = vsel %vm4521_vm3, %v2748_v33, %v2752_v4  ;;  %v3043_v8 = vunpack.c.l.b16 %v2739_v36  ;;  %v2179_v34 = vld [vmem:[#allocation3 + $0xb0] sm:$0x8]  ;;  %v2460_v4 = vshll.u32 %v2181_v37, 16 }
 0x2b9   : > { %v2745_v6 = vsel %vm4521_vm3, %v2743_v15, %v2744_v13  ;;  %v3045_v43 = vunpack.c.l.b16 %v2753_v61  ;;  %v2448_v13 = vshrl.u32 %v2180_v27, 16  ;;  %v2459_v40 = vrot.slane %v2457_v60, 7 }
 0x2ba   : > { %v2731_v5 = vsel %vm4521_vm3, %v2729_v2, %v2730_v29  ;;  %v3044_v44 = vunpack.c.l.b16 %v2745_v6  ;;  %v2415_v29 = vrot.slane %v2413_v39, 7  ;;  %v2443_v45 = vshrl.u32 %v2179_v34, 16 }
 0x2bb   : > { %v3042_v28 = vunpack.c.l.b16 %v2731_v5  ;;  %v2450_v33 = vrot.slane %v2448_v13, 7  ;;  %v2451_v15 = vshll.u32 %v2180_v27, 16  ;;  %v2462_v61 = vor.u32 %v2460_v4, %v2459_v40  ;;  %v2607_v40 = vld [vmem:[#allocation3 + $0xbc] sm:$0x1] }
 0x2bc   : > { %3109 = vrot.lane.b32.xlu2 %v6247_v26, %s4311_s30  ;;  %3088 = vrot.lane.b32.xlu1 %v6249_v9, %s4308_s27  ;;  %v6282_v47 = vpack.c.b16 %v3045_v43, %v3044_v44  ;;  %v2418_v39 = vor.u32 %v2416_v30, %v2415_v29  ;;  %v4079_v54 = vrot.slane %v2443_v45, 11  ;;  %v2774_v34 = vrot.slane %v2457_v60, 4 }
 0x2bd   : > { %3146 = vrot.lane.b32.xlu0 %v4286_v56, %s4312_s6  ;;  %v6280_v57 = vpack.c.b16 %v3043_v8, %v3042_v28  ;;  %v2406_v56 = vrot.slane %v2404_v24, 7  ;;  %v2453_v30 = vor.u32 %v2451_v15, %v2450_v33  ;;  %v2455_v5 = vrot.slane %v2450_v33, 4 }
 0x2be   : > { %7198 = vst [vmem:[#allocation6_spill] sm:$0xff] %v6282_v47  ;;  %v2769_v45 = vrot.slane %v2451_v15, 5 }
 0x2bf   : > { %v2409_v2 = vor.u32 %v2407_v3, %v2406_v56  ;;  %v2411_v36 = vrot.slane %v2406_v56, 4  ;;  %v6304_v3 = vpop.permute.xlu1 %2998  ;;  %v2463_v43 = vsel %vm4913_vm6, %v2455_v5, %v2462_v61  ;;  %v2772_v56 = vrot.slane %v2460_v4, 5 }
 0x2c0   : > { %v2889_v37 = vunpack.c.l.b16 %v2463_v43 }
 0x2c1   : > { %v2419_v24 = vsel %vm4913_vm6, %v2411_v36, %v2418_v39  ;;  %v2768_v39 = vrot.slane %v2448_v13, 4  ;;  %v2775_v33 = vor.u32 %v2774_v34, %v2772_v56 }
 0x2c2   : > { %v2885_v6 = vunpack.c.l.b16 %v2419_v24 }
 0x2c3   : > { %v2770_v60 = vor.u32 %v2769_v45, %v2768_v39  ;;  %v2776_v36 = vrot.slane %v2775_v33, 4  ;;  %v2608_v45 = vld [vmem:[#allocation3 + $0xcc] sm:$0x1] }
 0x2c4   : > { %3216 = vrot.lane.b32.xlu2 %v5744_v22, %s4313_s23  ;;  %3010 = vrot.lane.b32.xlu1 %v4222_v16, %s4306_s25  ;;  %v4077_v16 = vrot.slane %v2399_v35, 11 }
 0x2c5   : > { %3162 = vrot.lane.b32.xlu0 %v4223_v48, %s4312_s6  ;;  %v2771_v61 = vrot.slane %v2770_v60, 4 }
 0x2c6   : > { %v2410_v1 = vsel %vm4913_vm6, %v4077_v16, %v2409_v2  ;;  %v2778_v16 = vshll.u32 %v2607_v40, 16 }
 0x2c8   : > { %v3015_v0 = vpop.permute.xlu0 %3014  ;;  %v2780_v13 = vrot.slane %v2778_v16, 5 }
 0x2c9   : > { %v6278_v52 = vsel %vm1604_vm10, %v6215_v7, %v3015_v0  ;;  %v4287_v0 = vld [vmem:[#allocation3 + $0x24] sm:$0xff] }
 0x2ca   : > { %v2781_v24 = vsel %vm4521_vm3, %v2776_v36, %v2780_v13 }
 0x2cc   : > { %3304 = vrot.lane.b32.xlu1 %v6213_v20, %s4315_s26  ;;  %3090 = vrot.lane.b32.xlu2 %v6280_v57, %s4308_s27 }
 0x2cd   : > { %3092 = vrot.lane.b32.xlu0 %v6282_v47, %s4308_s27 }
 0x2d4   : > { %3181 = vrot.lane.b32.xlu1 %v6150_v41, %s4316_s28  ;;  %3012 = vrot.lane.b32.xlu2 %v4223_v48, %s4306_s25  ;;  %v2884_v41 = vunpack.c.l.b16 %v2410_v1  ;;  %v2454_v48 = vsel %vm4913_vm6, %v4079_v54, %v2453_v30  ;;  %v3049_v54 = vunpack.c.l.b16 %v2781_v24  ;;  %v2184_v1 = vld [vmem:[#allocation3 + $0xc8] sm:$0xf] }
 0x2d5   : > { %3253 = vrot.lane.b32.xlu0 %v4287_v0, %s4314_s24  ;;  %v2888_v44 = vunpack.c.l.b16 %v2454_v48  ;;  %v2479_v43 = vshrl.u32 %v2184_v1, 16 }
 0x2d6   : > { %v6306_v8 = vpop.permute.xlu2 %3018  ;;  %v6312_v28 = vpack.c.b16 %v2885_v6, %v2884_v41  ;;  %v4288_v6 = vld [vmem:[#allocation3 + $0x34] sm:$0xff]  ;;  %v2182_v41 = vld [vmem:[#allocation3 + $0xc0] sm:$0x8] }
 0x2d7   : > { %v2909_v27 = vpack.c.b16 %v2889_v37, %v2888_v44  ;;  %v2481_v48 = vrot.slane %v2479_v43, 7  ;;  %v2482_v37 = vshll.u32 %v2184_v1, 16  ;;  %v2465_v44 = vshrl.u32 %v2182_v41, 16 }
 0x2d8   : > { %v2788_v16 = vrot.slane %v2479_v43, 4 }
 0x2d9   : > { %v2484_v39 = vor.u32 %v2482_v37, %v2481_v48  ;;  %v2786_v33 = vrot.slane %v2482_v37, 5  ;;  %v2187_v37 = vld [vmem:[#allocation3 + $0xd8] sm:$0xf] }
 0x2dc   : > { %3197 = vrot.lane.b32.xlu1 %v6282_v47, %s4316_s28  ;;  %3125 = vrot.lane.b32.xlu2 %v6312_v28, %s4311_s30 }
 0x2dd   : > { %3164 = vrot.lane.b32.xlu0 %v5977_v31, %s4312_s6 }
 0x2de   : > { %v3017_v63 = vpop.permute.xlu1 %3016  ;;  %v6320_v29 = vpop.permute.xlu2 %3078 }
 0x2df   : > { %v6323_v35 = vsel %vm1604_vm10, %v2909_v27, %v3017_v63 }
 0x2e4   : > { %3288 = vrot.lane.b32.xlu1 %v6037_v25, %s4315_s26  ;;  %3127 = vrot.lane.b32.xlu2 %v6215_v7, %s4311_s30  ;;  %v2773_v7 = vsel %vm4521_vm3, %v2771_v61, %v2772_v56  ;;  %v2789_v61 = vor.u32 %v2788_v16, %v2786_v33  ;;  %v2501_v16 = vshrl.u32 %v2187_v37, 16 }
 0x2e5   : > { %3271 = vrot.lane.b32.xlu0 %v5991_v62, %s4314_s24  ;;  %v3048_v30 = vunpack.c.l.b16 %v2773_v7 }
 0x2e6   : > { %v3005_v31 = vpop.permute.xlu1 %3004  ;;  %v3085_v2 = vpop.permute.xlu2 %3084 }
 0x2e7   : > { %v3337_v4 = vsel %vm1604_vm10, %v5868_v42, %v3005_v31  ;;  %v6344_v5 = vpack.c.b16 %v3049_v54, %v3048_v30  ;;  %v4080_v31 = vrot.slane %v2465_v44, 11 }
 0x2e8   : > { %v6334_v15 = vsel %vm1670_vm11, %v3337_v4, %v3085_v2  ;;  %v2792_v4 = vshll.u32 %v2608_v45, 16 }
 0x2e9   : > { %7199 = vst [vmem:[#allocation7_spill] sm:$0xff] %v6334_v15 }
 0x2ea   : > { %v2794_v43 = vrot.slane %v2792_v4, 5  ;;  %v2185_v4 = vld [vmem:[#allocation3 + $0xd0] sm:$0x8] }
 0x2ec   : > { %3199 = vrot.lane.b32.xlu1 %v6213_v20, %s4316_s28  ;;  %3234 = vrot.lane.b32.xlu2 %v2909_v27, %s4313_s23  ;;  %v2183_v20 = vld [vmem:[#allocation3 + $0xc4] sm:$0xf] }
 0x2ed   : > { %3148 = vrot.lane.b32.xlu0 %v4287_v0, %s4312_s6  ;;  %v2470_v0 = vshrl.u32 %v2183_v20, 16  ;;  %v2473_v40 = vshll.u32 %v2183_v20, 16  ;;  %v2790_v20 = vrot.slane %v2789_v61, 4  ;;  %v2504_v61 = vshll.u32 %v2187_v37, 16 }
 0x2ee   : > { %v6357_v56 = vpop.permute.xlu2 %3006 }
 0x2ef   : > { %v2472_v63 = vrot.slane %v2470_v0, 7  ;;  %v2782_v36 = vrot.slane %v2470_v0, 4  ;;  %v2783_v13 = vrot.slane %v2473_v40, 5  ;;  %v2795_v48 = vsel %vm4521_vm3, %v2790_v20, %v2794_v43 }
 0x2f0   : > { %v3340_v37 = vsel %vm1604_vm10, %v5913_v17, %v6357_v56 }
 0x2f1   : > { %v2475_v2 = vor.u32 %v2473_v40, %v2472_v63  ;;  %v2784_v1 = vor.u32 %v2783_v13, %v2782_v36  ;;  %v3051_v40 = vunpack.c.l.b16 %v2795_v48  ;;  %v2487_v36 = vshrl.u32 %v2185_v4, 16 }
 0x2f2   : > { %v2800_v4 = vrot.slane %v2504_v61, 5 }
 0x2f4   : > { %3306 = vrot.lane.b32.xlu1 %v6344_v5, %s4315_s26  ;;  %3111 = vrot.lane.b32.xlu2 %v5744_v22, %s4311_s30 }
 0x2f5   : > { %3255 = vrot.lane.b32.xlu0 %v4288_v6, %s4314_s24 }
 0x2fc   : > { %3183 = vrot.lane.b32.xlu1 %v6037_v25, %s4316_s28  ;;  %3218 = vrot.lane.b32.xlu2 %v5786_v38, %s4313_s23  ;;  %v2477_v25 = vrot.slane %v2472_v63, 4 }
 0x2fd   : > { %3166 = vrot.lane.b32.xlu0 %v5991_v62, %s4312_s6  ;;  %v2476_v62 = vsel %vm4913_vm6, %v4080_v31, %v2475_v2 }
 0x2fe   : > { %v6359_v34 = vpop.permute.xlu0 %3020  ;;  %v2485_v60 = vsel %vm4913_vm6, %v2477_v25, %v2484_v39  ;;  %v2890_v0 = vunpack.c.l.b16 %v2476_v62  ;;  %v2186_v39 = vld [vmem:[#allocation3 + $0xd4] sm:$0xf] }
 0x2ff   : > { %7200 = vst [vmem:[#allocation8_spill] sm:$0xff] %v6359_v34  ;;  %v2891_v24 = vunpack.c.l.b16 %v2485_v60  ;;  %v2492_v2 = vshrl.u32 %v2186_v39, 16  ;;  %v2503_v60 = vrot.slane %v2501_v16, 7  ;;  %v2495_v20 = vshll.u32 %v2186_v39, 16 }
 0x301   : > { %v6376_v41 = vpack.c.b16 %v2891_v24, %v2890_v0  ;;  %v2494_v13 = vrot.slane %v2492_v2, 7  ;;  %v2506_v43 = vor.u32 %v2504_v61, %v2503_v60  ;;  %v4081_v0 = vrot.slane %v2487_v36, 11 }
 0x302   : > { %v2802_v60 = vrot.slane %v2501_v16, 4  ;;  %v2797_v56 = vrot.slane %v2495_v20, 5 }
 0x303   : > { %v2499_v48 = vrot.slane %v2494_v13, 4 }
 0x304   : > { %3290 = vrot.lane.b32.xlu1 %v6130_v23, %s4315_s26  ;;  %3129 = vrot.lane.b32.xlu2 %v2909_v27, %s4311_s30  ;;  %v2785_v27 = vrot.slane %v2784_v1, 4 }
 0x305   : > { %3273 = vrot.lane.b32.xlu0 %v6014_v11, %s4314_s24 }
 0x306   : > { %v3075_v7 = vpop.permute.xlu0 %3074  ;;  %v6370_v54 = vpop.permute.xlu2 %3024 }
 0x307   : > { %7201 = vst [vmem:[#allocation9_spill] sm:$0xff] %v6370_v54  ;;  %v6374_v30 = vsel %vm1670_vm11, %v5934_v18, %v3075_v7  ;;  %v2787_v18 = vsel %vm4521_vm3, %v2785_v27, %v2786_v33  ;;  %v3325_v33 = vsel %vm1604_vm10, %v6247_v26, %v6237_v14  ;;  %v2497_v27 = vor.u32 %v2495_v20, %v2494_v13  ;;  %v3604_v13 = vld [vmem:[%s6977_s3 + $0x20] sm:$0xf] }
 0x308   : > { %v3050_v31 = vunpack.c.l.b16 %v2787_v18  ;;  %v2507_v18 = vsel %vm4913_vm6, %v2499_v48, %v2506_v43  ;;  %v2803_v48 = vor.u32 %v2802_v60, %v2800_v4  ;;  %v2188_v54 = vld [vmem:[#allocation3 + $0xe0] sm:$0x8] }
 0x309   : > { %v2498_v14 = vsel %vm4913_vm6, %v4081_v0, %v2497_v27  ;;  %v3622_v0 = vunpack.c.l.b16 %v3604_v13 }
 0x30a   : > { %v6393_v25 = vpack.c.b16 %v3051_v40, %v3050_v31  ;;  %v2893_v40 = vunpack.c.l.b16 %v2507_v18  ;;  %v2892_v36 = vunpack.c.l.b16 %v2498_v14 }
 0x30b   : > { %v3627_v16 = vpack.c.b16 %v3622_v0, %v3622_v0 }
 0x30c   : > { %3201 = vrot.lane.b32.xlu1 %v6344_v5, %s4316_s28  ;;  %3236 = vrot.lane.b32.xlu2 %v6376_v41, %s4313_s23  ;;  %v6434_v27 = vpack.c.b16 %v2893_v40, %v2892_v36  ;;  %v2804_v40 = vrot.slane %v2803_v48, 4  ;;  %v4233_v48 = vld [vmem:[%s6977_s3 + $0x8] sm:$0xff] }
 0x30d   : > { %3150 = vrot.lane.b32.xlu0 %v4288_v6, %s4312_s6  ;;  %v6399_v6 = vld [vmem:[#allocation3 + $0x44] sm:$0xff]  ;;  %v3667_v18 = vsel %vm3665_vm2, %v3627_v16, 0 }
 0x30e   : > { %v6387_v44 = vpop.permute.xlu0 %3080  ;;  %v6389_v63 = vpop.permute.xlu1 %3022  ;;  %4239 = vmatpush.bf16.msra.mxu2 %v3667_v18  ;;  %3672 = vmatpush.bf16.msra.mxu1 %v3667_v18 }
 0x30f   : > { %7202 = vst [vmem:[#allocation10_spill] sm:$0xff] %v6389_v63  ;;  %v6391_v45 = vpop.permute.xlu2 %3232 }
 0x314   : > { %3308 = vrot.lane.b32.xlu1 %v6393_v25, %s4315_s26  ;;  %3113 = vrot.lane.b32.xlu2 %v5786_v38, %s4311_s30 }
 0x315   : > { %3257 = vrot.lane.b32.xlu0 %v6399_v6, %s4314_s24 }
 0x316   : > { %v3077_v62 = vpop.permute.xlu1 %3076  ;;  %v3009_v24 = vpop.permute.xlu0 %3008 }
 0x317   : > { %v6407_v7 = vsel %vm1670_vm11, %v3325_v33, %v3077_v62  ;;  %v6409_v1 = vpop.permute.xlu2 %3109  ;;  %v2796_v62 = vrot.slane %v2492_v2, 4  ;;  %v3343_v13 = vsel %vm1604_vm10, %v5955_v32, %v3009_v24  ;;  %v4232_v24 = vld [vmem:[%s6977_s3] sm:$0xff] }
 0x31c   : > { %3185 = vrot.lane.b32.xlu1 %v6130_v23, %s4316_s28  ;;  %3220 = vrot.lane.b32.xlu2 %v5828_v51, %s4313_s23  ;;  %v2609_v23 = vld [vmem:[#allocation3 + $0xdc] sm:$0x1] }
 0x31d   : > { %3131 = vrot.lane.b32.xlu0 %v6376_v41, %s4311_s30  ;;  %v2806_v43 = vshll.u32 %v2609_v23, 16 }
 0x31e   : > { %v6421_v26 = vpop.permute.xlu1 %3082 }
 0x31f   : > { %7203 = vst [vmem:[#allocation19_spill] sm:$0xff] %v6421_v26  ;;  %v6426_v39 = vpop.permute.xlu2 %3216  ;;  %v3087_v31 = vpop.permute.xlu0 %3086 }
 0x320   : > { %v6429_v33 = vsel %vm1670_vm11, %v3340_v37, %v3087_v31  ;;  %v2798_v37 = vor.u32 %v2797_v56, %v2796_v62  ;;  %v2808_v31 = vrot.slane %v2806_v43, 5 }
 0x321   : > { %7204 = vst [vmem:[#allocation13_spill] sm:$0xff] %v6429_v33 }
 0x322   : > { %v2799_v23 = vrot.slane %v2798_v37, 4  ;;  %v2809_v60 = vsel %vm4521_vm3, %v2804_v40, %v2808_v31  ;;  %v2189_v40 = vld [vmem:[#allocation3 + $0xe4] sm:$0xf] }
 0x323   : > { %v3053_v43 = vunpack.c.l.b16 %v2809_v60  ;;  %v2514_v60 = vshrl.u32 %v2189_v40, 16 }
 0x324   : > { %3292 = vrot.lane.b32.xlu1 %v6176_v58, %s4315_s26  ;;  %3096 = vrot.lane.b32.xlu2 %v6344_v5, %s4308_s27  ;;  %v4235_v5 = vld [vmem:[%s6977_s3 + $0x18] sm:$0xff]  ;;  %v2801_v36 = vsel %vm4521_vm3, %v2799_v23, %v2800_v4  ;;  %v2190_v4 = vld [vmem:[#allocation3 + $0xe8] sm:$0xf] }
 0x325   : > { %3238 = vrot.lane.b32.xlu0 %v6434_v27, %s4313_s23  ;;  %4240 = vmatpush.bf16.msra.mxu2 %v4235_v5  ;;  %v3052_v16 = vunpack.c.l.b16 %v2801_v36  ;;  %v2523_v18 = vshrl.u32 %v2190_v4, 16  ;;  %v2526_v37 = vshll.u32 %v2190_v4, 16  ;;  %v2516_v34 = vrot.slane %v2514_v60, 7 }
 0x326   : > { %v3095_v61 = vpop.permute.xlu1 %3094  ;;  %3673 = vmatpush.bf16.msra.mxu1 %v4235_v5 }
 0x327   : > { %v6444_v2 = vsel %vm1670_vm11, %v6278_v52, %v3095_v61  ;;  %v6446_v14 = vpop.permute.xlu0 %3269  ;;  %v6448_v20 = vpop.permute.xlu2 %3090  ;;  %v4234_v52 = vld [vmem:[%s6977_s3 + $0x10] sm:$0xff]  ;;  %v6478_v61 = vpack.c.b16 %v3053_v43, %v3052_v16  ;;  %v2814_v36 = vrot.slane %v2526_v37, 5  ;;  %v2810_v43 = vrot.slane %v2514_v60, 4 }
 0x328   : > { %v2525_v26 = vrot.slane %v2523_v18, 7 }
 0x329   : > { %4241 = vmatpush.bf16.msra.mxu2 %v4234_v52 }
 0x32a   : > { %3674 = vmatpush.bf16.msra.mxu1 %v4234_v52  ;;  %v2517_v52 = vshll.u32 %v2189_v40, 16 }
 0x32c   : > { %3168 = vrot.lane.b32.xlu1 %v6014_v11, %s4312_s6  ;;  %3203 = vrot.lane.b32.xlu2 %v6393_v25, %s4316_s28  ;;  %v2519_v60 = vor.u32 %v2517_v52, %v2516_v34 }
 0x32d   : > { %3115 = vrot.lane.b32.xlu0 %v5828_v51, %s4311_s30  ;;  %4242 = vmatpush.bf16.msra.mxu2 %v4233_v48 }
 0x32e   : > { %v3089_v62 = vpop.permute.xlu1 %3088  ;;  %3675 = vmatpush.bf16.msra.mxu1 %v4233_v48  ;;  %v2811_v48 = vrot.slane %v2517_v52, 5 }
 0x32f   : > { %v6468_v0 = vpop.permute.xlu0 %3146  ;;  %v6471_v56 = vsel %vm1670_vm11, %v3343_v13, %v3089_v62  ;;  %v6473_v11 = vpop.permute.xlu2 %3012  ;;  %v2816_v13 = vrot.slane %v2523_v18, 4  ;;  %v2610_v62 = vld [vmem:[#allocation3 + $0xec] sm:$0x1] }
 0x330   : > { %7205 = vst [vmem:[#allocation17_spill] sm:$0xff] %v6471_v56  ;;  %v2820_v4 = vshll.u32 %v2610_v62, 16  ;;  %v2812_v33 = vor.u32 %v2811_v48, %v2810_v43  ;;  %v2528_v48 = vor.u32 %v2526_v37, %v2525_v26 }
 0x331   : > { %4243 = vmatpush.bf16.msra.mxu2 %v4232_v24  ;;  %v2817_v16 = vor.u32 %v2816_v13, %v2814_v36 }
 0x332   : > { %3676 = vmatpush.bf16.msra.mxu1 %v4232_v24  ;;  %v2822_v15 = vrot.slane %v2820_v4, 5  ;;  %v2813_v13 = vrot.slane %v2812_v33, 4 }
 0x333   : > { %v2818_v63 = vrot.slane %v2817_v16, 4 }
 0x334   : > { %3275 = vrot.lane.b32.xlu1 %v6067_v12, %s4314_s24  ;;  %3310 = vrot.lane.b32.xlu2 %v6478_v61, %s4315_s26 }
 0x335   : > { %3222 = vrot.lane.b32.xlu0 %v5868_v42, %s4313_s23 }
 0x336   : > { %v3011_v31 = vpop.permute.xlu1 %3010 }
 0x337   : > { %v3163_v5 = vpop.permute.xlu0 %3162  ;;  %v3126_v23 = vpop.permute.xlu2 %3125  ;;  %v3346_v62 = vsel %vm1604_vm10, %v5982_v55, %v3011_v31 }
 0x338   : > { %v3385_v33 = vsel %vm1670_vm11, %v3346_v62, %v6448_v20  ;;  %v3401_v20 = vsel %vm1736_vm13, %v6374_v30, %v6409_v1 }
 0x339   : > { %v3417_v47 = vsel %vm1736_vm13, %v3385_v33, %v3126_v23  ;;  %v3433_v23 = vsel %vm1802_vm15, %v3401_v20, %v6468_v0 }
 0x33c   : > { %3152 = vrot.lane.b32.xlu1 %v6399_v6, %s4312_s6  ;;  %3187 = vrot.lane.b32.xlu2 %v6176_v58, %s4316_s28  ;;  %v2509_v6 = vshrl.u32 %v2188_v54, 16  ;;  %v4290_v58 = vld [vmem:[#allocation3 + $0x54] sm:$0xff]  ;;  %v2815_v54 = vsel %vm4521_vm3, %v2813_v13, %v2814_v36 }
 0x33d   : > { %3098 = vrot.lane.b32.xlu0 %v6393_v25, %s4308_s27  ;;  %v2823_v25 = vsel %vm4521_vm3, %v2818_v63, %v2822_v15  ;;  %v2521_v15 = vrot.slane %v2516_v34, 4  ;;  %v3054_v63 = vunpack.c.l.b16 %v2815_v54 }
 0x33e   : > { %v3305_v56 = vpop.permute.xlu1 %3304  ;;  %v4082_v18 = vrot.slane %v2509_v6, 11  ;;  %v3055_v51 = vunpack.c.l.b16 %v2823_v25 }
 0x33f   : > { %v6495_v24 = vpop.permute.xlu0 %3092  ;;  %v6497_v40 = vpop.permute.xlu2 %3127  ;;  %v2529_v59 = vsel %vm4913_vm6, %v2521_v15, %v2528_v48 }
 0x340   : > { %v2520_v31 = vsel %vm4913_vm6, %v4082_v18, %v2519_v60  ;;  %v6517_v36 = vpack.c.b16 %v3055_v51, %v3054_v63  ;;  %v2895_v26 = vunpack.c.l.b16 %v2529_v59  ;;  %v3449_v51 = vsel %vm1802_vm15, %v3417_v47, %v3163_v5 }
 0x341   : > { %v2894_v34 = vunpack.c.l.b16 %v2520_v31  ;;  %v4291_v31 = vld [vmem:[#allocation3 + $0x64] sm:$0xff] }
 0x343   : > { %v6539_v30 = vpack.c.b16 %v2895_v26, %v2894_v34 }
 0x344   : > { %3259 = vrot.lane.b32.xlu1 %v4290_v58, %s4314_s24  ;;  %3294 = vrot.lane.b32.xlu2 %v6069_v50, %s4315_s26 }
 0x345   : > { %3205 = vrot.lane.b32.xlu0 %v6478_v61, %s4316_s28 }
 0x346   : > { %v3182_v43 = vpop.permute.xlu1 %3181 }
 0x347   : > { %v3254_v16 = vpop.permute.xlu0 %3253  ;;  %v3235_v4 = vpop.permute.xlu2 %3234  ;;  %v3466_v13 = vsel %vm3464_vm4, %v3433_v23, %v3182_v43  ;;  %v2193_v43 = vld [vmem:[#allocation3 + $0xf8] sm:$0xf] }
 0x348   : > { %v3499_v0 = vsel %vm3497_vm5, %v3466_v13, %v6426_v39  ;;  %v3349_v39 = vsel %vm1604_vm10, %v6312_v28, %v6473_v11  ;;  %v2545_v60 = vshrl.u32 %v2193_v43, 16 }
 0x349   : > { %v3387_v62 = vsel %vm1670_vm11, %v3349_v39, %v6495_v24 }
 0x34a   : > { %v3419_v54 = vsel %vm1736_vm13, %v3387_v62, %v6497_v40  ;;  %v2547_v15 = vrot.slane %v2545_v60, 7 }
 0x34c   : > { %3133 = vrot.lane.b32.xlu1 %v6434_v27, %s4311_s30  ;;  %3170 = vrot.lane.b32.xlu2 %v6067_v12, %s4312_s6 }
 0x34d   : > { %3312 = vrot.lane.b32.xlu0 %v6517_v36, %s4315_s26 }
 0x34e   : > { %v3198_v37 = vpop.permute.xlu1 %3197 }
 0x34f   : > { %v3482_v52 = vsel %vm3464_vm4, %v3449_v51, %v3198_v37  ;;  %v3165_v12 = vpop.permute.xlu0 %3164  ;;  %v6532_v6 = vpop.permute.xlu2 %3111 }
 0x350   : > { %v3515_v59 = vsel %vm3497_vm5, %v3482_v52, %v6391_v45  ;;  %v3532_v45 = vsel %vm3530_vm8, %v3499_v0, %v3254_v16  ;;  %v3451_v11 = vsel %vm1802_vm15, %v3419_v54, %v3165_v12  ;;  %v2611_v12 = vld [vmem:[#allocation3 + $0xfc] sm:$0x1] }
 0x351   : > { %v3548_v47 = vsel %vm3530_vm8, %v3515_v59, %v6446_v14  ;;  %v2830_v59 = vrot.slane %v2545_v60, 4 }
 0x352   : > { %v3581_v1 = vsel %vm3563_vm7, %v3548_v47, %v3305_v56 }
 0x353   : > { %4182 = vmatmul.msk.bf16.vlgmr.msra.gmra.mxu2 %vm3632_vm9, %v3581_v1 }
 0x354   : > { %3240 = vrot.lane.b32.xlu1 %v6539_v30, %s4313_s23  ;;  %3277 = vrot.lane.b32.xlu2 %v6132_v21, %s4314_s24 }
 0x355   : > { %3189 = vrot.lane.b32.xlu0 %v6069_v50, %s4316_s28  ;;  %v2192_v50 = vld [vmem:[#allocation3 + $0xf4] sm:$0xf] }
 0x356   : > { %v3289_v14 = vpop.permute.xlu1 %3288  ;;  %v2536_v33 = vshrl.u32 %v2192_v50, 16  ;;  %v2539_v26 = vshll.u32 %v2192_v50, 16 }
 0x357   : > { %v3272_v5 = vpop.permute.xlu0 %3271  ;;  %v6552_v25 = vpop.permute.xlu2 %3218  ;;  %v3565_v56 = vsel %vm3563_vm7, %v3532_v45, %v3289_v14  ;;  %v2834_v45 = vshll.u32 %v2611_v12, 16 }
 0x358   : > { %4174 = vmatmul.msk.bf16.vlgmr.msra.gmra.mxu1 %vm3632_vm9, %v3565_v56  ;;  %v2538_v34 = vrot.slane %v2536_v33, 7  ;;  %v2824_v14 = vrot.slane %v2536_v33, 4 }
 0x35a   : > { %v2541_v1 = vor.u32 %v2539_v26, %v2538_v34  ;;  %v2543_v0 = vrot.slane %v2538_v34, 4 }
 0x35c   : > { %3117 = vrot.lane.b32.xlu1 %v5868_v42, %s4311_s30  ;;  %3154 = vrot.lane.b32.xlu2 %v4290_v58, %s4312_s6  ;;  %v2191_v42 = vld [vmem:[#allocation3 + $0xf0] sm:$0x8]  ;;  %v2548_v58 = vshll.u32 %v2193_v43, 16  ;;  %v3403_v43 = vsel %vm1736_vm13, %v6407_v7, %v6532_v6 }
 0x35d   : > { %3296 = vrot.lane.b32.xlu0 %v6180_v46, %s4315_s26  ;;  %v2531_v40 = vshrl.u32 %v2191_v42, 16 }
 0x35e   : > { %v3200_v18 = vpop.permute.xlu1 %3199  ;;  %v2550_v51 = vor.u32 %v2548_v58, %v2547_v15  ;;  %v2828_v13 = vrot.slane %v2548_v58, 5 }
 0x35f   : > { %v3149_v48 = vpop.permute.xlu0 %3148  ;;  %v6569_v16 = vpop.permute.xlu2 %3129  ;;  %v3484_v24 = vsel %vm3464_vm4, %v3451_v11, %v3200_v18  ;;  %v4083_v47 = vrot.slane %v2531_v40, 11 }
 0x360   : > { %v3517_v63 = vsel %vm3497_vm5, %v3484_v24, %v3235_v4  ;;  %v2831_v56 = vor.u32 %v2830_v59, %v2828_v13  ;;  %v3435_v54 = vsel %vm1802_vm15, %v3403_v43, %v3149_v48  ;;  %v2836_v24 = vrot.slane %v2834_v45, 5  ;;  %v2196_v48 = vld [vmem:[#allocation3 + $0x108] sm:$0xf]  ;;  %v2194_v59 = vld [vmem:[#allocation3 + $0x100] sm:$0x8] }
 0x361   : > { %v3550_v37 = vsel %vm3530_vm8, %v3517_v63, %v3272_v5  ;;  %v2825_v5 = vrot.slane %v2539_v26, 5  ;;  %v2542_v39 = vsel %vm4913_vm6, %v4083_v47, %v2541_v1  ;;  %v3421_v47 = vsel %vm1736_vm13, %v6444_v2, %v6569_v16 }
 0x362   : > { %v2832_v11 = vrot.slane %v2831_v56, 4  ;;  %v2896_v33 = vunpack.c.l.b16 %v2542_v39 }
 0x364   : > { %3224 = vrot.lane.b32.xlu1 %v5913_v17, %s4313_s23  ;;  %3261 = vrot.lane.b32.xlu2 %v4291_v31, %s4314_s24  ;;  %v2837_v7 = vsel %vm4521_vm3, %v2832_v11, %v2836_v24 }
 0x365   : > { %3172 = vrot.lane.b32.xlu0 %v6132_v21, %s4312_s6  ;;  %v2551_v21 = vsel %vm4913_vm6, %v2543_v0, %v2550_v51  ;;  %v2553_v0 = vshrl.u32 %v2194_v59, 16 }
 0x366   : > { %v3307_v20 = vpop.permute.xlu1 %3306  ;;  %v2897_v62 = vunpack.c.l.b16 %v2551_v21  ;;  %v2570_v21 = vshll.u32 %v2196_v48, 16 }
 0x367   : > { %v3256_v23 = vpop.permute.xlu0 %3255  ;;  %v6579_v52 = vpop.permute.xlu2 %3236  ;;  %v3583_v4 = vsel %vm3563_vm7, %v3550_v37, %v3307_v20  ;;  %v2195_v37 = vld [vmem:[#allocation3 + $0x104] sm:$0xf]  ;;  %v4084_v43 = vrot.slane %v2553_v0, 11  ;;  %v4293_v0 = vld [vmem:[#allocation3 + $0xf4] sm:$0xff] }
 0x368   : > { %4183 = vmatmul.msk.bf16.gmra.mxu2 %vm3632_vm9, %v3583_v4  ;;  %v6600_v15 = vpack.c.b16 %v2897_v62, %v2896_v33  ;;  %v2567_v4 = vshrl.u32 %v2196_v48, 16  ;;  %v2561_v39 = vshll.u32 %v2195_v37, 16 }
 0x36c   : > { %3100 = vrot.lane.b32.xlu1 %v6478_v61, %s4308_s27  ;;  %3135 = vrot.lane.b32.xlu2 %v6539_v30, %s4311_s30  ;;  %v2826_v61 = vor.u32 %v2825_v5, %v2824_v14 }
 0x36d   : > { %3279 = vrot.lane.b32.xlu0 %v6178_v10, %s4314_s24 }
 0x36e   : > { %v3184_v50 = vpop.permute.xlu1 %3183  ;;  %v2827_v58 = vrot.slane %v2826_v61, 4 }
 0x36f   : > { %v3167_v18 = vpop.permute.xlu0 %3166  ;;  %v6597_v60 = vpop.permute.xlu2 %3113  ;;  %v3468_v42 = vsel %vm3464_vm4, %v3435_v54, %v3184_v50 }
 0x370   : > { %v3501_v10 = vsel %vm3497_vm5, %v3468_v42, %v6552_v25  ;;  %v2829_v6 = vsel %vm4521_vm3, %v2827_v58, %v2828_v13  ;;  %v3057_v25 = vunpack.c.l.b16 %v2837_v7  ;;  %v6624_v13 = vld [vmem:[#allocation3 + $0x74] sm:$0xff]  ;;  %v3453_v14 = vsel %vm1802_vm15, %v3421_v47, %v3167_v18  ;;  %v2612_v42 = vld [vmem:[#allocation3 + $0x10c] sm:$0x1] }
 0x371   : > { %v3534_v40 = vsel %vm3530_vm8, %v3501_v10, %v3256_v23  ;;  %v3056_v51 = vunpack.c.l.b16 %v2829_v6  ;;  %v2569_v23 = vrot.slane %v2567_v4, 7  ;;  %v2842_v10 = vrot.slane %v2570_v21, 5 }
 0x372   : > { %v2844_v58 = vrot.slane %v2567_v4, 4  ;;  %v2848_v6 = vshll.u32 %v2612_v42, 16 }
 0x373   : > { %v6618_v12 = vpack.c.b16 %v3057_v25, %v3056_v51  ;;  %v2572_v62 = vor.u32 %v2570_v21, %v2569_v23 }
 0x374   : > { %3207 = vrot.lane.b32.xlu1 %v6517_v36, %s4316_s28  ;;  %3242 = vrot.lane.b32.xlu2 %v6600_v15, %s4313_s23  ;;  %v2845_v25 = vor.u32 %v2844_v58, %v2842_v10  ;;  %v2850_v23 = vrot.slane %v2848_v6, 5 }
 0x375   : > { %3156 = vrot.lane.b32.xlu0 %v4291_v31, %s4312_s6  ;;  %v2558_v31 = vshrl.u32 %v2195_v37, 16 }
 0x376   : > { %v3291_v63 = vpop.permute.xlu1 %3290  ;;  %v2846_v59 = vrot.slane %v2845_v25, 4 }
 0x377   : > { %v3274_v34 = vpop.permute.xlu0 %3273  ;;  %v6614_v26 = vpop.permute.xlu2 %3220  ;;  %v3567_v20 = vsel %vm3563_vm7, %v3534_v40, %v3291_v63  ;;  %v2560_v45 = vrot.slane %v2558_v31, 7  ;;  %v2838_v63 = vrot.slane %v2558_v31, 4  ;;  %v2839_v40 = vrot.slane %v2561_v39, 5 }
 0x378   : > { %4175 = vmatmul.msk.bf16.gmra.mxu1 %vm3632_vm9, %v3567_v20 }
 0x379   : > { %v2563_v50 = vor.u32 %v2561_v39, %v2560_v45  ;;  %v2565_v54 = vrot.slane %v2560_v45, 4  ;;  %v2198_v45 = vld [vmem:[#allocation3 + $0x114] sm:$0xf] }
 0x37b   : > { %v2573_v2 = vsel %vm4913_vm6, %v2565_v54, %v2572_v62  ;;  %v2564_v11 = vsel %vm4913_vm6, %v4084_v43, %v2563_v50  ;;  %v2580_v50 = vshrl.u32 %v2198_v45, 16  ;;  %v2583_v54 = vshll.u32 %v2198_v45, 16 }
 0x37c   : > { %3314 = vrot.lane.b32.xlu1 %v6618_v12, %s4315_s26  ;;  %3119 = vrot.lane.b32.xlu2 %v5913_v17, %s4311_s30  ;;  %v3107_v33 = vunpack.c.l.b16 %v2573_v2  ;;  %v3106_v7 = vunpack.c.l.b16 %v2564_v11  ;;  %v4230_v2 = vld [vmem:[#allocation3 + $0x104] sm:$0xff] }
 0x37d   : > { %3263 = vrot.lane.b32.xlu0 %v6624_v13, %s4314_s24  ;;  %v2853_v11 = vrot.slane %v2583_v54, 5 }
 0x37e   : > { %v3202_v1 = vpop.permute.xlu1 %3201  ;;  %v6652_v48 = vpack.c.b16 %v3107_v33, %v3106_v7 }
 0x37f   : > { %v3151_v5 = vpop.permute.xlu0 %3150  ;;  %v6632_v56 = vpop.permute.xlu2 %3096  ;;  %v3486_v17 = vsel %vm3464_vm4, %v3453_v14, %v3202_v1  ;;  %v2851_v1 = vsel %vm4521_vm3, %v2846_v59, %v2850_v23 }
 0x380   : > { %v3519_v61 = vsel %vm3497_vm5, %v3486_v17, %v6579_v52  ;;  %v3179_v14 = vunpack.c.l.b16 %v2851_v1  ;;  %v3391_v33 = vsel %vm1670_vm11, %v6323_v35, %v6632_v56  ;;  %v4294_v1 = vld [vmem:[#allocation3 + $0x84] sm:$0xff] }
 0x381   : > { %v3552_v18 = vsel %vm3530_vm8, %v3519_v61, %v3274_v34  ;;  %v3328_v34 = vsel %vm1604_vm10, %v5744_v22, %v6304_v3  ;;  %v2840_v3 = vor.u32 %v2839_v40, %v2838_v63 }
 0x382   : > { %v3373_v20 = vsel %vm1670_vm11, %v3328_v34, %v6320_v29 }
 0x383   : > { %v3405_v37 = vsel %vm1736_vm13, %v3373_v20, %v6597_v60  ;;  %v2841_v29 = vrot.slane %v2840_v3, 4 }
 0x384   : > { %3191 = vrot.lane.b32.xlu1 %v6180_v46, %s4316_s28  ;;  %3226 = vrot.lane.b32.xlu2 %v5955_v32, %s4313_s23  ;;  %v3437_v4 = vsel %vm1802_vm15, %v3405_v37, %v3151_v5  ;;  %v2199_v5 = vld [vmem:[#allocation3 + $0x118] sm:$0xf] }
 0x385   : > { %3137 = vrot.lane.b32.xlu0 %v6600_v15, %s4311_s30  ;;  %v2843_v60 = vsel %vm4521_vm3, %v2841_v29, %v2842_v10  ;;  %v2592_v61 = vshll.u32 %v2199_v5, 16  ;;  %v2613_v10 = vld [vmem:[#allocation3 + $0x11c] sm:$0x1]  ;;  %v3331_v29 = vsel %vm1604_vm10, %v5786_v38, %v6290_v19 }
 0x386   : > { %v3309_v16 = vpop.permute.xlu1 %3308  ;;  %v3178_v43 = vunpack.c.l.b16 %v2843_v60  ;;  %v2862_v34 = vshll.u32 %v2613_v10, 16 }
 0x387   : > { %v3258_v24 = vpop.permute.xlu0 %3257  ;;  %v6648_v52 = vpop.permute.xlu2 %3203  ;;  %v3585_v46 = vsel %vm3563_vm7, %v3552_v18, %v3309_v16  ;;  %v2852_v18 = vrot.slane %v2580_v50, 4 }
 0x388   : > { %4184 = vmatmul.msk.bf16.gmra.mxu2 %vm3632_vm9, %v3585_v46  ;;  %v3180_v16 = vpack.c.b16 %v3179_v14, %v3178_v43  ;;  %v2864_v37 = vrot.slane %v2862_v34, 5 }
 0x389   : > { %v2854_v40 = vor.u32 %v2853_v11, %v2852_v18 }
 0x38b   : > { %v2855_v35 = vrot.slane %v2854_v40, 4 }
 0x38c   : > { %3298 = vrot.lane.b32.xlu1 %v6249_v9, %s4315_s26  ;;  %3102 = vrot.lane.b32.xlu2 %v6517_v36, %s4308_s27 }
 0x38d   : > { %3244 = vrot.lane.b32.xlu0 %v6652_v48, %s4313_s23 }
 0x38e   : > { %v3186_v51 = vpop.permute.xlu1 %3185 }
 0x38f   : > { %v3132_v31 = vpop.permute.xlu0 %3131  ;;  %v3311_v22 = vpop.permute.xlu2 %3310  ;;  %v3470_v47 = vsel %vm3464_vm4, %v3437_v4, %v3186_v51 }
 0x390   : > { %v3503_v36 = vsel %vm3497_vm5, %v3470_v47, %v6614_v26  ;;  %v3423_v58 = vsel %vm1736_vm13, %v3391_v33, %v3132_v31  ;;  %v2197_v31 = vld [vmem:[#allocation3 + $0x110] sm:$0x8]  ;;  %v2582_v47 = vrot.slane %v2580_v50, 7 }
 0x391   : > { %v3536_v26 = vsel %vm3530_vm8, %v3503_v36, %v3258_v24  ;;  %v2856_v24 = vrot.slane %v2592_v61, 5 }
 0x392   : > { %v2585_v53 = vor.u32 %v2583_v54, %v2582_v47  ;;  %v2587_v45 = vrot.slane %v2582_v47, 4 }
 0x394   : > { %3174 = vrot.lane.b32.xlu1 %v4293_v0, %s4312_s6  ;;  %3209 = vrot.lane.b32.xlu2 %v6618_v12, %s4316_s28 }
 0x395   : > { %3121 = vrot.lane.b32.xlu0 %v5955_v32, %s4311_s30  ;;  %v2589_v32 = vshrl.u32 %v2199_v5, 16 }
 0x396   : > { %v3293_v21 = vpop.permute.xlu1 %3292 }
 0x397   : > { %v3239_v17 = vpop.permute.xlu0 %3238  ;;  %v6681_v39 = vpop.permute.xlu2 %3187  ;;  %v3569_v62 = vsel %vm3563_vm7, %v3536_v26, %v3293_v21  ;;  %v2858_v46 = vrot.slane %v2589_v32, 4  ;;  %v2591_v36 = vrot.slane %v2589_v32, 7  ;;  %v3375_v26 = vsel %vm1670_vm11, %v3331_v29, %v6387_v44 }
 0x398   : > { %4176 = vmatmul.msk.bf16.gmra.mxu1 %vm3632_vm9, %v3569_v62 }
 0x399   : > { %v2859_v25 = vor.u32 %v2858_v46, %v2856_v24  ;;  %v2594_v21 = vor.u32 %v2592_v61, %v2591_v36 }
 0x39b   : > { %v2860_v56 = vrot.slane %v2859_v25, 4  ;;  %v2595_v50 = vsel %vm4913_vm6, %v2587_v45, %v2594_v21 }
 0x39c   : > { %3281 = vrot.lane.b32.xlu1 %v4230_v2, %s4314_s24  ;;  %3316 = vrot.lane.b32.xlu2 %v3180_v16, %s4315_s26  ;;  %v3214_v32 = vunpack.c.l.b16 %v2595_v50  ;;  %v7210_v50 = vld [vmem:[#allocation8_spill] sm:$0xff] }
 0x39d   : > { %3228 = vrot.lane.b32.xlu0 %v5982_v55, %s4313_s23 }
 0x39e   : > { %v3169_v42 = vpop.permute.xlu1 %3168 }
 0x39f   : > { %v3116_v7 = vpop.permute.xlu0 %3115  ;;  %v3295_v6 = vpop.permute.xlu2 %3294  ;;  %v3455_v63 = vsel %vm1802_vm15, %v3423_v58, %v3169_v42 }
 0x3a0   : > { %v3488_v20 = vsel %vm3464_vm4, %v3455_v63, %v6648_v52  ;;  %v3407_v38 = vsel %vm1736_vm13, %v3375_v26, %v3116_v7 }
 0x3a1   : > { %v3521_v4 = vsel %vm3497_vm5, %v3488_v20, %v3239_v17  ;;  %v7207_v20 = vld [vmem:[#allocation5_spill] sm:$0xff] }
 0x3a4   : > { %3158 = vrot.lane.b32.xlu1 %v6624_v13, %s4312_s6  ;;  %3193 = vrot.lane.b32.xlu2 %v6249_v9, %s4316_s28  ;;  %v2857_v13 = vsel %vm4521_vm3, %v2855_v35, %v2856_v24  ;;  %v2865_v9 = vsel %vm4521_vm3, %v2860_v56, %v2864_v37  ;;  %v7208_v35 = vld [vmem:[#allocation4_spill] sm:$0xff] }
 0x3a5   : > { %3104 = vrot.lane.b32.xlu0 %v6618_v12, %s4308_s27  ;;  %v2575_v12 = vshrl.u32 %v2197_v31, 16  ;;  %v3286_v0 = vunpack.c.l.b16 %v2865_v9  ;;  %v3334_v56 = vsel %vm1604_vm10, %v7208_v35, %v7207_v20 }
 0x3a6   : > { %v3276_v51 = vpop.permute.xlu1 %3275 }
 0x3a7   : > { %v3554_v3 = vsel %vm3530_vm8, %v3521_v4, %v3276_v51  ;;  %v3223_v59 = vpop.permute.xlu0 %3222  ;;  %v3171_v52 = vpop.permute.xlu2 %3170  ;;  %v4085_v60 = vrot.slane %v2575_v12, 11  ;;  %v7209_v51 = vld [vmem:[#allocation19_spill] sm:$0xff] }
 0x3a8   : > { %v3587_v23 = vsel %vm3563_vm7, %v3554_v3, %v3311_v22  ;;  %v3285_v22 = vunpack.c.l.b16 %v2857_v13  ;;  %v3377_v4 = vsel %vm1670_vm11, %v3334_v56, %v7209_v51 }
 0x3a9   : > { %4185 = vmatmul.msk.bf16.gmra.mxu2 %vm3632_vm9, %v3587_v23  ;;  %v2586_v43 = vsel %vm4913_vm6, %v4085_v60, %v2585_v53  ;;  %v6773_v23 = vld [vmem:[%s6978_s4 + $0x1] ss:$0 sm:$0xff] }
 0x3aa   : > { %v3287_v62 = vpack.c.b16 %v3286_v0, %v3285_v22  ;;  %v3213_v44 = vunpack.c.l.b16 %v2586_v43 }
 0x3ac   : > { %3265 = vrot.lane.b32.xlu1 %v4294_v1, %s4314_s24  ;;  %3300 = vrot.lane.b32.xlu2 %v6280_v57, %s4315_s26  ;;  %v3215_v46 = vpack.c.b16 %v3214_v32, %v3213_v44 }
 0x3ad   : > { %3211 = vrot.lane.b32.xlu0 %v3180_v16, %s4316_s28 }
 0x3ae   : > { %v3153_v14 = vpop.permute.xlu1 %3152 }
 0x3af   : > { %v3099_v19 = vpop.permute.xlu0 %3098  ;;  %v3278_v5 = vpop.permute.xlu2 %3277  ;;  %v3439_v17 = vsel %vm1802_vm15, %v3407_v38, %v3153_v14 }
 0x3b0   : > { %v3472_v54 = vsel %vm3464_vm4, %v3439_v17, %v6681_v39  ;;  %v4231_v39 = vld [vmem:[#allocation3 + $0x114] sm:$0xff] }
 0x3b1   : > { %v3505_v16 = vsel %vm3497_vm5, %v3472_v54, %v3223_v59  ;;  %v3361_v54 = vsel %vm1604_vm10, %v6434_v27, %v7210_v50 }
 0x3b4   : > { %3139 = vrot.lane.b32.xlu1 %v6652_v48, %s4311_s30  ;;  %3176 = vrot.lane.b32.xlu2 %v4230_v2, %s4312_s6  ;;  %v3358_v48 = vsel %vm1604_vm10, %v6376_v41, %v6306_v8 }
 0x3b5   : > { %3318 = vrot.lane.b32.xlu0 %v3287_v62, %s4315_s26  ;;  %v3393_v33 = vsel %vm1670_vm11, %v3358_v48, %v3099_v19 }
 0x3b6   : > { %v3260_v61 = vpop.permute.xlu1 %3259 }
 0x3b7   : > { %v3538_v18 = vsel %vm3530_vm8, %v3505_v16, %v3260_v61  ;;  %v3206_v11 = vpop.permute.xlu0 %3205  ;;  %v3155_v49 = vpop.permute.xlu2 %3154 }
 0x3b8   : > { %v3571_v24 = vsel %vm3563_vm7, %v3538_v18, %v3295_v6 }
 0x3b9   : > { %4177 = vmatmul.msk.bf16.gmra.mxu1 %vm3632_vm9, %v3571_v24 }
 0x3bc   : > { %3246 = vrot.lane.b32.xlu1 %v3215_v46, %s4313_s23  ;;  %3283 = vrot.lane.b32.xlu2 %v4231_v39, %s4314_s24 }
 0x3bd   : > { %3195 = vrot.lane.b32.xlu0 %v6280_v57, %s4316_s28  ;;  %v7206_v57 = vld [vmem:[#allocation6_spill] sm:$0xff] }
 0x3be   : > { %v3134_v2 = vpop.permute.xlu1 %3133 }
 0x3bf   : > { %v3313_v42 = vpop.permute.xlu0 %3312  ;;  %v3262_v10 = vpop.permute.xlu2 %3261  ;;  %v3425_v58 = vsel %vm1736_vm13, %v3393_v33, %v3134_v2 }
 0x3c0   : > { %v3457_v7 = vsel %vm1802_vm15, %v3425_v58, %v3171_v52  ;;  %v6767_v52 = vld [vmem:[%s6978_s4] ss:$0 sm:$0xff] }
 0x3c1   : > { %v3490_v8 = vsel %vm3464_vm4, %v3457_v7, %v3206_v11 }
 0x3c4   : > { %3123 = vrot.lane.b32.xlu1 %v5982_v55, %s4311_s30  ;;  %3160 = vrot.lane.b32.xlu2 %v4294_v1, %s4312_s6  ;;  %v4295_v55 = vld [vmem:[#allocation3 + $0x94] sm:$0xff] }
 0x3c5   : > { %3302 = vrot.lane.b32.xlu0 %v7206_v57, %s4315_s26 }
 0x3c6   : > { %v3241_v6 = vpop.permute.xlu1 %3240 }
 0x3c7   : > { %v3523_v41 = vsel %vm3497_vm5, %v3490_v8, %v3241_v6  ;;  %v3190_v63 = vpop.permute.xlu0 %3189  ;;  %v3136_v40 = vpop.permute.xlu2 %3135 }
 0x3c8   : > { %v3556_v25 = vsel %vm3530_vm8, %v3523_v41, %v3278_v5 }
 0x3c9   : > { %v3589_v34 = vsel %vm3563_vm7, %v3556_v25, %v3313_v42  ;;  %v7211_v25 = vld [vmem:[#allocation7_spill] sm:$0xff] }
 0x3ca   : > { %4186 = vmatmul.msk.bf16.gmra.mxu2 %vm3632_vm9, %v3589_v34 }
 0x3cc   : > { %3230 = vrot.lane.b32.xlu1 %v6312_v28, %s4313_s23  ;;  %3267 = vrot.lane.b32.xlu2 %v4295_v55, %s4314_s24 }
 0x3ce   : > { %v3118_v37 = vpop.permute.xlu1 %3117 }
 0x3cf   : > { %v3297_v31 = vpop.permute.xlu0 %3296  ;;  %v3409_v3 = vsel %vm1736_vm13, %v3377_v4, %v3118_v37  ;;  %v3243_v59 = vpop.permute.xlu2 %3242 }
 0x3d0   : > { %v3441_v28 = vsel %vm1802_vm15, %v3409_v3, %v3155_v49 }
 0x3d1   : > { %v3474_v47 = vsel %vm3464_vm4, %v3441_v28, %v3190_v63 }
 0x3d5   : > { %v3678_v13 = vpop.f32.mrf.mxu1 }
 0x3d6   : > { %v3760_v9 = vmul.f32 %v6767_v52, %v3678_v13  ;;  %v3225_v12 = vpop.permute.xlu1 %3224  ;;  %v3718_v36 = vpop.f32.mrf.mxu2 }
 0x3d7   : > { %v3507_v29 = vsel %vm3497_vm5, %v3474_v47, %v3225_v12  ;;  %v3173_v1 = vpop.permute.xlu0 %3172  ;;  %v3776_v22 = vmul.f32 %v6767_v52, %v3718_v36  ;;  %v3120_v14 = vpop.permute.xlu2 %3119 }
 0x3d8   : > { %v3794_v0 = vadd.f32 %v6773_v23, %v3760_v9  ;;  %v3540_v60 = vsel %vm3530_vm8, %v3507_v29, %v3262_v10  ;;  %v3411_v34 = vsel %vm1736_vm13, %v7211_v25, %v3120_v14 }
 0x3d9   : > { %v3810_v53 = vadd.f32 %v6773_v23, %v3776_v22  ;;  %v3573_v45 = vsel %vm3563_vm7, %v3540_v60, %v3297_v31  ;;  %v7212_v60 = vld [vmem:[#allocation10_spill] sm:$0xff] }
 0x3da   : > { %v3826_v21 = vmax.f32 %v3794_v0, 0.0  ;;  %4178 = vmatmul.msk.bf16.gmra.mxu1 %vm3632_vm9, %v3573_v45 }
 0x3db   : > { %v3842_v26 = vmax.f32 %v3810_v53, 0.0  ;;  %v3364_v53 = vsel %vm1604_vm10, %v6539_v30, %v7212_v60 }
 0x3dc   : > { %3858 = vst.msk [vmem:[%s6785_s21] sm:$0xff] %vm1604_vm10, %v3826_v21 }
 0x3dd   : > { %3874 = vst.msk [vmem:[%s6785_s21 + $0x80] sm:$0xff] %vm1604_vm10, %v3842_v26  ;;  %v3680_v38 = vpop.f32.mrf.mxu1 }
 0x3de   : > { %v3761_v19 = vmul.f32 %v6767_v52, %v3680_v38  ;;  %v3101_v5 = vpop.permute.xlu1 %3100  ;;  %v3720_v17 = vpop.f32.mrf.mxu2 }
 0x3df   : > { %v3280_v62 = vpop.permute.xlu0 %3279  ;;  %v3777_v43 = vmul.f32 %v6767_v52, %v3720_v17  ;;  %v3395_v32 = vsel %vm1670_vm11, %v3361_v54, %v3101_v5  ;;  %v3227_v49 = vpop.permute.xlu2 %3226 }
 0x3e0   : > { %v3795_v44 = vadd.f32 %v6773_v23, %v3761_v19  ;;  %v3427_v11 = vsel %vm1736_vm13, %v3395_v32, %v3136_v40 }
 0x3e1   : > { %v3811_v61 = vadd.f32 %v6773_v23, %v3777_v43  ;;  %v3459_v46 = vsel %vm1802_vm15, %v3427_v11, %v3173_v1 }
 0x3e2   : > { %v3827_v16 = vmax.f32 %v3795_v44, 0.0 }
 0x3e3   : > { %v3843_v18 = vmax.f32 %v3811_v61, 0.0 }
 0x3e4   : > { %3859 = vst.msk [vmem:[%s6785_s21 + $0x8] sm:$0xff] %vm1604_vm10, %v3827_v16 }
 0x3e5   : > { %3875 = vst.msk [vmem:[%s6785_s21 + $0x88] sm:$0xff] %vm1604_vm10, %v3843_v18 }
 0x3e6   : > { %v3208_v24 = vpop.permute.xlu1 %3207 }
 0x3e7   : > { %v3157_v27 = vpop.permute.xlu0 %3156  ;;  %v3492_v39 = vsel %vm3464_vm4, %v3459_v46, %v3208_v24  ;;  %v3103_v7 = vpop.permute.xlu2 %3102 }
 0x3e8   : > { %v3525_v48 = vsel %vm3497_vm5, %v3492_v39, %v3243_v59  ;;  %v3443_v56 = vsel %vm1802_vm15, %v3411_v34, %v3157_v27  ;;  %v3397_v45 = vsel %vm1670_vm11, %v3364_v53, %v3103_v7  ;;  %v7213_v27 = vld [vmem:[#allocation13_spill] sm:$0xff] }
 0x3e9   : > { %v3558_v58 = vsel %vm3530_vm8, %v3525_v48, %v3280_v62 }
 0x3eb   : > { %v3723_v2 = vpop.f32.mrf.mxu2 }
 0x3ec   : > { %v3778_v33 = vmul.f32 %v6767_v52, %v3723_v2 }
 0x3ee   : > { %v3812_v42 = vadd.f32 %v6773_v23, %v3778_v33  ;;  %v3315_v10 = vpop.permute.xlu1 %3314 }
 0x3ef   : > { %v3264_v57 = vpop.permute.xlu0 %3263  ;;  %v3591_v6 = vsel %vm3563_vm7, %v3558_v58, %v3315_v10  ;;  %v3210_v3 = vpop.permute.xlu2 %3209 }
 0x3f0   : > { %v3844_v8 = vmax.f32 %v3812_v42, 0.0  ;;  %4187 = vmatmul.msk.bf16.gmra.mxu2 %vm3632_vm9, %v3591_v6 }
 0x3f2   : > { %3876 = vst.msk [vmem:[%s6785_s21 + $0x90] sm:$0xff] %vm1604_vm10, %v3844_v8 }
 0x3f3   : > { %v3725_v41 = vpop.f32.mrf.mxu2 }
 0x3f4   : > { %v3779_v63 = vmul.f32 %v6767_v52, %v3725_v41 }
 0x3f5   : > { %v3683_v40 = vpop.f32.mrf.mxu1 }
 0x3f6   : > { %v3813_v55 = vadd.f32 %v6773_v23, %v3779_v63  ;;  %v3762_v20 = vmul.f32 %v6767_v52, %v3683_v40  ;;  %v3192_v35 = vpop.permute.xlu1 %3191 }
 0x3f7   : > { %v3138_v37 = vpop.permute.xlu0 %3137  ;;  %v3476_v31 = vsel %vm3464_vm4, %v3443_v56, %v3192_v35  ;;  %v3317_v0 = vpop.permute.xlu2 %3316  ;;  %v7214_v35 = vld [vmem:[#allocation9_spill] sm:$0xff] }
 0x3f8   : > { %v3845_v51 = vmax.f32 %v3813_v55, 0.0  ;;  %v3796_v4 = vadd.f32 %v6773_v23, %v3762_v20  ;;  %v3509_v28 = vsel %vm3497_vm5, %v3476_v31, %v3227_v49  ;;  %v3429_v26 = vsel %vm1736_vm13, %v3397_v45, %v3138_v37 }
 0x3f9   : > { %v3542_v47 = vsel %vm3530_vm8, %v3509_v28, %v3264_v57  ;;  %v3367_v56 = vsel %vm1604_vm10, %v6600_v15, %v7214_v35 }
 0x3fa   : > { %3877 = vst.msk [vmem:[%s6785_s21 + $0x98] sm:$0xff] %vm1604_vm10, %v3845_v51  ;;  %v3828_v59 = vmax.f32 %v3796_v4, 0.0 }
 0x3fc   : > { %3860 = vst.msk [vmem:[%s6785_s21 + $0x10] sm:$0xff] %vm1604_vm10, %v3828_v59 }
 0x3fd   : > { %v3685_v13 = vpop.f32.mrf.mxu1 }
 0x3fe   : > { %v3763_v9 = vmul.f32 %v6767_v52, %v3685_v13  ;;  %v3299_v12 = vpop.permute.xlu1 %3298 }
 0x3ff   : > { %v3245_v36 = vpop.permute.xlu0 %3244  ;;  %v3575_v29 = vsel %vm3563_vm7, %v3542_v47, %v3299_v12  ;;  %v3194_v62 = vpop.permute.xlu2 %3193 }
 0x400   : > { %v3797_v1 = vadd.f32 %v6773_v23, %v3763_v9  ;;  %4179 = vmatmul.msk.bf16.gmra.mxu1 %vm3632_vm9, %v3575_v29 }
 0x402   : > { %v3829_v22 = vmax.f32 %v3797_v1, 0.0 }
 0x404   : > { %3861 = vst.msk [vmem:[%s6785_s21 + $0x18] sm:$0xff] %vm1604_vm10, %v3829_v22 }
 0x406   : > { %v3175_v21 = vpop.permute.xlu1 %3174 }
 0x407   : > { %v3122_v14 = vpop.permute.xlu0 %3121  ;;  %v3461_v38 = vsel %vm1802_vm15, %v3429_v26, %v3175_v21  ;;  %v3301_v48 = vpop.permute.xlu2 %3300 }
 0x408   : > { %v3494_v19 = vsel %vm3464_vm4, %v3461_v38, %v3210_v3  ;;  %v3413_v39 = vsel %vm1736_vm13, %v7213_v27, %v3122_v14  ;;  %v7215_v38 = vld [vmem:[#allocation17_spill] sm:$0xff] }
 0x409   : > { %v3527_v30 = vsel %vm3497_vm5, %v3494_v19, %v3245_v36 }
 0x40b   : > { %v3728_v5 = vpop.f32.mrf.mxu2 }
 0x40c   : > { %v3780_v17 = vmul.f32 %v6767_v52, %v3728_v5 }
 0x40e   : > { %v3814_v43 = vadd.f32 %v6773_v23, %v3780_v17  ;;  %v3282_v50 = vpop.permute.xlu1 %3281 }
 0x40f   : > { %v3560_v54 = vsel %vm3530_vm8, %v3527_v30, %v3282_v50  ;;  %v3229_v44 = vpop.permute.xlu0 %3228  ;;  %v3177_v34 = vpop.permute.xlu2 %3176 }
 0x410   : > { %v3846_v32 = vmax.f32 %v3814_v43, 0.0  ;;  %v3593_v61 = vsel %vm3563_vm7, %v3560_v54, %v3317_v0 }
 0x411   : > { %4188 = vmatmul.msk.bf16.gmra.mxu2 %vm3632_vm9, %v3593_v61 }
 0x412   : > { %3878 = vst.msk [vmem:[%s6785_s21 + $0xa0] sm:$0xff] %vm1604_vm10, %v3846_v32 }
 0x413   : > { %v3730_v16 = vpop.f32.mrf.mxu2 }
 0x414   : > { %v3781_v18 = vmul.f32 %v6767_v52, %v3730_v16 }
 0x415   : > { %v3688_v11 = vpop.f32.mrf.mxu1 }
 0x416   : > { %v3815_v49 = vadd.f32 %v6773_v23, %v3781_v18  ;;  %v3764_v24 = vmul.f32 %v6767_v52, %v3688_v11  ;;  %v3159_v46 = vpop.permute.xlu1 %3158 }
 0x417   : > { %v3105_v2 = vpop.permute.xlu0 %3104  ;;  %v3445_v10 = vsel %vm1802_vm15, %v3413_v39, %v3159_v46  ;;  %v3284_v31 = vpop.permute.xlu2 %3283 }
 0x418   : > { %v3847_v33 = vmax.f32 %v3815_v49, 0.0  ;;  %v3798_v42 = vadd.f32 %v6773_v23, %v3764_v24  ;;  %v3478_v7 = vsel %vm3464_vm4, %v3445_v10, %v3194_v62  ;;  %v3399_v51 = vsel %vm1670_vm11, %v3367_v56, %v3105_v2 }
 0x419   : > { %v3511_v41 = vsel %vm3497_vm5, %v3478_v7, %v3229_v44 }
 0x41a   : > { %3879 = vst.msk [vmem:[%s6785_s21 + $0xa8] sm:$0xff] %vm1604_vm10, %v3847_v33  ;;  %v3830_v58 = vmax.f32 %v3798_v42, 0.0 }
 0x41c   : > { %3862 = vst.msk [vmem:[%s6785_s21 + $0x20] sm:$0xff] %vm1604_vm10, %v3830_v58 }
 0x41d   : > { %v3690_v57 = vpop.f32.mrf.mxu1 }
 0x41e   : > { %v3765_v6 = vmul.f32 %v6767_v52, %v3690_v57  ;;  %v3266_v8 = vpop.permute.xlu1 %3265 }
 0x41f   : > { %v3544_v63 = vsel %vm3530_vm8, %v3511_v41, %v3266_v8  ;;  %v3212_v55 = vpop.permute.xlu0 %3211  ;;  %v3161_v0 = vpop.permute.xlu2 %3160 }
 0x420   : > { %v3799_v40 = vadd.f32 %v6773_v23, %v3765_v6  ;;  %v3577_v25 = vsel %vm3563_vm7, %v3544_v63, %v3301_v48 }
 0x421   : > { %4180 = vmatmul.msk.bf16.gmra.mxu1 %vm3632_vm9, %v3577_v25 }
 0x422   : > { %v3831_v20 = vmax.f32 %v3799_v40, 0.0 }
 0x424   : > { %3863 = vst.msk [vmem:[%s6785_s21 + $0x28] sm:$0xff] %vm1604_vm10, %v3831_v20 }
 0x426   : > { %v3140_v37 = vpop.permute.xlu1 %3139 }
 0x427   : > { %v3431_v4 = vsel %vm1736_vm13, %v3399_v51, %v3140_v37  ;;  %v3319_v59 = vpop.permute.xlu0 %3318  ;;  %v3268_v44 = vpop.permute.xlu2 %3267 }
 0x428   : > { %v3463_v3 = vsel %vm1802_vm15, %v3431_v4, %v3177_v34 }
 0x429   : > { %v3496_v12 = vsel %vm3464_vm4, %v3463_v3, %v3212_v55 }
 0x42c   : > { %v3733_v28 = vpop.f32.mrf.mxu2 }
 0x42d   : > { %v3782_v13 = vmul.f32 %v6767_v52, %v3733_v28 }
 0x42e   : > { %v3247_v9 = vpop.permute.xlu1 %3246 }
 0x42f   : > { %v3816_v47 = vadd.f32 %v6773_v23, %v3782_v13  ;;  %v3529_v15 = vsel %vm3497_vm5, %v3496_v12, %v3247_v9  ;;  %v3196_v60 = vpop.permute.xlu0 %3195 }
 0x430   : > { %v3562_v36 = vsel %vm3530_vm8, %v3529_v15, %v3284_v31 }
 0x431   : > { %v3848_v29 = vmax.f32 %v3816_v47, 0.0  ;;  %v3595_v1 = vsel %vm3563_vm7, %v3562_v36, %v3319_v59 }
 0x432   : > { %4189 = vmatmul.msk.bf16.gmra.mxu2 %vm3632_vm9, %v3595_v1 }
 0x433   : > { %3880 = vst.msk [vmem:[%s6785_s21 + $0xb0] sm:$0xff] %vm1604_vm10, %v3848_v29 }
 0x434   : > { %v3735_v22 = vpop.f32.mrf.mxu2 }
 0x435   : > { %v3783_v53 = vmul.f32 %v6767_v52, %v3735_v22 }
 0x436   : > { %v3124_v45 = vpop.permute.xlu1 %3123  ;;  %v3693_v21 = vpop.f32.mrf.mxu1 }
 0x437   : > { %v3817_v26 = vadd.f32 %v6773_v23, %v3783_v53  ;;  %v3766_v14 = vmul.f32 %v6767_v52, %v3693_v21  ;;  %v3415_v19 = vsel %vm1736_vm13, %v7215_v38, %v3124_v45  ;;  %v3303_v16 = vpop.permute.xlu0 %3302 }
 0x438   : > { %v3447_v62 = vsel %vm1802_vm15, %v3415_v19, %v3161_v0 }
 0x439   : > { %v3849_v5 = vmax.f32 %v3817_v26, 0.0  ;;  %v3800_v17 = vadd.f32 %v6773_v23, %v3766_v14  ;;  %v3480_v30 = vsel %vm3464_vm4, %v3447_v62, %v3196_v60 }
 0x43b   : > { %3881 = vst.msk [vmem:[%s6785_s21 + $0xb8] sm:$0xff] %vm1604_vm10, %v3849_v5  ;;  %v3832_v43 = vmax.f32 %v3800_v17, 0.0 }
 0x43d   : > { %3864 = vst.msk [vmem:[%s6785_s21 + $0x30] sm:$0xff] %vm1604_vm10, %v3832_v43 }
 0x43e   : > { %v3231_v50 = vpop.permute.xlu1 %3230  ;;  %v3695_v54 = vpop.f32.mrf.mxu1 }
 0x43f   : > { %v3513_v32 = vsel %vm3497_vm5, %v3480_v30, %v3231_v50  ;;  %v3767_v61 = vmul.f32 %v6767_v52, %v3695_v54 }
 0x440   : > { %v3546_v18 = vsel %vm3530_vm8, %v3513_v32, %v3268_v44 }
 0x441   : > { %v3801_v11 = vadd.f32 %v6773_v23, %v3767_v61  ;;  %v3579_v49 = vsel %vm3563_vm7, %v3546_v18, %v3303_v16 }
 0x442   : > { %4181 = vmatmul.msk.bf16.gmra.mxu1 %vm3632_vm9, %v3579_v49 }
 0x443   : > { %v3833_v24 = vmax.f32 %v3801_v11, 0.0 }
 0x445   : > { %3865 = vst.msk [vmem:[%s6785_s21 + $0x38] sm:$0xff] %vm1604_vm10, %v3833_v24 }
 0x44d   : > { %v3738_v46 = vpop.f32.mrf.mxu2 }
 0x44e   : > { %v3784_v27 = vmul.f32 %v6767_v52, %v3738_v46 }
 0x450   : > { %v3818_v39 = vadd.f32 %v6773_v23, %v3784_v27 }
 0x452   : > { %v3850_v48 = vmax.f32 %v3818_v39, 0.0 }
 0x454   : > { %3882 = vst.msk [vmem:[%s6785_s21 + $0xc0] sm:$0xff] %vm1604_vm10, %v3850_v48 }
 0x455   : > { %v3740_v2 = vpop.f32.mrf.mxu2 }
 0x456   : > { %v3785_v33 = vmul.f32 %v6767_v52, %v3740_v2 }
 0x457   : > { %v3698_v42 = vpop.f32.mrf.mxu1 }
 0x458   : > { %v3819_v10 = vadd.f32 %v6773_v23, %v3785_v33  ;;  %v3768_v58 = vmul.f32 %v6767_v52, %v3698_v42 }
 0x45a   : > { %v3851_v7 = vmax.f32 %v3819_v10, 0.0  ;;  %v3802_v57 = vadd.f32 %v6773_v23, %v3768_v58 }
 0x45c   : > { %3883 = vst.msk [vmem:[%s6785_s21 + $0xc8] sm:$0xff] %vm1604_vm10, %v3851_v7  ;;  %v3834_v6 = vmax.f32 %v3802_v57, 0.0 }
 0x45e   : > { %3866 = vst.msk [vmem:[%s6785_s21 + $0x40] sm:$0xff] %vm1604_vm10, %v3834_v6 }
 0x45f   : > { %v3700_v8 = vpop.f32.mrf.mxu1 }
 0x460   : > { %v3769_v41 = vmul.f32 %v6767_v52, %v3700_v8 }
 0x462   : > { %v3803_v63 = vadd.f32 %v6773_v23, %v3769_v41 }
 0x464   : > { %v3835_v40 = vmax.f32 %v3803_v63, 0.0 }
 0x466   : > { %3867 = vst.msk [vmem:[%s6785_s21 + $0x48] sm:$0xff] %vm1604_vm10, %v3835_v40 }
 0x473   : > { %v3743_v25 = vpop.f32.mrf.mxu2 }
 0x474   : > { %v3786_v34 = vmul.f32 %v6767_v52, %v3743_v25 }
 0x476   : > { %v3820_v55 = vadd.f32 %v6773_v23, %v3786_v34 }
 0x478   : > { %v3852_v20 = vmax.f32 %v3820_v55, 0.0 }
 0x47a   : > { %3884 = vst.msk [vmem:[%s6785_s21 + $0xd0] sm:$0xff] %vm1604_vm10, %v3852_v20 }
 0x47b   : > { %v3745_v35 = vpop.f32.mrf.mxu2 }
 0x47c   : > { %v3787_v56 = vmul.f32 %v6767_v52, %v3745_v35 }
 0x47d   : > { %v3703_v37 = vpop.f32.mrf.mxu1 }
 0x47e   : > { %v3821_v51 = vadd.f32 %v6773_v23, %v3787_v56  ;;  %v3770_v4 = vmul.f32 %v6767_v52, %v3703_v37 }
 0x480   : > { %v3853_v31 = vmax.f32 %v3821_v51, 0.0  ;;  %v3804_v3 = vadd.f32 %v6773_v23, %v3770_v4 }
 0x482   : > { %3885 = vst.msk [vmem:[%s6785_s21 + $0xd8] sm:$0xff] %vm1604_vm10, %v3853_v31  ;;  %v3836_v59 = vmax.f32 %v3804_v3, 0.0 }
 0x484   : > { %3868 = vst.msk [vmem:[%s6785_s21 + $0x50] sm:$0xff] %vm1604_vm10, %v3836_v59 }
 0x485   : > { %v3705_v28 = vpop.f32.mrf.mxu1 }
 0x486   : > { %v3771_v13 = vmul.f32 %v6767_v52, %v3705_v28 }
 0x488   : > { %v3805_v9 = vadd.f32 %v6773_v23, %v3771_v13 }
 0x48a   : > { %v3837_v12 = vmax.f32 %v3805_v9, 0.0 }
 0x48c   : > { %3869 = vst.msk [vmem:[%s6785_s21 + $0x58] sm:$0xff] %vm1604_vm10, %v3837_v12 }
 0x494   : > { %v3748_v47 = vpop.f32.mrf.mxu2 }
 0x495   : > { %v3788_v15 = vmul.f32 %v6767_v52, %v3748_v47 }
 0x497   : > { %v3822_v36 = vadd.f32 %v6773_v23, %v3788_v15 }
 0x499   : > { %v3854_v29 = vmax.f32 %v3822_v36, 0.0 }
 0x49b   : > { %3886 = vst.msk [vmem:[%s6785_s21 + $0xe0] sm:$0xff] %vm1604_vm10, %v3854_v29 }
 0x49c   : > { %v3750_v1 = vpop.f32.mrf.mxu2 }
 0x49d   : > { %v3789_v22 = vmul.f32 %v6767_v52, %v3750_v1 }
 0x49e   : > { %v3708_v0 = vpop.f32.mrf.mxu1 }
 0x49f   : > { %v3823_v60 = vadd.f32 %v6773_v23, %v3789_v22  ;;  %v3772_v53 = vmul.f32 %v6767_v52, %v3708_v0 }
 0x4a1   : > { %v3855_v45 = vmax.f32 %v3823_v60, 0.0  ;;  %v3806_v21 = vadd.f32 %v6773_v23, %v3772_v53 }
 0x4a3   : > { %3887 = vst.msk [vmem:[%s6785_s21 + $0xe8] sm:$0xff] %vm1604_vm10, %v3855_v45  ;;  %v3838_v26 = vmax.f32 %v3806_v21, 0.0 }
 0x4a5   : > { %3870 = vst.msk [vmem:[%s6785_s21 + $0x60] sm:$0xff] %vm1604_vm10, %v3838_v26 }
 0x4a6   : > { %v3710_v14 = vpop.f32.mrf.mxu1 }
 0x4a7   : > { %v3773_v38 = vmul.f32 %v6767_v52, %v3710_v14 }
 0x4a9   : > { %v3807_v19 = vadd.f32 %v6773_v23, %v3773_v38 }
 0x4ab   : > { %v3839_v5 = vmax.f32 %v3807_v19, 0.0 }
 0x4ad   : > { %3871 = vst.msk [vmem:[%s6785_s21 + $0x68] sm:$0xff] %vm1604_vm10, %v3839_v5 }
 0x4b5   : > { %v3753_v17 = vpop.f32.mrf.mxu2 }
 0x4b6   : > { %v3790_v62 = vmul.f32 %v6767_v52, %v3753_v17 }
 0x4b8   : > { %v3824_v43 = vadd.f32 %v6773_v23, %v3790_v62 }
 0x4ba   : > { %v3856_v50 = vmax.f32 %v3824_v43, 0.0 }
 0x4bc   : > { %3888 = vst.msk [vmem:[%s6785_s21 + $0xf0] sm:$0xff] %vm1604_vm10, %v3856_v50 }
 0x4bd   : > { %v3755_v30 = vpop.f32.mrf.mxu2 }
 0x4be   : > { %v3791_v54 = vmul.f32 %v6767_v52, %v3755_v30 }
 0x4bf   : > { %v3713_v44 = vpop.f32.mrf.mxu1 }
 0x4c0   : > { %v3825_v32 = vadd.f32 %v6773_v23, %v3791_v54  ;;  %v3774_v61 = vmul.f32 %v6767_v52, %v3713_v44 }
 0x4c2   : > { %v3857_v16 = vmax.f32 %v3825_v32, 0.0  ;;  %v3808_v18 = vadd.f32 %v6773_v23, %v3774_v61 }
 0x4c4   : > { %3889 = vst.msk [vmem:[%s6785_s21 + $0xf8] sm:$0xff] %vm1604_vm10, %v3857_v16  ;;  %v3840_v11 = vmax.f32 %v3808_v18, 0.0 }
 0x4c6   : > { %3872 = vst.msk [vmem:[%s6785_s21 + $0x70] sm:$0xff] %vm1604_vm10, %v3840_v11 }
 0x4c7   : > { %v3715_v49 = vpop.f32.mrf.mxu1 }
 0x4c8   : > { %v3775_v24 = vmul.f32 %v6767_v52, %v3715_v49 }
 0x4ca   : > { %v3809_v46 = vadd.f32 %v6773_v23, %v3775_v24 }
 0x4cc   : > { %v3841_v27 = vmax.f32 %v3809_v46, 0.0 }
 0x4ce   : > { %3873 = vst.msk [vmem:[%s6785_s21 + $0x78] sm:$0xff] %vm1604_vm10, %v3841_v27 }
 0x4cf PF: > { %s15_s18 = sadd.s32 1, %s4302_s18  }
 0x4d0   : > { %p12_p4 = scmp.ge.s32.totalorder %s15_s18, 4  }
 0x4d2   :  { %14 = sbr.rel (!%p12_p4) target bundleno = 1 (0x1), region = 74 }

</bundles_post_ra>
